<compile_context>
chip_gen: v6e
topology: v6e:2x2x1
jax: 0.10.0
libtpu: 0.0.40
codegen_flags: <defaults>
</compile_context>

<pallas_src>
import functools

import jax
import jax.numpy as jnp
from jax import lax
from jax.experimental import pallas as pl
from jax.experimental.pallas import tpu as pltpu

BN_EPS = 1e-5
LEAKY_SLOPE = 0.2
NUM_CLASSES = 10
ROWS_PER_STEP = 1024          # target GEMM M rows per grid step


# ----------------------------------------------------------------------------
# Pallas kernels
# ----------------------------------------------------------------------------
def _conv_gemm_kernel(x_ref, w_ref, o_ref, *, leaky_slope):
    """One conv layer (+ folded eval-BN) + LeakyReLU as a single GEMM.

    x_ref: (B, Pt, K)    bf16 im2col patches (Pt = spatial tile, K = 16*Cin)
    w_ref: (K, Cout)     bf16 GEMM weight (eval-BN scale folded), VMEM-resident
    o_ref: (B, Pt, Cout) bf16
    """
    B, Pt, K = x_ref.shape
    Cout = w_ref.shape[-1]
    # Fold batch into the matmul M dimension (Pt is a multiple of 16, so this
    # is a layout-preserving collapse of leading dims).
    lhs = x_ref[...].reshape(B * Pt, K)
    acc = jnp.dot(lhs, w_ref[...], preferred_element_type=jnp.float32)
    y = jnp.where(acc > 0, acc, leaky_slope * acc)        # LeakyReLU(0.2), f32
    o_ref[...] = y.reshape(B, Pt, Cout).astype(o_ref.dtype)


def _head_kernel(x_ref, w5_ref, wfc_ref, bfc_ref, dis_ref, cls_ref):
    """Fused conv5 (full 4x4 contraction) + fc_dis/sigmoid + fc_aux/softmax.

    x_ref  : (N, 16*8f) bf16  flattened conv4 output, row order (p, channel)
    w5_ref : (16*8f, f) bf16  conv5 weight flattened the same way
    wfc_ref: (f, 11)    f32   cols 0..9 = fc_aux, col 10 = fc_dis
    bfc_ref: (1, 11)    f32
    """
    feats = jnp.dot(x_ref[...], w5_ref[...],
                    preferred_element_type=jnp.float32)            # (N, f)
    logits = jnp.dot(feats, wfc_ref[...],
                     preferred_element_type=jnp.float32) + bfc_ref[...]
    # fc_dis + sigmoid (column 10)
    d = logits[:, NUM_CLASSES:NUM_CLASSES + 1]
    dis_ref[...] = 1.0 / (1.0 + jnp.exp(-d))
    # fc_aux + softmax(dim=1) (columns 0..9)
    cl = logits[:, :NUM_CLASSES]
    m = jnp.max(cl, axis=1, keepdims=True)
    e = jnp.exp(cl - m)
    cls_ref[...] = e / jnp.sum(e, axis=1, keepdims=True)


# ----------------------------------------------------------------------------
# pallas_call wrappers
# ----------------------------------------------------------------------------
def _pick_batch_tile(n, max_tile=8):
    """Largest divisor of n that is <= max_tile (bounds VMEM per grid step)."""
    for t in range(min(n, max_tile), 0, -1):
        if n % t == 0:
            return t
    return 1


def _pow2_divisor_at_most(n, cap):
    """Largest power-of-two divisor of n that is <= cap (cap >= 1)."""
    d = 1
    while d * 2 <= cap and n % (d * 2) == 0:
        d *= 2
    return d


def conv_gemm(x_col, w, *, batch_tile=None):
    """x_col: (N, P, K) bf16 im2col patches; w: (K, Cout) bf16.

    Returns (N, P, Cout) bf16 = LeakyReLU(x_col @ w).
    """
    N, P, K = x_col.shape
    Cout = w.shape[-1]
    bt = batch_tile or _pick_batch_tile(N)
    ptile = _pow2_divisor_at_most(P, max(16, ROWS_PER_STEP // bt))
    kern = functools.partial(_conv_gemm_kernel, leaky_slope=LEAKY_SLOPE)
    return pl.pallas_call(
        kern,
        out_shape=jax.ShapeDtypeStruct((N, P, Cout), jnp.bfloat16),
        grid=(N // bt, P // ptile),
        in_specs=[
            pl.BlockSpec((bt, ptile, K), lambda n, p: (n, p, 0)),
            pl.BlockSpec((K, Cout), lambda n, p: (0, 0)),   # weights resident
        ],
        out_specs=pl.BlockSpec((bt, ptile, Cout), lambda n, p: (n, p, 0)),
        compiler_params=pltpu.CompilerParams(
            dimension_semantics=("parallel", "parallel")),   # v7x megacore
    )(x_col, w)


def head(x_flat, w5, wfc, bfc):
    """x_flat: (N, 16*8f) bf16. Returns (dis (N,1) f32, classes (N,10) f32)."""
    N = x_flat.shape[0]
    # Whole arrays fit VMEM comfortably for any realistic batch (4 KB/image),
    # so no grid is needed here.
    return pl.pallas_call(
        _head_kernel,
        out_shape=(jax.ShapeDtypeStruct((N, 1), jnp.float32),
                   jax.ShapeDtypeStruct((N, NUM_CLASSES), jnp.float32)),
    )(x_flat, w5, wfc, bfc)


# ----------------------------------------------------------------------------
# Plain-JAX glue: im2col patch extraction (dense in HBM; no in-kernel slicing)
# ----------------------------------------------------------------------------
def im2col(x, ksize, stride, pad):
    """(N,H,W,C) -> ((N, OH*OW, ksize*ksize*C), OH, OW); channel order (kh,kw,ci)."""
    N, H, W, C = x.shape
    OH = (H + 2 * pad - ksize) // stride + 1
    OW = (W + 2 * pad - ksize) // stride + 1
    xp = jnp.pad(x, ((0, 0), (pad, pad), (pad, pad), (0, 0)))
    cols = []
    for kh in range(ksize):
        for kw in range(ksize):
            cols.append(lax.slice(
                xp, (0, kh, kw, 0),
                (N, kh + (OH - 1) * stride + 1, kw + (OW - 1) * stride + 1, C),
                (1, stride, stride, 1)))
    out = jnp.concatenate(cols, axis=-1)                  # (N, OH, OW, k*k*C)
    return out.reshape(N, OH * OW, ksize * ksize * C), OH, OW


# ----------------------------------------------------------------------------
# Parameter construction (PyTorch layouts -> GEMM layouts, eval-BN folded)
# ----------------------------------------------------------------------------
def conv_weight_to_gemm(w, scale=1.0):
    """PyTorch conv weight (Cout, Cin, KH, KW) -> (KH*KW*Cin, Cout) bf16.

    Row order (kh, kw, ci) matches im2col packing; `scale` folds eval-BN."""
    Cout, Cin, KH, KW = w.shape
    w = jnp.transpose(w, (2, 3, 1, 0)).reshape(KH * KW * Cin, Cout)
    return (scale * w).astype(jnp.bfloat16)


def init_params(key, channels, features):
    f = features
    conv_dims = [(channels, f), (f, 2 * f), (2 * f, 4 * f), (4 * f, 8 * f)]
    has_bn = [False, True, True, True]
    # Eval-mode BN with fresh running stats: y = x / sqrt(1 + eps); fold into W.
    # TODO(synk): a trained checkpoint needs gamma/sqrt(var+eps) scale AND a
    # beta - mean*scale shift folded in (the shift would add a bias operand).
    bn_scale = float(1.0 / jnp.sqrt(1.0 + BN_EPS))
    keys = jax.random.split(key, 7)
    conv_w = []
    for i, ((cin, cout), bn) in enumerate(zip(conv_dims, has_bn)):
        w = 0.05 * jax.random.normal(keys[i], (cout, cin, 4, 4), jnp.float32)
        conv_w.append(conv_weight_to_gemm(w, bn_scale if bn else 1.0))
    w5 = 0.05 * jax.random.normal(keys[4], (f, 8 * f, 4, 4), jnp.float32)
    wd = 0.05 * jax.random.normal(keys[5], (1, f), jnp.float32)          # torch (out,in)
    wa = 0.05 * jax.random.normal(keys[6], (NUM_CLASSES, f), jnp.float32)
    wfc = jnp.concatenate([wa.T, wd.T], axis=1).astype(jnp.float32)      # (f, 11)
    bfc = jnp.zeros((1, NUM_CLASSES + 1), jnp.float32)
    return {
        "conv_w": conv_w,                        # 4 x (16*Cin, Cout) bf16
        "conv5_w": conv_weight_to_gemm(w5),      # (16*8f, f) bf16
        "fc_w": wfc,                             # (f, 11) f32: aux | dis
        "fc_b": bfc,                             # (1, 11) f32
    }


# ----------------------------------------------------------------------------
# Forward
# ----------------------------------------------------------------------------
def acgan_discriminator_forward(params, x_nchw, features, batch_tile=None):
    N, C, H, W = x_nchw.shape
    if H != 64 or W != 64:
        raise ValueError("ACGAN_Discriminator assumes 64x64 inputs "
                         "(the conv stack must reduce to a 1x1 map).")
    f = features
    assert params["conv5_w"].shape == (16 * 8 * f, f)
    x = jnp.transpose(x_nchw, (0, 2, 3, 1)).astype(jnp.bfloat16)   # NCHW -> NHWC

    # conv1..conv4 (+ folded eval-BN where present) + LeakyReLU, as batched GEMMs.
    # TODO(synk): Dropout(0.5) after the first four blocks is an eval-mode
    # identity here; training-mode masking would need pltpu.prng_* in-kernel.
    for w in params["conv_w"]:
        x_col, oh, ow = im2col(x, ksize=4, stride=2, pad=1)
        y = conv_gemm(x_col.astype(jnp.bfloat16), w, batch_tile=batch_tile)
        x = y.reshape(N, oh, ow, w.shape[-1])

    # conv5 (full 4x4 contraction) + fc_dis/sigmoid + fc_aux/softmax, fused.
    x_flat = x.reshape(N, 16 * 8 * f)            # row-major (p, channel) order
    return head(x_flat, params["conv5_w"], params["fc_w"], params["fc_b"])


if __name__ == "__main__":
    channels, features, batch = 3, 16, 2
    key = jax.random.PRNGKey(0)
    pkey, xkey = jax.random.split(key)
    params = init_params(pkey, channels, features)
    # Input must be 64x64 so the conv stack reduces to 1x1 (as view(-1, f) assumes).
    x = jax.random.normal(xkey, (batch, channels, 64, 64), jnp.float32)

    fwd = jax.jit(functools.partial(acgan_discriminator_forward,
                                    features=features))
    out, classes = fwd(params, x)
    out, classes = jax.block_until_ready((out, classes))

    assert out.shape == (batch, 1) and classes.shape == (batch, NUM_CLASSES)
    assert bool(jnp.all((out > 0) & (out < 1)))
    assert bool(jnp.allclose(jnp.sum(classes, axis=1), 1.0, atol=1e-5))
    print("KERNEL_OK")
</pallas_src>

<mosaic_0001>
module attributes {stable_mosaic.version = 11 : i64} {
  func.func @_conv_gemm_kernel(%arg0: i32, %arg1: i32, %arg2: memref<2x512x48xbf16, #tpu.memory_space<vmem>>, %arg3: memref<48x16xbf16, #tpu.memory_space<vmem>>, %arg4: memref<2x512x16xbf16, #tpu.memory_space<vmem>>) attributes {dimension_semantics = [#tpu.dimension_semantics<parallel>, #tpu.dimension_semantics<parallel>], iteration_bounds = array<i64: 1, 2>, scalar_prefetch = 0 : i64, scratch_operands = 0 : i64, tpu.core_type = #tpu.core_type<tc>, window_params = [{transform_indices = @transform_0, window_bounds = array<i64: 2, 512, 48>}, {pipeline_mode = #tpu.pipeline_mode<synchronous>, transform_indices = @transform_1, window_bounds = array<i64: 48, 16>}, {transform_indices = @transform_2, window_bounds = array<i64: 2, 512, 16>}]} {
    %c0 = arith.constant 0 : index
    %c0_0 = arith.constant 0 : index
    %c0_1 = arith.constant 0 : index
    %0 = vector.load %arg2[%c0, %c0_0, %c0_1] : memref<2x512x48xbf16, #tpu.memory_space<vmem>>, vector<2x512x48xbf16>
    %1 = vector.shape_cast %0 : vector<2x512x48xbf16> to vector<1024x48xbf16>
    %c0_2 = arith.constant 0 : index
    %c0_3 = arith.constant 0 : index
    %2 = vector.load %arg3[%c0_2, %c0_3] : memref<48x16xbf16, #tpu.memory_space<vmem>>, vector<48x16xbf16>
    %cst = arith.constant dense<0.000000e+00> : vector<1024x16xf32>
    %3 = tpu.matmul %1, %2, %cst {dimension_numbers = #tpu.dot_dimension_numbers<[1], [0], [0], [1], [0, 0, 1, 1], [], []>} : vector<1024x48xbf16>, vector<48x16xbf16>, vector<1024x16xf32> -> vector<1024x16xf32>
    %cst_4 = arith.constant 0.000000e+00 : f32
    %4 = vector.broadcast %cst_4 : f32 to vector<1024x16xf32>
    %5 = arith.cmpf ogt, %3, %4 : vector<1024x16xf32>
    %cst_5 = arith.constant 2.000000e-01 : f32
    %6 = vector.broadcast %cst_5 : f32 to vector<1024x16xf32>
    %7 = arith.mulf %6, %3 : vector<1024x16xf32>
    %8 = arith.select %5, %3, %7 : vector<1024x16xi1>, vector<1024x16xf32>
    %9 = vector.shape_cast %8 : vector<1024x16xf32> to vector<2x512x16xf32>
    %10 = arith.truncf %9 : vector<2x512x16xf32> to vector<2x512x16xbf16>
    %c0_6 = arith.constant 0 : index
    %c0_7 = arith.constant 0 : index
    %c0_8 = arith.constant 0 : index
    %11 = vector.load %arg4[%c0_6, %c0_7, %c0_8] : memref<2x512x16xbf16, #tpu.memory_space<vmem>>, vector<2x512x16xbf16>
    tpu.vector_store %arg4[%c0_6, %c0_7, %c0_8], %10 {strides = array<i32>} : memref<2x512x16xbf16, #tpu.memory_space<vmem>>, vector<2x512x16xbf16>,
    return
  }
  func.func @transform_0(%arg0: i32, %arg1: i32) -> (i32, i32, i32) {
    %c0_i32 = arith.constant 0 : i32
    %c0_i32_0 = arith.constant 0 : i32
    return %arg0, %arg1, %c0_i32 : i32, i32, i32
  }
  func.func @transform_1(%arg0: i32, %arg1: i32) -> (i32, i32) {
    %c0_i32 = arith.constant 0 : i32
    %c0_i32_0 = arith.constant 0 : i32
    %c0_i32_1 = arith.constant 0 : i32
    return %c0_i32, %c0_i32_0 : i32, i32
  }
  func.func @transform_2(%arg0: i32, %arg1: i32) -> (i32, i32, i32) {
    %c0_i32 = arith.constant 0 : i32
    %c0_i32_0 = arith.constant 0 : i32
    return %arg0, %arg1, %c0_i32 : i32, i32, i32
  }
}

module attributes {stable_mosaic.version = 11 : i64} {
  func.func @_conv_gemm_kernel(%arg0: i32, %arg1: i32, %arg2: memref<2x256x256xbf16, #tpu.memory_space<vmem>>, %arg3: memref<256x32xbf16, #tpu.memory_space<vmem>>, %arg4: memref<2x256x32xbf16, #tpu.memory_space<vmem>>) attributes {dimension_semantics = [#tpu.dimension_semantics<parallel>, #tpu.dimension_semantics<parallel>], iteration_bounds = array<i64: 1, 1>, scalar_prefetch = 0 : i64, scratch_operands = 0 : i64, tpu.core_type = #tpu.core_type<tc>, window_params = [{transform_indices = @transform_0, window_bounds = array<i64: 2, 256, 256>}, {pipeline_mode = #tpu.pipeline_mode<synchronous>, transform_indices = @transform_1, window_bounds = array<i64: 256, 32>}, {transform_indices = @transform_2, window_bounds = array<i64: 2, 256, 32>}]} {
    %c0 = arith.constant 0 : index
    %c0_0 = arith.constant 0 : index
    %c0_1 = arith.constant 0 : index
    %0 = vector.load %arg2[%c0, %c0_0, %c0_1] : memref<2x256x256xbf16, #tpu.memory_space<vmem>>, vector<2x256x256xbf16>
    %1 = vector.shape_cast %0 : vector<2x256x256xbf16> to vector<512x256xbf16>
    %c0_2 = arith.constant 0 : index
    %c0_3 = arith.constant 0 : index
    %2 = vector.load %arg3[%c0_2, %c0_3] : memref<256x32xbf16, #tpu.memory_space<vmem>>, vector<256x32xbf16>
    %cst = arith.constant dense<0.000000e+00> : vector<512x32xf32>
    %3 = tpu.matmul %1, %2, %cst {dimension_numbers = #tpu.dot_dimension_numbers<[1], [0], [0], [1], [0, 0, 1, 1], [], []>} : vector<512x256xbf16>, vector<256x32xbf16>, vector<512x32xf32> -> vector<512x32xf32>
    %cst_4 = arith.constant 0.000000e+00 : f32
    %4 = vector.broadcast %cst_4 : f32 to vector<512x32xf32>
    %5 = arith.cmpf ogt, %3, %4 : vector<512x32xf32>
    %cst_5 = arith.constant 2.000000e-01 : f32
    %6 = vector.broadcast %cst_5 : f32 to vector<512x32xf32>
    %7 = arith.mulf %6, %3 : vector<512x32xf32>
    %8 = arith.select %5, %3, %7 : vector<512x32xi1>, vector<512x32xf32>
    %9 = vector.shape_cast %8 : vector<512x32xf32> to vector<2x256x32xf32>
    %10 = arith.truncf %9 : vector<2x256x32xf32> to vector<2x256x32xbf16>
    %c0_6 = arith.constant 0 : index
    %c0_7 = arith.constant 0 : index
    %c0_8 = arith.constant 0 : index
    %11 = vector.load %arg4[%c0_6, %c0_7, %c0_8] : memref<2x256x32xbf16, #tpu.memory_space<vmem>>, vector<2x256x32xbf16>
    tpu.vector_store %arg4[%c0_6, %c0_7, %c0_8], %10 {strides = array<i32>} : memref<2x256x32xbf16, #tpu.memory_space<vmem>>, vector<2x256x32xbf16>,
    return
  }
  func.func @transform_0(%arg0: i32, %arg1: i32) -> (i32, i32, i32) {
    %c0_i32 = arith.constant 0 : i32
    %c0_i32_0 = arith.constant 0 : i32
    return %arg0, %arg1, %c0_i32 : i32, i32, i32
  }
  func.func @transform_1(%arg0: i32, %arg1: i32) -> (i32, i32) {
    %c0_i32 = arith.constant 0 : i32
    %c0_i32_0 = arith.constant 0 : i32
    %c0_i32_1 = arith.constant 0 : i32
    return %c0_i32, %c0_i32_0 : i32, i32
  }
  func.func @transform_2(%arg0: i32, %arg1: i32) -> (i32, i32, i32) {
    %c0_i32 = arith.constant 0 : i32
    %c0_i32_0 = arith.constant 0 : i32
    return %arg0, %arg1, %c0_i32 : i32, i32, i32
  }
}

module attributes {stable_mosaic.version = 11 : i64} {
  func.func @_conv_gemm_kernel(%arg0: i32, %arg1: i32, %arg2: memref<2x64x512xbf16, #tpu.memory_space<vmem>>, %arg3: memref<512x64xbf16, #tpu.memory_space<vmem>>, %arg4: memref<2x64x64xbf16, #tpu.memory_space<vmem>>) attributes {dimension_semantics = [#tpu.dimension_semantics<parallel>, #tpu.dimension_semantics<parallel>], iteration_bounds = array<i64: 1, 1>, scalar_prefetch = 0 : i64, scratch_operands = 0 : i64, tpu.core_type = #tpu.core_type<tc>, window_params = [{transform_indices = @transform_0, window_bounds = array<i64: 2, 64, 512>}, {pipeline_mode = #tpu.pipeline_mode<synchronous>, transform_indices = @transform_1, window_bounds = array<i64: 512, 64>}, {transform_indices = @transform_2, window_bounds = array<i64: 2, 64, 64>}]} {
    %c0 = arith.constant 0 : index
    %c0_0 = arith.constant 0 : index
    %c0_1 = arith.constant 0 : index
    %0 = vector.load %arg2[%c0, %c0_0, %c0_1] : memref<2x64x512xbf16, #tpu.memory_space<vmem>>, vector<2x64x512xbf16>
    %1 = vector.shape_cast %0 : vector<2x64x512xbf16> to vector<128x512xbf16>
    %c0_2 = arith.constant 0 : index
    %c0_3 = arith.constant 0 : index
    %2 = vector.load %arg3[%c0_2, %c0_3] : memref<512x64xbf16, #tpu.memory_space<vmem>>, vector<512x64xbf16>
    %cst = arith.constant dense<0.000000e+00> : vector<128x64xf32>
    %3 = tpu.matmul %1, %2, %cst {dimension_numbers = #tpu.dot_dimension_numbers<[1], [0], [0], [1], [0, 0, 1, 1], [], []>} : vector<128x512xbf16>, vector<512x64xbf16>, vector<128x64xf32> -> vector<128x64xf32>
    %cst_4 = arith.constant 0.000000e+00 : f32
    %4 = vector.broadcast %cst_4 : f32 to vector<128x64xf32>
    %5 = arith.cmpf ogt, %3, %4 : vector<128x64xf32>
    %cst_5 = arith.constant 2.000000e-01 : f32
    %6 = vector.broadcast %cst_5 : f32 to vector<128x64xf32>
    %7 = arith.mulf %6, %3 : vector<128x64xf32>
    %8 = arith.select %5, %3, %7 : vector<128x64xi1>, vector<128x64xf32>
    %9 = vector.shape_cast %8 : vector<128x64xf32> to vector<2x64x64xf32>
    %10 = arith.truncf %9 : vector<2x64x64xf32> to vector<2x64x64xbf16>
    %c0_6 = arith.constant 0 : index
    %c0_7 = arith.constant 0 : index
    %c0_8 = arith.constant 0 : index
    %11 = vector.load %arg4[%c0_6, %c0_7, %c0_8] : memref<2x64x64xbf16, #tpu.memory_space<vmem>>, vector<2x64x64xbf16>
    tpu.vector_store %arg4[%c0_6, %c0_7, %c0_8], %10 {strides = array<i32>} : memref<2x64x64xbf16, #tpu.memory_space<vmem>>, vector<2x64x64xbf16>,
    return
  }
  func.func @transform_0(%arg0: i32, %arg1: i32) -> (i32, i32, i32) {
    %c0_i32 = arith.constant 0 : i32
    %c0_i32_0 = arith.constant 0 : i32
    return %arg0, %arg1, %c0_i32 : i32, i32, i32
  }
  func.func @transform_1(%arg0: i32, %arg1: i32) -> (i32, i32) {
    %c0_i32 = arith.constant 0 : i32
    %c0_i32_0 = arith.constant 0 : i32
    %c0_i32_1 = arith.constant 0 : i32
    return %c0_i32, %c0_i32_0 : i32, i32
  }
  func.func @transform_2(%arg0: i32, %arg1: i32) -> (i32, i32, i32) {
    %c0_i32 = arith.constant 0 : i32
    %c0_i32_0 = arith.constant 0 : i32
    return %arg0, %arg1, %c0_i32 : i32, i32, i32
  }
}

module attributes {stable_mosaic.version = 11 : i64} {
  func.func @_conv_gemm_kernel(%arg0: i32, %arg1: i32, %arg2: memref<2x16x1024xbf16, #tpu.memory_space<vmem>>, %arg3: memref<1024x128xbf16, #tpu.memory_space<vmem>>, %arg4: memref<2x16x128xbf16, #tpu.memory_space<vmem>>) attributes {dimension_semantics = [#tpu.dimension_semantics<parallel>, #tpu.dimension_semantics<parallel>], iteration_bounds = array<i64: 1, 1>, scalar_prefetch = 0 : i64, scratch_operands = 0 : i64, tpu.core_type = #tpu.core_type<tc>, window_params = [{transform_indices = @transform_0, window_bounds = array<i64: 2, 16, 1024>}, {pipeline_mode = #tpu.pipeline_mode<synchronous>, transform_indices = @transform_1, window_bounds = array<i64: 1024, 128>}, {transform_indices = @transform_2, window_bounds = array<i64: 2, 16, 128>}]} {
    %c0 = arith.constant 0 : index
    %c0_0 = arith.constant 0 : index
    %c0_1 = arith.constant 0 : index
    %0 = vector.load %arg2[%c0, %c0_0, %c0_1] : memref<2x16x1024xbf16, #tpu.memory_space<vmem>>, vector<2x16x1024xbf16>
    %1 = vector.shape_cast %0 : vector<2x16x1024xbf16> to vector<32x1024xbf16>
    %c0_2 = arith.constant 0 : index
    %c0_3 = arith.constant 0 : index
    %2 = vector.load %arg3[%c0_2, %c0_3] : memref<1024x128xbf16, #tpu.memory_space<vmem>>, vector<1024x128xbf16>
    %cst = arith.constant dense<0.000000e+00> : vector<32x128xf32>
    %3 = tpu.matmul %1, %2, %cst {dimension_numbers = #tpu.dot_dimension_numbers<[1], [0], [0], [1], [0, 0, 1, 1], [], []>} : vector<32x1024xbf16>, vector<1024x128xbf16>, vector<32x128xf32> -> vector<32x128xf32>
    %cst_4 = arith.constant 0.000000e+00 : f32
    %4 = vector.broadcast %cst_4 : f32 to vector<32x128xf32>
    %5 = arith.cmpf ogt, %3, %4 : vector<32x128xf32>
    %cst_5 = arith.constant 2.000000e-01 : f32
    %6 = vector.broadcast %cst_5 : f32 to vector<32x128xf32>
    %7 = arith.mulf %6, %3 : vector<32x128xf32>
    %8 = arith.select %5, %3, %7 : vector<32x128xi1>, vector<32x128xf32>
    %9 = vector.shape_cast %8 : vector<32x128xf32> to vector<2x16x128xf32>
    %10 = arith.truncf %9 : vector<2x16x128xf32> to vector<2x16x128xbf16>
    %c0_6 = arith.constant 0 : index
    %c0_7 = arith.constant 0 : index
    %c0_8 = arith.constant 0 : index
    %11 = vector.load %arg4[%c0_6, %c0_7, %c0_8] : memref<2x16x128xbf16, #tpu.memory_space<vmem>>, vector<2x16x128xbf16>
    tpu.vector_store %arg4[%c0_6, %c0_7, %c0_8], %10 {strides = array<i32>} : memref<2x16x128xbf16, #tpu.memory_space<vmem>>, vector<2x16x128xbf16>,
    return
  }
  func.func @transform_0(%arg0: i32, %arg1: i32) -> (i32, i32, i32) {
    %c0_i32 = arith.constant 0 : i32
    %c0_i32_0 = arith.constant 0 : i32
    return %arg0, %arg1, %c0_i32 : i32, i32, i32
  }
  func.func @transform_1(%arg0: i32, %arg1: i32) -> (i32, i32) {
    %c0_i32 = arith.constant 0 : i32
    %c0_i32_0 = arith.constant 0 : i32
    %c0_i32_1 = arith.constant 0 : i32
    return %c0_i32, %c0_i32_0 : i32, i32
  }
  func.func @transform_2(%arg0: i32, %arg1: i32) -> (i32, i32, i32) {
    %c0_i32 = arith.constant 0 : i32
    %c0_i32_0 = arith.constant 0 : i32
    return %arg0, %arg1, %c0_i32 : i32, i32, i32
  }
}

module attributes {stable_mosaic.version = 11 : i64} {
  func.func @_head_kernel(%arg0: memref<2x2048xbf16, #tpu.memory_space<vmem>>, %arg1: memref<2048x16xbf16, #tpu.memory_space<vmem>>, %arg2: memref<16x11xf32, #tpu.memory_space<vmem>>, %arg3: memref<1x11xf32, #tpu.memory_space<vmem>>, %arg4: memref<2x1xf32, #tpu.memory_space<vmem>>, %arg5: memref<2x10xf32, #tpu.memory_space<vmem>>) attributes {dimension_semantics = [], scalar_prefetch = 0 : i64, scratch_operands = 0 : i64, tpu.core_type = #tpu.core_type<tc>} {
    %c0 = arith.constant 0 : index
    %c0_0 = arith.constant 0 : index
    %0 = vector.load %arg0[%c0, %c0_0] : memref<2x2048xbf16, #tpu.memory_space<vmem>>, vector<2x2048xbf16>
    %c0_1 = arith.constant 0 : index
    %c0_2 = arith.constant 0 : index
    %1 = vector.load %arg1[%c0_1, %c0_2] : memref<2048x16xbf16, #tpu.memory_space<vmem>>, vector<2048x16xbf16>
    %cst = arith.constant dense<0.000000e+00> : vector<2x16xf32>
    %2 = tpu.matmul %0, %1, %cst {dimension_numbers = #tpu.dot_dimension_numbers<[1], [0], [0], [1], [0, 0, 1, 1], [], []>} : vector<2x2048xbf16>, vector<2048x16xbf16>, vector<2x16xf32> -> vector<2x16xf32>
    %c0_3 = arith.constant 0 : index
    %c0_4 = arith.constant 0 : index
    %3 = vector.load %arg2[%c0_3, %c0_4] : memref<16x11xf32, #tpu.memory_space<vmem>>, vector<16x11xf32>
    %cst_5 = arith.constant dense<0.000000e+00> : vector<2x11xf32>
    %4 = tpu.matmul %2, %3, %cst_5 {dimension_numbers = #tpu.dot_dimension_numbers<[1], [0], [0], [1], [0, 0, 1, 1], [], []>} : vector<2x16xf32>, vector<16x11xf32>, vector<2x11xf32> -> vector<2x11xf32>
    %c0_6 = arith.constant 0 : index
    %c0_7 = arith.constant 0 : index
    %5 = vector.load %arg3[%c0_6, %c0_7] : memref<1x11xf32, #tpu.memory_space<vmem>>, vector<1x11xf32>
    %6 = vector.broadcast %5 : vector<1x11xf32> to vector<2x11xf32>
    %7 = arith.addf %4, %6 : vector<2x11xf32>
    %8 = vector.extract_strided_slice %7 {offsets = [0, 10], sizes = [2, 1], strides = [1, 1]} : vector<2x11xf32> to vector<2x1xf32>
    %cst_8 = arith.constant 0.000000e+00 : f32
    %9 = vector.broadcast %cst_8 : f32 to vector<2x1xf32>
    %10 = arith.subf %9, %8 : vector<2x1xf32>
    %11 = math.exp %10 : vector<2x1xf32>
    %cst_9 = arith.constant 1.000000e+00 : f32
    %12 = vector.broadcast %cst_9 : f32 to vector<2x1xf32>
    %13 = arith.addf %12, %11 : vector<2x1xf32>
    %cst_10 = arith.constant 1.000000e+00 : f32
    %14 = vector.broadcast %cst_10 : f32 to vector<2x1xf32>
    %15 = arith.divf %14, %13 : vector<2x1xf32>
    %c0_11 = arith.constant 0 : index
    %c0_12 = arith.constant 0 : index
    %16 = vector.load %arg4[%c0_11, %c0_12] : memref<2x1xf32, #tpu.memory_space<vmem>>, vector<2x1xf32>
    tpu.vector_store %arg4[%c0_11, %c0_12], %15 {strides = array<i32>} : memref<2x1xf32, #tpu.memory_space<vmem>>, vector<2x1xf32>,
    %17 = vector.extract_strided_slice %7 {offsets = [0, 0], sizes = [2, 10], strides = [1, 1]} : vector<2x11xf32> to vector<2x10xf32>
    %cst_13 = arith.constant dense<0xFF800000> : vector<2xf32>
    %18 = vector.multi_reduction <maximumf>, %17, %cst_13 [1] : vector<2x10xf32> to vector<2xf32>
    %19 = vector.shape_cast %18 : vector<2xf32> to vector<2x1xf32>
    %20 = vector.broadcast %19 : vector<2x1xf32> to vector<2x10xf32>
    %21 = arith.subf %17, %20 : vector<2x10xf32>
    %22 = math.exp %21 : vector<2x10xf32>
    %cst_14 = arith.constant dense<0.000000e+00> : vector<2xf32>
    %23 = vector.multi_reduction <add>, %22, %cst_14 [1] : vector<2x10xf32> to vector<2xf32>
    %24 = vector.shape_cast %23 : vector<2xf32> to vector<2x1xf32>
    %25 = vector.broadcast %24 : vector<2x1xf32> to vector<2x10xf32>
    %26 = arith.divf %22, %25 : vector<2x10xf32>
    %c0_15 = arith.constant 0 : index
    %c0_16 = arith.constant 0 : index
    %27 = vector.load %arg5[%c0_15, %c0_16] : memref<2x10xf32, #tpu.memory_space<vmem>>, vector<2x10xf32>
    tpu.vector_store %arg5[%c0_15, %c0_16], %26 {strides = array<i32>} : memref<2x10xf32, #tpu.memory_space<vmem>>, vector<2x10xf32>,
    return
  }
}

</mosaic_0001>

<bundles_post_ra>
// kernel: acgan_discriminator_forward.5
= control target key start
LH: loop header
LB: loop body
LE: loop exit
PB: predicated region body
PF: predicated region fallthrough
CT: control target
= control target key end

     0   :  { %s4355_s9 = smov 0   ;;  %s4357_s10 = smov 0   ;;  %s5090_s0 = inlined_call_operand.vmem [shape: bf16[2,1024,48], index: 0, kind: input, shape index: {}]   ;;  %s5091_s1 = inlined_call_operand.vmem [shape: bf16[48,16], index: 1, kind: input, shape index: {}]   ;;  %s5092_s2 = inlined_call_operand.vmem [shape: bf16[2,1024,16], index: 2, kind: output, shape index: {}]  }
   0x1   :  { %s4359_s11 = smov 0   ;;  %s4361_s12 = smov 0  }
   0x2   :  { %s4363_s13 = smov 0  }
   0x3 LB: > { %s21_s14 = sadd.s32 1, %s4334_s12  ;;  %s3582_s15 = sadd.s32 4294967295, %s4338_s13   ;;  %s4338_s13 = sphi %s4363_s13, %s12_s13   ;;  %s4334_s12 = sphi %s4361_s12, %s5097_s12   ;;  %s4330_s11 = sphi %s4359_s11, %s5096_s11   ;;  %s4326_s10 = sphi %s4357_s10, %s5095_s10   ;;  %s4322_s9 = sphi %s4355_s9, %s5094_s9  }
   0x4   : > { %p22_p0 = scmp.ge.s32.totalorder %s21_s14, 2  ;;  %p40_p1 = scmp.ne.s32.totalorder %s4326_s10, %s4322_s9 }
   0x5   : > { %p41_p2 = scmp.eq.s32.totalorder %s4338_s13, 0  ;;  %p93_p4 = scmp.eq.s32.totalorder %s3582_s15, 1 }
   0x6   : > { %s5099_s14 = smov (%p22_p0, %s21_s14), 0  ;;  %s33_s17 = sadd.s32 1, %s4326_s10 }
   0x7   : > { %p42_p3 = por %p41_p2, %p40_p1  ;;  %s29_s16 = ssub.s32 %s4334_s12, %s5099_s14 }
   0x8   : > { %p31_p5 = scmp.eq.s32.totalorder %s29_s16, 0  ;;  %p4390_p6 = por %p93_p4, %p40_p1 }
   0x9   : > { %p3585_p7 = scmp.ge.s32.totalorder %s4338_s13, 2 }
   0xa   : > { %s4395_s19 = scalar_select %p31_p5, %s4326_s10, %s33_s17  }
   0xb   : > { %118 = sbr.rel (%p3585_p7) target bundleno = 52 (0x34), region = 20 }
  0x10   : > { %121 = sbr.rel (!%p42_p3) target bundleno = 52 (0x34), region = 24  ;;  %s123_s20 = sand.u32 (%p42_p3), 1, %s4326_s10  }
  0x11   : > { %s3856_s21 = sshll.u32 (%p42_p3), %s4334_s12, 8  ;;  %s3586_s22 = sshll.u32 (%p42_p3), %s123_s20, 9 }
  0x12   : > { %s4403_s25 = scalar_lea.vmem (%p42_p3), %s5090_s0, %s3856_s21  ;;  %s4408_s26 = scalar_lea.vmem (%p42_p3), [#allocation2], %s3586_s22 }
  0x13   : > { %v148_v0 = vld [vmem:[%s4403_s25] sm:$0xff] (%p42_p3)   ;;  %v152_v1 = vld [vmem:[%s4403_s25 + $0x8] sm:$0xff] (%p42_p3)   ;;  %v156_v2 = vld [vmem:[%s4403_s25 + $0x10] sm:$0xff] (%p42_p3)  }
  0x14   : > { %149 = vst [vmem:[%s4408_s26] sm:$0xff] (%p42_p3), %v148_v0   ;;  %153 = vst [vmem:[%s4408_s26 + $0x8] sm:$0xff] (%p42_p3), %v152_v1   ;;  %v160_v3 = vld [vmem:[%s4403_s25 + $0x18] sm:$0xff] (%p42_p3)   ;;  %v164_v4 = vld [vmem:[%s4403_s25 + $0x20] sm:$0xff] (%p42_p3)  }
  0x15   : > { %157 = vst [vmem:[%s4408_s26 + $0x10] sm:$0xff] %v156_v2   ;;  %v168_v5 = vld [vmem:[%s4403_s25 + $0x28] sm:$0xff]   ;;  %161 = vst [vmem:[%s4408_s26 + $0x18] sm:$0xff] %v160_v3   ;;  %v172_v6 = vld [vmem:[%s4403_s25 + $0x30] sm:$0xff]  }
  0x16   : > { %165 = vst [vmem:[%s4408_s26 + $0x20] sm:$0xff] %v164_v4   ;;  %169 = vst [vmem:[%s4408_s26 + $0x28] sm:$0xff] %v168_v5   ;;  %v176_v7 = vld [vmem:[%s4403_s25 + $0x38] sm:$0xff]   ;;  %v180_v8 = vld [vmem:[%s4403_s25 + $0x40] sm:$0xff]  }
  0x17   : > { %173 = vst [vmem:[%s4408_s26 + $0x30] sm:$0xff] %v172_v6   ;;  %177 = vst [vmem:[%s4408_s26 + $0x38] sm:$0xff] %v176_v7   ;;  %v184_v9 = vld [vmem:[%s4403_s25 + $0x48] sm:$0xff]   ;;  %v188_v10 = vld [vmem:[%s4403_s25 + $0x50] sm:$0xff]  }
  0x18   : > { %181 = vst [vmem:[%s4408_s26 + $0x40] sm:$0xff] %v180_v8   ;;  %v192_v11 = vld [vmem:[%s4403_s25 + $0x58] sm:$0xff]   ;;  %185 = vst [vmem:[%s4408_s26 + $0x48] sm:$0xff] %v184_v9   ;;  %v196_v12 = vld [vmem:[%s4403_s25 + $0x60] sm:$0xff]  }
  0x19   : > { %189 = vst [vmem:[%s4408_s26 + $0x50] sm:$0xff] %v188_v10   ;;  %193 = vst [vmem:[%s4408_s26 + $0x58] sm:$0xff] %v192_v11   ;;  %v200_v13 = vld [vmem:[%s4403_s25 + $0x68] sm:$0xff]   ;;  %v204_v14 = vld [vmem:[%s4403_s25 + $0x70] sm:$0xff]  }
  0x1a   : > { %197 = vst [vmem:[%s4408_s26 + $0x60] sm:$0xff] %v196_v12   ;;  %201 = vst [vmem:[%s4408_s26 + $0x68] sm:$0xff] %v200_v13   ;;  %v208_v15 = vld [vmem:[%s4403_s25 + $0x78] sm:$0xff]   ;;  %v212_v16 = vld [vmem:[%s4403_s25 + $0x80] sm:$0xff]  }
  0x1b   : > { %205 = vst [vmem:[%s4408_s26 + $0x70] sm:$0xff] %v204_v14   ;;  %v216_v17 = vld [vmem:[%s4403_s25 + $0x88] sm:$0xff]   ;;  %209 = vst [vmem:[%s4408_s26 + $0x78] sm:$0xff] %v208_v15   ;;  %v220_v18 = vld [vmem:[%s4403_s25 + $0x90] sm:$0xff]  }
  0x1c   : > { %213 = vst [vmem:[%s4408_s26 + $0x80] sm:$0xff] %v212_v16   ;;  %217 = vst [vmem:[%s4408_s26 + $0x88] sm:$0xff] %v216_v17   ;;  %v224_v19 = vld [vmem:[%s4403_s25 + $0x98] sm:$0xff]   ;;  %v228_v20 = vld [vmem:[%s4403_s25 + $0xa0] sm:$0xff]  }
  0x1d   : > { %221 = vst [vmem:[%s4408_s26 + $0x90] sm:$0xff] %v220_v18   ;;  %225 = vst [vmem:[%s4408_s26 + $0x98] sm:$0xff] %v224_v19   ;;  %v232_v21 = vld [vmem:[%s4403_s25 + $0xa8] sm:$0xff]   ;;  %v236_v22 = vld [vmem:[%s4403_s25 + $0xb0] sm:$0xff]  }
  0x1e   : > { %229 = vst [vmem:[%s4408_s26 + $0xa0] sm:$0xff] %v228_v20   ;;  %v240_v23 = vld [vmem:[%s4403_s25 + $0xb8] sm:$0xff]   ;;  %233 = vst [vmem:[%s4408_s26 + $0xa8] sm:$0xff] %v232_v21   ;;  %v244_v24 = vld [vmem:[%s4403_s25 + $0xc0] sm:$0xff]  }
  0x1f   : > { %237 = vst [vmem:[%s4408_s26 + $0xb0] sm:$0xff] %v236_v22   ;;  %241 = vst [vmem:[%s4408_s26 + $0xb8] sm:$0xff] %v240_v23   ;;  %v248_v25 = vld [vmem:[%s4403_s25 + $0xc8] sm:$0xff]   ;;  %v252_v26 = vld [vmem:[%s4403_s25 + $0xd0] sm:$0xff]  }
  0x20   : > { %245 = vst [vmem:[%s4408_s26 + $0xc0] sm:$0xff] %v244_v24   ;;  %249 = vst [vmem:[%s4408_s26 + $0xc8] sm:$0xff] %v248_v25   ;;  %v256_v27 = vld [vmem:[%s4403_s25 + $0xd8] sm:$0xff]   ;;  %v260_v28 = vld [vmem:[%s4403_s25 + $0xe0] sm:$0xff]  }
  0x21   : > { %253 = vst [vmem:[%s4408_s26 + $0xd0] sm:$0xff] %v252_v26   ;;  %v264_v29 = vld [vmem:[%s4403_s25 + $0xe8] sm:$0xff]   ;;  %257 = vst [vmem:[%s4408_s26 + $0xd8] sm:$0xff] %v256_v27   ;;  %v268_v30 = vld [vmem:[%s4403_s25 + $0xf0] sm:$0xff]  }
  0x22   : > { %261 = vst [vmem:[%s4408_s26 + $0xe0] sm:$0xff] %v260_v28   ;;  %265 = vst [vmem:[%s4408_s26 + $0xe8] sm:$0xff] %v264_v29   ;;  %v272_v31 = vld [vmem:[%s4403_s25 + $0xf8] sm:$0xff]   ;;  %v276_v32 = vld [vmem:[%s4403_s25 + $0x200] sm:$0xff]  }
  0x23   : > { %269 = vst [vmem:[%s4408_s26 + $0xf0] sm:$0xff] %v268_v30   ;;  %273 = vst [vmem:[%s4408_s26 + $0xf8] sm:$0xff] %v272_v31   ;;  %v280_v33 = vld [vmem:[%s4403_s25 + $0x208] sm:$0xff]   ;;  %v284_v34 = vld [vmem:[%s4403_s25 + $0x210] sm:$0xff]  }
  0x24   : > { %277 = vst [vmem:[%s4408_s26 + $0x100] sm:$0xff] %v276_v32   ;;  %v288_v35 = vld [vmem:[%s4403_s25 + $0x218] sm:$0xff]   ;;  %281 = vst [vmem:[%s4408_s26 + $0x108] sm:$0xff] %v280_v33   ;;  %v292_v36 = vld [vmem:[%s4403_s25 + $0x220] sm:$0xff]  }
  0x25   : > { %285 = vst [vmem:[%s4408_s26 + $0x110] sm:$0xff] %v284_v34   ;;  %289 = vst [vmem:[%s4408_s26 + $0x118] sm:$0xff] %v288_v35   ;;  %v296_v37 = vld [vmem:[%s4403_s25 + $0x228] sm:$0xff]   ;;  %v300_v38 = vld [vmem:[%s4403_s25 + $0x230] sm:$0xff]  }
  0x26   : > { %293 = vst [vmem:[%s4408_s26 + $0x120] sm:$0xff] %v292_v36   ;;  %297 = vst [vmem:[%s4408_s26 + $0x128] sm:$0xff] %v296_v37   ;;  %v304_v39 = vld [vmem:[%s4403_s25 + $0x238] sm:$0xff]   ;;  %v308_v40 = vld [vmem:[%s4403_s25 + $0x240] sm:$0xff]  }
  0x27   : > { %301 = vst [vmem:[%s4408_s26 + $0x130] sm:$0xff] %v300_v38   ;;  %v312_v41 = vld [vmem:[%s4403_s25 + $0x248] sm:$0xff]   ;;  %305 = vst [vmem:[%s4408_s26 + $0x138] sm:$0xff] %v304_v39   ;;  %v316_v42 = vld [vmem:[%s4403_s25 + $0x250] sm:$0xff]  }
  0x28   : > { %309 = vst [vmem:[%s4408_s26 + $0x140] sm:$0xff] %v308_v40   ;;  %313 = vst [vmem:[%s4408_s26 + $0x148] sm:$0xff] %v312_v41   ;;  %v320_v43 = vld [vmem:[%s4403_s25 + $0x258] sm:$0xff]   ;;  %v324_v44 = vld [vmem:[%s4403_s25 + $0x260] sm:$0xff]  }
  0x29   : > { %317 = vst [vmem:[%s4408_s26 + $0x150] sm:$0xff] %v316_v42   ;;  %321 = vst [vmem:[%s4408_s26 + $0x158] sm:$0xff] %v320_v43   ;;  %v328_v45 = vld [vmem:[%s4403_s25 + $0x268] sm:$0xff]   ;;  %v332_v46 = vld [vmem:[%s4403_s25 + $0x270] sm:$0xff]  }
  0x2a   : > { %325 = vst [vmem:[%s4408_s26 + $0x160] sm:$0xff] %v324_v44   ;;  %v336_v47 = vld [vmem:[%s4403_s25 + $0x278] sm:$0xff]   ;;  %329 = vst [vmem:[%s4408_s26 + $0x168] sm:$0xff] %v328_v45   ;;  %v340_v48 = vld [vmem:[%s4403_s25 + $0x280] sm:$0xff]  }
  0x2b   : > { %333 = vst [vmem:[%s4408_s26 + $0x170] sm:$0xff] %v332_v46   ;;  %337 = vst [vmem:[%s4408_s26 + $0x178] sm:$0xff] %v336_v47   ;;  %v344_v49 = vld [vmem:[%s4403_s25 + $0x288] sm:$0xff]   ;;  %v348_v50 = vld [vmem:[%s4403_s25 + $0x290] sm:$0xff]  }
  0x2c   : > { %341 = vst [vmem:[%s4408_s26 + $0x180] sm:$0xff] %v340_v48   ;;  %345 = vst [vmem:[%s4408_s26 + $0x188] sm:$0xff] %v344_v49   ;;  %v352_v51 = vld [vmem:[%s4403_s25 + $0x298] sm:$0xff]   ;;  %v356_v52 = vld [vmem:[%s4403_s25 + $0x2a0] sm:$0xff]  }
  0x2d   : > { %349 = vst [vmem:[%s4408_s26 + $0x190] sm:$0xff] %v348_v50   ;;  %v360_v53 = vld [vmem:[%s4403_s25 + $0x2a8] sm:$0xff]   ;;  %353 = vst [vmem:[%s4408_s26 + $0x198] sm:$0xff] %v352_v51   ;;  %v364_v54 = vld [vmem:[%s4403_s25 + $0x2b0] sm:$0xff]  }
  0x2e   : > { %357 = vst [vmem:[%s4408_s26 + $0x1a0] sm:$0xff] %v356_v52   ;;  %361 = vst [vmem:[%s4408_s26 + $0x1a8] sm:$0xff] %v360_v53   ;;  %v368_v55 = vld [vmem:[%s4403_s25 + $0x2b8] sm:$0xff]   ;;  %v372_v56 = vld [vmem:[%s4403_s25 + $0x2c0] sm:$0xff]  }
  0x2f   : > { %365 = vst [vmem:[%s4408_s26 + $0x1b0] sm:$0xff] %v364_v54   ;;  %369 = vst [vmem:[%s4408_s26 + $0x1b8] sm:$0xff] %v368_v55   ;;  %v376_v57 = vld [vmem:[%s4403_s25 + $0x2c8] sm:$0xff]   ;;  %v380_v58 = vld [vmem:[%s4403_s25 + $0x2d0] sm:$0xff]  }
  0x30   : > { %373 = vst [vmem:[%s4408_s26 + $0x1c0] sm:$0xff] %v372_v56   ;;  %v384_v59 = vld [vmem:[%s4403_s25 + $0x2d8] sm:$0xff]   ;;  %377 = vst [vmem:[%s4408_s26 + $0x1c8] sm:$0xff] %v376_v57   ;;  %v388_v60 = vld [vmem:[%s4403_s25 + $0x2e0] sm:$0xff]  }
  0x31   : > { %381 = vst [vmem:[%s4408_s26 + $0x1d0] sm:$0xff] %v380_v58   ;;  %385 = vst [vmem:[%s4408_s26 + $0x1d8] sm:$0xff] %v384_v59   ;;  %v392_v61 = vld [vmem:[%s4403_s25 + $0x2e8] sm:$0xff]   ;;  %v396_v62 = vld [vmem:[%s4403_s25 + $0x2f0] sm:$0xff]  }
  0x32   : > { %389 = vst [vmem:[%s4408_s26 + $0x1e0] sm:$0xff] %v388_v60   ;;  %393 = vst [vmem:[%s4408_s26 + $0x1e8] sm:$0xff] %v392_v61   ;;  %v400_v63 = vld [vmem:[%s4403_s25 + $0x2f8] sm:$0xff]  }
  0x33   : > { %397 = vst [vmem:[%s4408_s26 + $0x1f0] sm:$0xff] %v396_v62   ;;  %401 = vst [vmem:[%s4408_s26 + $0x1f8] sm:$0xff] %v400_v63  }
  0x34 PF: > { %p3589_p8 = scmp.ge.s32.totalorder %s4338_s13, 1  ;;  %p682_p9 = scmp.lt.s32.totalorder %s4338_s13, 3 }
  0x36   : > { %p683_p10 = pnand %p3589_p8, %p682_p9 }
  0x37   : > { %s689_s29 = sand.u32 (!%p683_p10), 1, %s4322_s9  }
  0x38   : > { %686 = sbr.rel (%p683_p10) target bundleno = 427 (0x1ab), region = 65  ;;  %s4544_s4 = sshll.u32 (!%p683_p10), %s689_s29, 9 }
  0x39   : > { %s4550_s7 = scalar_lea.vmem (!%p683_p10), [#allocation2], %s4544_s4  ;;  %s4681_s8 = scalar_lea.vmem (!%p683_p10), [#allocation3], %s4544_s4 }
  0x3d   : > { %v4233_v0 = vld [vmem:[%s5091_s1 + $0x10] sm:$0xff]   ;;  %v4234_v1 = vld [vmem:[%s5091_s1 + $0x8] sm:$0xff]   ;;  %v4235_v2 = vld [vmem:[%s5091_s1] sm:$0xff]   ;;  %vm1186_vm0 = vcmask 392192   ;;  %vm2820_vm3 = vcmask 125952   ;;  %s3985_s9 = sshll.u32 (%p4390_p6), %s4330_s11, 8 }
  0x3e   : > { %4053 = vmatprep.subr.bf16.mxu0 %v4233_v0  ;;  %4187 = vmatprep.subr.bf16.mxu1 %v4233_v0  ;;  %v4236_v3 = vld [vmem:[%s4550_s7] sm:$0xff]   ;;  %v4238_v5 = vld [vmem:[%s4550_s7 + $0x8] sm:$0xff]   ;;  %v4240_v7 = vld [vmem:[%s4550_s7 + $0x10] sm:$0xff]   ;;  %s4948_s17 = scalar_lea.vmem (%p4390_p6), %s5092_s2, %s3985_s9 }
  0x3f   : > { %4054 = vmatpush3.bf16.msra.mxu0 %v4233_v0  ;;  %4190 = vmatpush3.bf16.msra.mxu1 %v4233_v0  ;;  %v4237_v4 = vld [vmem:[%s4550_s7 + $0x100] sm:$0xff]   ;;  %v4239_v6 = vld [vmem:[%s4550_s7 + $0x108] sm:$0xff]   ;;  %v4241_v8 = vld [vmem:[%s4550_s7 + $0x110] sm:$0xff]  }
  0x40   : > { %4055 = vmatprep.subr.bf16.mxu0 %v4234_v1  ;;  %4188 = vmatprep.subr.bf16.mxu1 %v4234_v1  ;;  %v4242_v9 = vld [vmem:[%s4550_s7 + $0x18] sm:$0xff]   ;;  %v4244_v11 = vld [vmem:[%s4550_s7 + $0x20] sm:$0xff]   ;;  %v4246_v13 = vld [vmem:[%s4550_s7 + $0x28] sm:$0xff]  }
  0x41   : > { %4059 = vmatprep.mubr.msk.bf16.mxu0 %vm1186_vm0, %v4236_v3  ;;  %4123 = vmatprep.mubr.msk.bf16.mxu1 %vm1186_vm0, %v4237_v4  ;;  %v4243_v10 = vld [vmem:[%s4550_s7 + $0x118] sm:$0xff]   ;;  %v4245_v12 = vld [vmem:[%s4550_s7 + $0x120] sm:$0xff]   ;;  %v4247_v14 = vld [vmem:[%s4550_s7 + $0x128] sm:$0xff]  }
  0x42   : > { %v4248_v15 = vld [vmem:[%s4550_s7 + $0x30] sm:$0xff]   ;;  %v4250_v17 = vld [vmem:[%s4550_s7 + $0x38] sm:$0xff]   ;;  %v4252_v19 = vld [vmem:[%s4550_s7 + $0x40] sm:$0xff]  }
  0x43   : > { %4056 = vmatpush3.bf16.msra.mxu0 %v4234_v1  ;;  %4191 = vmatpush3.bf16.msra.mxu1 %v4234_v1  ;;  %v4249_v16 = vld [vmem:[%s4550_s7 + $0x130] sm:$0xff]   ;;  %v4251_v18 = vld [vmem:[%s4550_s7 + $0x138] sm:$0xff]   ;;  %v4253_v20 = vld [vmem:[%s4550_s7 + $0x140] sm:$0xff]  }
  0x44   : > { %4057 = vmatprep.subr.bf16.mxu0 %v4235_v2  ;;  %4189 = vmatprep.subr.bf16.mxu1 %v4235_v2  ;;  %v4254_v21 = vld [vmem:[%s4550_s7 + $0x48] sm:$0xff]   ;;  %v4256_v23 = vld [vmem:[%s4550_s7 + $0x50] sm:$0xff]   ;;  %v4258_v25 = vld [vmem:[%s4550_s7 + $0x58] sm:$0xff]  }
  0x45   : > { %v4255_v22 = vld [vmem:[%s4550_s7 + $0x148] sm:$0xff]   ;;  %v4257_v24 = vld [vmem:[%s4550_s7 + $0x150] sm:$0xff]   ;;  %v4259_v26 = vld [vmem:[%s4550_s7 + $0x158] sm:$0xff]  }
  0x46   : > { %v4260_v27 = vld [vmem:[%s4550_s7 + $0x60] sm:$0xff]   ;;  %v4262_v29 = vld [vmem:[%s4550_s7 + $0x68] sm:$0xff]   ;;  %v4264_v31 = vld [vmem:[%s4550_s7 + $0x70] sm:$0xff]  }
  0x47   : > { %4058 = vmatpush3.bf16.msra.mxu0 %v4235_v2  ;;  %4192 = vmatpush3.bf16.msra.mxu1 %v4235_v2  ;;  %v4261_v28 = vld [vmem:[%s4550_s7 + $0x160] sm:$0xff]   ;;  %v4263_v30 = vld [vmem:[%s4550_s7 + $0x168] sm:$0xff]   ;;  %v4265_v32 = vld [vmem:[%s4550_s7 + $0x170] sm:$0xff]  }
  0x48   : > { %v4266_v33 = vld [vmem:[%s4550_s7 + $0x78] sm:$0xff]   ;;  %v4268_v35 = vld [vmem:[%s4550_s7 + $0x80] sm:$0xff]   ;;  %v4270_v37 = vld [vmem:[%s4550_s7 + $0x88] sm:$0xff]  }
  0x49   : > { %v4267_v34 = vld [vmem:[%s4550_s7 + $0x178] sm:$0xff]   ;;  %v4269_v36 = vld [vmem:[%s4550_s7 + $0x180] sm:$0xff]   ;;  %v4271_v38 = vld [vmem:[%s4550_s7 + $0x188] sm:$0xff]  }
  0x4a   : > { %4060 = vmatmul.mubr.msk.bf16.vlgmr.msra.gmra.mxu0 %vm1186_vm0, %v4238_v5  ;;  %4124 = vmatmul.mubr.msk.bf16.vlgmr.msra.gmra.mxu1 %vm1186_vm0, %v4239_v6  ;;  %v4272_v39 = vld [vmem:[%s4550_s7 + $0x90] sm:$0xff]   ;;  %v4274_v41 = vld [vmem:[%s4550_s7 + $0x98] sm:$0xff]   ;;  %v4276_v43 = vld [vmem:[%s4550_s7 + $0xa0] sm:$0xff]  }
  0x4b   : > { %4063 = vmatprep.mubr.msk.bf16.mxu0 %vm1186_vm0, %v4240_v7  ;;  %4127 = vmatprep.mubr.msk.bf16.mxu1 %vm1186_vm0, %v4241_v8  ;;  %v4273_v40 = vld [vmem:[%s4550_s7 + $0x190] sm:$0xff]   ;;  %v4275_v42 = vld [vmem:[%s4550_s7 + $0x198] sm:$0xff]   ;;  %v4277_v44 = vld [vmem:[%s4550_s7 + $0x1a0] sm:$0xff]  }
  0x4c   : > { %v4278_v45 = vld [vmem:[%s4550_s7 + $0xa8] sm:$0xff]   ;;  %v4280_v47 = vld [vmem:[%s4550_s7 + $0xb0] sm:$0xff]   ;;  %v4282_v49 = vld [vmem:[%s4550_s7 + $0xb8] sm:$0xff]  }
  0x4d   : > { %v4279_v46 = vld [vmem:[%s4550_s7 + $0x1a8] sm:$0xff]   ;;  %v4281_v48 = vld [vmem:[%s4550_s7 + $0x1b0] sm:$0xff]   ;;  %v4283_v50 = vld [vmem:[%s4550_s7 + $0x1b8] sm:$0xff]  }
  0x4e   : > { %v4284_v51 = vld [vmem:[%s4550_s7 + $0xc0] sm:$0xff]   ;;  %v4286_v53 = vld [vmem:[%s4550_s7 + $0xc8] sm:$0xff]   ;;  %v4288_v55 = vld [vmem:[%s4550_s7 + $0xd0] sm:$0xff]  }
  0x4f   : > { %v4285_v52 = vld [vmem:[%s4550_s7 + $0x1c0] sm:$0xff]   ;;  %v4287_v54 = vld [vmem:[%s4550_s7 + $0x1c8] sm:$0xff]   ;;  %v4289_v56 = vld [vmem:[%s4550_s7 + $0x1d0] sm:$0xff]  }
  0x50   : > { %v4290_v57 = vld [vmem:[%s4550_s7 + $0xd8] sm:$0xff]   ;;  %v4292_v59 = vld [vmem:[%s4550_s7 + $0xe0] sm:$0xff]   ;;  %v4294_v61 = vld [vmem:[%s4550_s7 + $0xe8] sm:$0xff]  }
  0x51   : > { %v4291_v58 = vld [vmem:[%s4550_s7 + $0x1d8] sm:$0xff]   ;;  %v4293_v60 = vld [vmem:[%s4550_s7 + $0x1e0] sm:$0xff]   ;;  %v4295_v62 = vld [vmem:[%s4550_s7 + $0x1e8] sm:$0xff]  }
  0x52   : > { %4064 = vmatmul.mubr.msk.bf16.gmra.mxu0 %vm1186_vm0, %v4242_v9  ;;  %4128 = vmatmul.mubr.msk.bf16.gmra.mxu1 %vm1186_vm0, %v4243_v10  ;;  %v4296_v63 = vld [vmem:[%s4550_s7 + $0xf0] sm:$0xff]   ;;  %v4298_v1 = vld [vmem:[%s4550_s7 + $0xf8] sm:$0xff]  }
  0x53   : > { %4067 = vmatprep.mubr.msk.bf16.mxu0 %vm1186_vm0, %v4244_v11  ;;  %4131 = vmatprep.mubr.msk.bf16.mxu1 %vm1186_vm0, %v4245_v12  ;;  %v4297_v0 = vld [vmem:[%s4550_s7 + $0x1f0] sm:$0xff]   ;;  %v4299_v2 = vld [vmem:[%s4550_s7 + $0x1f8] sm:$0xff]  }
  0x5a   : > { %4068 = vmatmul.mubr.msk.bf16.gmra.mxu0 %vm1186_vm0, %v4246_v13  ;;  %4132 = vmatmul.mubr.msk.bf16.gmra.mxu1 %vm1186_vm0, %v4247_v14 }
  0x5b   : > { %4071 = vmatprep.mubr.msk.bf16.mxu0 %vm1186_vm0, %v4248_v15  ;;  %4135 = vmatprep.mubr.msk.bf16.mxu1 %vm1186_vm0, %v4249_v16 }
  0x62   : > { %4072 = vmatmul.mubr.msk.bf16.gmra.mxu0 %vm1186_vm0, %v4250_v17  ;;  %4136 = vmatmul.mubr.msk.bf16.gmra.mxu1 %vm1186_vm0, %v4251_v18 }
  0x63   : > { %4075 = vmatprep.mubr.msk.bf16.mxu0 %vm1186_vm0, %v4252_v19  ;;  %4139 = vmatprep.mubr.msk.bf16.mxu1 %vm1186_vm0, %v4253_v20 }
  0x6a   : > { %4076 = vmatmul.mubr.msk.bf16.gmra.mxu0 %vm1186_vm0, %v4254_v21  ;;  %4140 = vmatmul.mubr.msk.bf16.gmra.mxu1 %vm1186_vm0, %v4255_v22 }
  0x6b   : > { %4079 = vmatprep.mubr.msk.bf16.mxu0 %vm1186_vm0, %v4256_v23  ;;  %4143 = vmatprep.mubr.msk.bf16.mxu1 %vm1186_vm0, %v4257_v24 }
  0x72   : > { %4080 = vmatmul.mubr.msk.bf16.gmra.mxu0 %vm1186_vm0, %v4258_v25  ;;  %4144 = vmatmul.mubr.msk.bf16.gmra.mxu1 %vm1186_vm0, %v4259_v26 }
  0x73   : > { %4083 = vmatprep.mubr.msk.bf16.mxu0 %vm1186_vm0, %v4260_v27  ;;  %4147 = vmatprep.mubr.msk.bf16.mxu1 %vm1186_vm0, %v4261_v28 }
  0x7a   : > { %4084 = vmatmul.mubr.msk.bf16.gmra.mxu0 %vm1186_vm0, %v4262_v29  ;;  %4148 = vmatmul.mubr.msk.bf16.gmra.mxu1 %vm1186_vm0, %v4263_v30 }
  0x7b   : > { %4087 = vmatprep.mubr.msk.bf16.mxu0 %vm1186_vm0, %v4264_v31  ;;  %4151 = vmatprep.mubr.msk.bf16.mxu1 %vm1186_vm0, %v4265_v32 }
  0x82   : > { %4088 = vmatmul.mubr.msk.bf16.gmra.mxu0 %vm1186_vm0, %v4266_v33  ;;  %4152 = vmatmul.mubr.msk.bf16.gmra.mxu1 %vm1186_vm0, %v4267_v34 }
  0x83   : > { %4091 = vmatprep.mubr.msk.bf16.mxu0 %vm1186_vm0, %v4268_v35  ;;  %4155 = vmatprep.mubr.msk.bf16.mxu1 %vm1186_vm0, %v4269_v36 }
  0x8a   : > { %4092 = vmatmul.mubr.msk.bf16.gmra.mxu0 %vm1186_vm0, %v4270_v37  ;;  %4156 = vmatmul.mubr.msk.bf16.gmra.mxu1 %vm1186_vm0, %v4271_v38 }
  0x8b   : > { %4095 = vmatprep.mubr.msk.bf16.mxu0 %vm1186_vm0, %v4272_v39  ;;  %4159 = vmatprep.mubr.msk.bf16.mxu1 %vm1186_vm0, %v4273_v40 }
  0x92   : > { %4096 = vmatmul.mubr.msk.bf16.gmra.mxu0 %vm1186_vm0, %v4274_v41  ;;  %4160 = vmatmul.mubr.msk.bf16.gmra.mxu1 %vm1186_vm0, %v4275_v42 }
  0x93   : > { %4099 = vmatprep.mubr.msk.bf16.mxu0 %vm1186_vm0, %v4276_v43  ;;  %4163 = vmatprep.mubr.msk.bf16.mxu1 %vm1186_vm0, %v4277_v44 }
  0x9a   : > { %4100 = vmatmul.mubr.msk.bf16.gmra.mxu0 %vm1186_vm0, %v4278_v45  ;;  %4164 = vmatmul.mubr.msk.bf16.gmra.mxu1 %vm1186_vm0, %v4279_v46 }
  0x9b   : > { %4103 = vmatprep.mubr.msk.bf16.mxu0 %vm1186_vm0, %v4280_v47  ;;  %4167 = vmatprep.mubr.msk.bf16.mxu1 %vm1186_vm0, %v4281_v48 }
  0xa2   : > { %4104 = vmatmul.mubr.msk.bf16.gmra.mxu0 %vm1186_vm0, %v4282_v49  ;;  %4168 = vmatmul.mubr.msk.bf16.gmra.mxu1 %vm1186_vm0, %v4283_v50 }
  0xa3   : > { %4107 = vmatprep.mubr.msk.bf16.mxu0 %vm1186_vm0, %v4284_v51  ;;  %4171 = vmatprep.mubr.msk.bf16.mxu1 %vm1186_vm0, %v4285_v52 }
  0xaa   : > { %4108 = vmatmul.mubr.msk.bf16.gmra.mxu0 %vm1186_vm0, %v4286_v53  ;;  %4172 = vmatmul.mubr.msk.bf16.gmra.mxu1 %vm1186_vm0, %v4287_v54 }
  0xab   : > { %4111 = vmatprep.mubr.msk.bf16.mxu0 %vm1186_vm0, %v4288_v55  ;;  %4175 = vmatprep.mubr.msk.bf16.mxu1 %vm1186_vm0, %v4289_v56 }
  0xb2   : > { %4112 = vmatmul.mubr.msk.bf16.gmra.mxu0 %vm1186_vm0, %v4290_v57  ;;  %4176 = vmatmul.mubr.msk.bf16.gmra.mxu1 %vm1186_vm0, %v4291_v58 }
  0xb3   : > { %4115 = vmatprep.mubr.msk.bf16.mxu0 %vm1186_vm0, %v4292_v59  ;;  %4179 = vmatprep.mubr.msk.bf16.mxu1 %vm1186_vm0, %v4293_v60 }
  0xba   : > { %4116 = vmatmul.mubr.msk.bf16.gmra.mxu0 %vm1186_vm0, %v4294_v61  ;;  %4180 = vmatmul.mubr.msk.bf16.gmra.mxu1 %vm1186_vm0, %v4295_v62 }
  0xbb   : > { %4119 = vmatprep.mubr.msk.bf16.mxu0 %vm1186_vm0, %v4296_v63  ;;  %4183 = vmatprep.mubr.msk.bf16.mxu1 %vm1186_vm0, %v4297_v0 }
  0xc2   : > { %4120 = vmatmul.mubr.msk.bf16.gmra.mxu0 %vm1186_vm0, %v4298_v1  ;;  %4184 = vmatmul.mubr.msk.bf16.gmra.mxu1 %vm1186_vm0, %v4299_v2 }
 0x10a   : > { %v4061_v3 = vpop.f32.mrf.mxu0  ;;  %v4125_v4 = vpop.f32.mrf.mxu1 }
 0x10b   : > { %vm1926_vm1 = vcmp.gt.f32.partialorder %v4061_v3, 0.0  ;;  %v2054_v5 = vmul.f32 0.2, %v4061_v3  ;;  %vm1990_vm2 = vcmp.gt.f32.partialorder %v4125_v4, 0.0  ;;  %v2118_v6 = vmul.f32 0.2, %v4125_v4 }
 0x10c   : > { %v1413_v7 = vpop.f32.mrf.mxu0  ;;  %v1669_v8 = vpop.f32.mrf.mxu1 }
 0x10d   : > { %v2182_v9 = vsel %vm1926_vm1, %v4061_v3, %v2054_v5  ;;  %v2246_v10 = vsel %vm1990_vm2, %v4125_v4, %v2118_v6  ;;  %vm1924_vm4 = vcmp.gt.f32.partialorder %v1413_v7, 0.0  ;;  %v2052_v11 = vmul.f32 0.2, %v1413_v7 }
 0x10e   : > { %v3859_v12 = vpack.c.bf16 %v2182_v9, %v2182_v9  ;;  %v3923_v13 = vpack.c.bf16 %v2246_v10, %v2246_v10  ;;  %vm1988_vm5 = vcmp.gt.f32.partialorder %v1669_v8, 0.0  ;;  %v2116_v14 = vmul.f32 0.2, %v1669_v8  ;;  %v4062_v15 = vpop.f32.mrf.mxu0  ;;  %v4126_v16 = vpop.f32.mrf.mxu1 }
 0x10f   : > { %v2180_v17 = vsel %vm1924_vm4, %v1413_v7, %v2052_v11  ;;  %vm1927_vm6 = vcmp.gt.f32.partialorder %v4062_v15, 0.0  ;;  %v2055_v18 = vmul.f32 0.2, %v4062_v15  ;;  %vm1991_vm7 = vcmp.gt.f32.partialorder %v4126_v16, 0.0 }
 0x110   : > { %2823 = vst.msk [vmem:[%s4681_s8 + $0x8] sm:$0xf] %vm2820_vm3, %v3859_v12  ;;  %2887 = vst.msk [vmem:[%s4681_s8 + $0x108] sm:$0xf] %vm2820_vm3, %v3923_v13  ;;  %v3857_v19 = vpack.c.bf16 %v2180_v17, %v2180_v17  ;;  %v2244_v20 = vsel %vm1988_vm5, %v1669_v8, %v2116_v14  ;;  %v2119_v21 = vmul.f32 0.2, %v4126_v16  ;;  %v1416_v22 = vpop.f32.mrf.mxu0  ;;  %v1672_v23 = vpop.f32.mrf.mxu1 }
 0x111   : > { %v3921_v24 = vpack.c.bf16 %v2244_v20, %v2244_v20  ;;  %v2183_v25 = vsel %vm1927_vm6, %v4062_v15, %v2055_v18  ;;  %vm1925_vm8 = vcmp.gt.f32.partialorder %v1416_v22, 0.0  ;;  %v2053_v26 = vmul.f32 0.2, %v1416_v22 }
 0x112   : > { %2821 = vst.msk [vmem:[%s4681_s8] sm:$0xf] %vm2820_vm3, %v3857_v19  ;;  %v3860_v27 = vpack.c.bf16 %v2183_v25, %v2183_v25  ;;  %v2247_v28 = vsel %vm1991_vm7, %v4126_v16, %v2119_v21  ;;  %vm1989_vm9 = vcmp.gt.f32.partialorder %v1672_v23, 0.0  ;;  %v2117_v29 = vmul.f32 0.2, %v1672_v23  ;;  %v4065_v30 = vpop.f32.mrf.mxu0  ;;  %v4129_v31 = vpop.f32.mrf.mxu1 }
 0x113   : > { %2885 = vst.msk [vmem:[%s4681_s8 + $0x100] sm:$0xf] %vm2820_vm3, %v3921_v24  ;;  %v3924_v32 = vpack.c.bf16 %v2247_v28, %v2247_v28  ;;  %v2181_v33 = vsel %vm1925_vm8, %v1416_v22, %v2053_v26  ;;  %vm1930_vm10 = vcmp.gt.f32.partialorder %v4065_v30, 0.0  ;;  %v2058_v34 = vmul.f32 0.2, %v4065_v30 }
 0x114   : > { %2824 = vst.msk [vmem:[%s4681_s8 + $0xc] sm:$0xf] %vm2820_vm3, %v3860_v27  ;;  %v3858_v35 = vpack.c.bf16 %v2181_v33, %v2181_v33  ;;  %v2245_v36 = vsel %vm1989_vm9, %v1672_v23, %v2117_v29  ;;  %vm1994_vm11 = vcmp.gt.f32.partialorder %v4129_v31, 0.0  ;;  %v2122_v37 = vmul.f32 0.2, %v4129_v31  ;;  %v1429_v38 = vpop.f32.mrf.mxu0  ;;  %v1685_v39 = vpop.f32.mrf.mxu1 }
 0x115   : > { %2888 = vst.msk [vmem:[%s4681_s8 + $0x10c] sm:$0xf] %vm2820_vm3, %v3924_v32  ;;  %v3922_v40 = vpack.c.bf16 %v2245_v36, %v2245_v36  ;;  %v2186_v41 = vsel %vm1930_vm10, %v4065_v30, %v2058_v34  ;;  %vm1928_vm12 = vcmp.gt.f32.partialorder %v1429_v38, 0.0  ;;  %v2056_v42 = vmul.f32 0.2, %v1429_v38 }
 0x116   : > { %2822 = vst.msk [vmem:[%s4681_s8 + $0x4] sm:$0xf] %vm2820_vm3, %v3858_v35  ;;  %v3863_v43 = vpack.c.bf16 %v2186_v41, %v2186_v41  ;;  %v2250_v44 = vsel %vm1994_vm11, %v4129_v31, %v2122_v37  ;;  %vm1992_vm13 = vcmp.gt.f32.partialorder %v1685_v39, 0.0  ;;  %v2120_v45 = vmul.f32 0.2, %v1685_v39  ;;  %v4066_v46 = vpop.f32.mrf.mxu0  ;;  %v4130_v47 = vpop.f32.mrf.mxu1 }
 0x117   : > { %2886 = vst.msk [vmem:[%s4681_s8 + $0x104] sm:$0xf] %vm2820_vm3, %v3922_v40  ;;  %v3927_v48 = vpack.c.bf16 %v2250_v44, %v2250_v44  ;;  %v2184_v49 = vsel %vm1928_vm12, %v1429_v38, %v2056_v42  ;;  %vm1931_vm14 = vcmp.gt.f32.partialorder %v4066_v46, 0.0  ;;  %v2059_v50 = vmul.f32 0.2, %v4066_v46 }
 0x118   : > { %2827 = vst.msk [vmem:[%s4681_s8 + $0x18] sm:$0xf] %vm2820_vm3, %v3863_v43  ;;  %v3861_v51 = vpack.c.bf16 %v2184_v49, %v2184_v49  ;;  %v2248_v52 = vsel %vm1992_vm13, %v1685_v39, %v2120_v45  ;;  %vm1995_vm15 = vcmp.gt.f32.partialorder %v4130_v47, 0.0  ;;  %v2123_v53 = vmul.f32 0.2, %v4130_v47  ;;  %v1432_v54 = vpop.f32.mrf.mxu0  ;;  %v1688_v55 = vpop.f32.mrf.mxu1 }
 0x119   : > { %2891 = vst.msk [vmem:[%s4681_s8 + $0x118] sm:$0xf] %vm2820_vm3, %v3927_v48  ;;  %v3925_v56 = vpack.c.bf16 %v2248_v52, %v2248_v52  ;;  %v2187_v57 = vsel %vm1931_vm14, %v4066_v46, %v2059_v50  ;;  %vm1929_vm0 = vcmp.gt.f32.partialorder %v1432_v54, 0.0  ;;  %v2057_v58 = vmul.f32 0.2, %v1432_v54 }
 0x11a   : > { %2825 = vst.msk [vmem:[%s4681_s8 + $0x10] sm:$0xf] %vm2820_vm3, %v3861_v51  ;;  %v3864_v59 = vpack.c.bf16 %v2187_v57, %v2187_v57  ;;  %v2251_v60 = vsel %vm1995_vm15, %v4130_v47, %v2123_v53  ;;  %vm1993_vm1 = vcmp.gt.f32.partialorder %v1688_v55, 0.0  ;;  %v2121_v61 = vmul.f32 0.2, %v1688_v55  ;;  %v4069_v62 = vpop.f32.mrf.mxu0  ;;  %v4133_v63 = vpop.f32.mrf.mxu1 }
 0x11b   : > { %2889 = vst.msk [vmem:[%s4681_s8 + $0x110] sm:$0xf] %vm2820_vm3, %v3925_v56  ;;  %v3928_v0 = vpack.c.bf16 %v2251_v60, %v2251_v60  ;;  %v2185_v1 = vsel %vm1929_vm0, %v1432_v54, %v2057_v58  ;;  %vm1934_vm2 = vcmp.gt.f32.partialorder %v4069_v62, 0.0  ;;  %v2062_v2 = vmul.f32 0.2, %v4069_v62 }
 0x11c   : > { %2828 = vst.msk [vmem:[%s4681_s8 + $0x1c] sm:$0xf] %vm2820_vm3, %v3864_v59  ;;  %v3862_v3 = vpack.c.bf16 %v2185_v1, %v2185_v1  ;;  %v2249_v4 = vsel %vm1993_vm1, %v1688_v55, %v2121_v61  ;;  %vm1998_vm4 = vcmp.gt.f32.partialorder %v4133_v63, 0.0  ;;  %v2126_v5 = vmul.f32 0.2, %v4133_v63  ;;  %v1445_v6 = vpop.f32.mrf.mxu0  ;;  %v1701_v7 = vpop.f32.mrf.mxu1 }
 0x11d   : > { %2892 = vst.msk [vmem:[%s4681_s8 + $0x11c] sm:$0xf] %vm2820_vm3, %v3928_v0  ;;  %v3926_v8 = vpack.c.bf16 %v2249_v4, %v2249_v4  ;;  %v2190_v9 = vsel %vm1934_vm2, %v4069_v62, %v2062_v2  ;;  %vm1932_vm5 = vcmp.gt.f32.partialorder %v1445_v6, 0.0  ;;  %v2060_v10 = vmul.f32 0.2, %v1445_v6 }
 0x11e   : > { %2826 = vst.msk [vmem:[%s4681_s8 + $0x14] sm:$0xf] %vm2820_vm3, %v3862_v3  ;;  %v3867_v11 = vpack.c.bf16 %v2190_v9, %v2190_v9  ;;  %v2254_v12 = vsel %vm1998_vm4, %v4133_v63, %v2126_v5  ;;  %vm1996_vm6 = vcmp.gt.f32.partialorder %v1701_v7, 0.0  ;;  %v2124_v13 = vmul.f32 0.2, %v1701_v7  ;;  %v4070_v14 = vpop.f32.mrf.mxu0  ;;  %v4134_v15 = vpop.f32.mrf.mxu1 }
 0x11f   : > { %2890 = vst.msk [vmem:[%s4681_s8 + $0x114] sm:$0xf] %vm2820_vm3, %v3926_v8  ;;  %v3931_v16 = vpack.c.bf16 %v2254_v12, %v2254_v12  ;;  %v2188_v17 = vsel %vm1932_vm5, %v1445_v6, %v2060_v10  ;;  %vm1935_vm7 = vcmp.gt.f32.partialorder %v4070_v14, 0.0  ;;  %v2063_v18 = vmul.f32 0.2, %v4070_v14 }
 0x120   : > { %2831 = vst.msk [vmem:[%s4681_s8 + $0x28] sm:$0xf] %vm2820_vm3, %v3867_v11  ;;  %v3865_v19 = vpack.c.bf16 %v2188_v17, %v2188_v17  ;;  %v2252_v20 = vsel %vm1996_vm6, %v1701_v7, %v2124_v13  ;;  %vm1999_vm8 = vcmp.gt.f32.partialorder %v4134_v15, 0.0  ;;  %v2127_v21 = vmul.f32 0.2, %v4134_v15  ;;  %v1448_v22 = vpop.f32.mrf.mxu0  ;;  %v1704_v23 = vpop.f32.mrf.mxu1 }
 0x121   : > { %2895 = vst.msk [vmem:[%s4681_s8 + $0x128] sm:$0xf] %vm2820_vm3, %v3931_v16  ;;  %v3929_v24 = vpack.c.bf16 %v2252_v20, %v2252_v20  ;;  %v2191_v25 = vsel %vm1935_vm7, %v4070_v14, %v2063_v18  ;;  %vm1933_vm9 = vcmp.gt.f32.partialorder %v1448_v22, 0.0  ;;  %v2061_v26 = vmul.f32 0.2, %v1448_v22 }
 0x122   : > { %2829 = vst.msk [vmem:[%s4681_s8 + $0x20] sm:$0xf] %vm2820_vm3, %v3865_v19  ;;  %v3868_v27 = vpack.c.bf16 %v2191_v25, %v2191_v25  ;;  %v2255_v28 = vsel %vm1999_vm8, %v4134_v15, %v2127_v21  ;;  %vm1997_vm10 = vcmp.gt.f32.partialorder %v1704_v23, 0.0  ;;  %v2125_v29 = vmul.f32 0.2, %v1704_v23  ;;  %v4073_v30 = vpop.f32.mrf.mxu0  ;;  %v4137_v31 = vpop.f32.mrf.mxu1 }
 0x123   : > { %2893 = vst.msk [vmem:[%s4681_s8 + $0x120] sm:$0xf] %vm2820_vm3, %v3929_v24  ;;  %v3932_v32 = vpack.c.bf16 %v2255_v28, %v2255_v28  ;;  %v2189_v33 = vsel %vm1933_vm9, %v1448_v22, %v2061_v26  ;;  %vm1938_vm11 = vcmp.gt.f32.partialorder %v4073_v30, 0.0  ;;  %v2066_v34 = vmul.f32 0.2, %v4073_v30 }
 0x124   : > { %2832 = vst.msk [vmem:[%s4681_s8 + $0x2c] sm:$0xf] %vm2820_vm3, %v3868_v27  ;;  %v3866_v35 = vpack.c.bf16 %v2189_v33, %v2189_v33  ;;  %v2253_v36 = vsel %vm1997_vm10, %v1704_v23, %v2125_v29  ;;  %vm2002_vm12 = vcmp.gt.f32.partialorder %v4137_v31, 0.0  ;;  %v2130_v37 = vmul.f32 0.2, %v4137_v31  ;;  %v1461_v38 = vpop.f32.mrf.mxu0  ;;  %v1717_v39 = vpop.f32.mrf.mxu1 }
 0x125   : > { %2896 = vst.msk [vmem:[%s4681_s8 + $0x12c] sm:$0xf] %vm2820_vm3, %v3932_v32  ;;  %v3930_v40 = vpack.c.bf16 %v2253_v36, %v2253_v36  ;;  %v2194_v41 = vsel %vm1938_vm11, %v4073_v30, %v2066_v34  ;;  %vm1936_vm13 = vcmp.gt.f32.partialorder %v1461_v38, 0.0  ;;  %v2064_v42 = vmul.f32 0.2, %v1461_v38 }
 0x126   : > { %2830 = vst.msk [vmem:[%s4681_s8 + $0x24] sm:$0xf] %vm2820_vm3, %v3866_v35  ;;  %v3871_v43 = vpack.c.bf16 %v2194_v41, %v2194_v41  ;;  %v2258_v44 = vsel %vm2002_vm12, %v4137_v31, %v2130_v37  ;;  %vm2000_vm14 = vcmp.gt.f32.partialorder %v1717_v39, 0.0  ;;  %v2128_v45 = vmul.f32 0.2, %v1717_v39  ;;  %v4074_v46 = vpop.f32.mrf.mxu0  ;;  %v4138_v47 = vpop.f32.mrf.mxu1 }
 0x127   : > { %2894 = vst.msk [vmem:[%s4681_s8 + $0x124] sm:$0xf] %vm2820_vm3, %v3930_v40  ;;  %v3935_v48 = vpack.c.bf16 %v2258_v44, %v2258_v44  ;;  %v2192_v49 = vsel %vm1936_vm13, %v1461_v38, %v2064_v42  ;;  %vm1939_vm15 = vcmp.gt.f32.partialorder %v4074_v46, 0.0  ;;  %v2067_v50 = vmul.f32 0.2, %v4074_v46 }
 0x128   : > { %2835 = vst.msk [vmem:[%s4681_s8 + $0x38] sm:$0xf] %vm2820_vm3, %v3871_v43  ;;  %v3869_v51 = vpack.c.bf16 %v2192_v49, %v2192_v49  ;;  %v2256_v52 = vsel %vm2000_vm14, %v1717_v39, %v2128_v45  ;;  %vm2003_vm0 = vcmp.gt.f32.partialorder %v4138_v47, 0.0  ;;  %v2131_v53 = vmul.f32 0.2, %v4138_v47  ;;  %v1464_v54 = vpop.f32.mrf.mxu0  ;;  %v1720_v55 = vpop.f32.mrf.mxu1 }
 0x129   : > { %2899 = vst.msk [vmem:[%s4681_s8 + $0x138] sm:$0xf] %vm2820_vm3, %v3935_v48  ;;  %v3933_v56 = vpack.c.bf16 %v2256_v52, %v2256_v52  ;;  %v2195_v57 = vsel %vm1939_vm15, %v4074_v46, %v2067_v50  ;;  %vm1937_vm1 = vcmp.gt.f32.partialorder %v1464_v54, 0.0  ;;  %v2065_v58 = vmul.f32 0.2, %v1464_v54 }
 0x12a   : > { %2833 = vst.msk [vmem:[%s4681_s8 + $0x30] sm:$0xf] %vm2820_vm3, %v3869_v51  ;;  %v3872_v59 = vpack.c.bf16 %v2195_v57, %v2195_v57  ;;  %v2259_v60 = vsel %vm2003_vm0, %v4138_v47, %v2131_v53  ;;  %vm2001_vm2 = vcmp.gt.f32.partialorder %v1720_v55, 0.0  ;;  %v2129_v61 = vmul.f32 0.2, %v1720_v55  ;;  %v4077_v62 = vpop.f32.mrf.mxu0  ;;  %v4141_v63 = vpop.f32.mrf.mxu1 }
 0x12b   : > { %2897 = vst.msk [vmem:[%s4681_s8 + $0x130] sm:$0xf] %vm2820_vm3, %v3933_v56  ;;  %v3936_v0 = vpack.c.bf16 %v2259_v60, %v2259_v60  ;;  %v2193_v1 = vsel %vm1937_vm1, %v1464_v54, %v2065_v58  ;;  %vm1942_vm4 = vcmp.gt.f32.partialorder %v4077_v62, 0.0  ;;  %v2070_v2 = vmul.f32 0.2, %v4077_v62 }
 0x12c   : > { %2836 = vst.msk [vmem:[%s4681_s8 + $0x3c] sm:$0xf] %vm2820_vm3, %v3872_v59  ;;  %v3870_v3 = vpack.c.bf16 %v2193_v1, %v2193_v1  ;;  %v2257_v4 = vsel %vm2001_vm2, %v1720_v55, %v2129_v61  ;;  %vm2006_vm5 = vcmp.gt.f32.partialorder %v4141_v63, 0.0  ;;  %v2134_v5 = vmul.f32 0.2, %v4141_v63  ;;  %v1477_v6 = vpop.f32.mrf.mxu0  ;;  %v1733_v7 = vpop.f32.mrf.mxu1 }
 0x12d   : > { %2900 = vst.msk [vmem:[%s4681_s8 + $0x13c] sm:$0xf] %vm2820_vm3, %v3936_v0  ;;  %v3934_v8 = vpack.c.bf16 %v2257_v4, %v2257_v4  ;;  %v2198_v9 = vsel %vm1942_vm4, %v4077_v62, %v2070_v2  ;;  %vm1940_vm6 = vcmp.gt.f32.partialorder %v1477_v6, 0.0  ;;  %v2068_v10 = vmul.f32 0.2, %v1477_v6 }
 0x12e   : > { %2834 = vst.msk [vmem:[%s4681_s8 + $0x34] sm:$0xf] %vm2820_vm3, %v3870_v3  ;;  %v3875_v11 = vpack.c.bf16 %v2198_v9, %v2198_v9  ;;  %v2262_v12 = vsel %vm2006_vm5, %v4141_v63, %v2134_v5  ;;  %vm2004_vm7 = vcmp.gt.f32.partialorder %v1733_v7, 0.0  ;;  %v2132_v13 = vmul.f32 0.2, %v1733_v7  ;;  %v4078_v14 = vpop.f32.mrf.mxu0  ;;  %v4142_v15 = vpop.f32.mrf.mxu1 }
 0x12f   : > { %2898 = vst.msk [vmem:[%s4681_s8 + $0x134] sm:$0xf] %vm2820_vm3, %v3934_v8  ;;  %v3939_v16 = vpack.c.bf16 %v2262_v12, %v2262_v12  ;;  %v2196_v17 = vsel %vm1940_vm6, %v1477_v6, %v2068_v10  ;;  %vm1943_vm8 = vcmp.gt.f32.partialorder %v4078_v14, 0.0  ;;  %v2071_v18 = vmul.f32 0.2, %v4078_v14 }
 0x130   : > { %2839 = vst.msk [vmem:[%s4681_s8 + $0x48] sm:$0xf] %vm2820_vm3, %v3875_v11  ;;  %v3873_v19 = vpack.c.bf16 %v2196_v17, %v2196_v17  ;;  %v2260_v20 = vsel %vm2004_vm7, %v1733_v7, %v2132_v13  ;;  %vm2007_vm9 = vcmp.gt.f32.partialorder %v4142_v15, 0.0  ;;  %v2135_v21 = vmul.f32 0.2, %v4142_v15  ;;  %v1480_v22 = vpop.f32.mrf.mxu0  ;;  %v1736_v23 = vpop.f32.mrf.mxu1 }
 0x131   : > { %2903 = vst.msk [vmem:[%s4681_s8 + $0x148] sm:$0xf] %vm2820_vm3, %v3939_v16  ;;  %v3937_v24 = vpack.c.bf16 %v2260_v20, %v2260_v20  ;;  %v2199_v25 = vsel %vm1943_vm8, %v4078_v14, %v2071_v18  ;;  %vm1941_vm10 = vcmp.gt.f32.partialorder %v1480_v22, 0.0  ;;  %v2069_v26 = vmul.f32 0.2, %v1480_v22 }
 0x132   : > { %2837 = vst.msk [vmem:[%s4681_s8 + $0x40] sm:$0xf] %vm2820_vm3, %v3873_v19  ;;  %v3876_v27 = vpack.c.bf16 %v2199_v25, %v2199_v25  ;;  %v2263_v28 = vsel %vm2007_vm9, %v4142_v15, %v2135_v21  ;;  %vm2005_vm11 = vcmp.gt.f32.partialorder %v1736_v23, 0.0  ;;  %v2133_v29 = vmul.f32 0.2, %v1736_v23  ;;  %v4081_v30 = vpop.f32.mrf.mxu0  ;;  %v4145_v31 = vpop.f32.mrf.mxu1 }
 0x133   : > { %2901 = vst.msk [vmem:[%s4681_s8 + $0x140] sm:$0xf] %vm2820_vm3, %v3937_v24  ;;  %v3940_v32 = vpack.c.bf16 %v2263_v28, %v2263_v28  ;;  %v2197_v33 = vsel %vm1941_vm10, %v1480_v22, %v2069_v26  ;;  %vm1946_vm12 = vcmp.gt.f32.partialorder %v4081_v30, 0.0  ;;  %v2074_v34 = vmul.f32 0.2, %v4081_v30 }
 0x134   : > { %2840 = vst.msk [vmem:[%s4681_s8 + $0x4c] sm:$0xf] %vm2820_vm3, %v3876_v27  ;;  %v3874_v35 = vpack.c.bf16 %v2197_v33, %v2197_v33  ;;  %v2261_v36 = vsel %vm2005_vm11, %v1736_v23, %v2133_v29  ;;  %vm2010_vm13 = vcmp.gt.f32.partialorder %v4145_v31, 0.0  ;;  %v2138_v37 = vmul.f32 0.2, %v4145_v31  ;;  %v1493_v38 = vpop.f32.mrf.mxu0  ;;  %v1749_v39 = vpop.f32.mrf.mxu1 }
 0x135   : > { %2904 = vst.msk [vmem:[%s4681_s8 + $0x14c] sm:$0xf] %vm2820_vm3, %v3940_v32  ;;  %v3938_v40 = vpack.c.bf16 %v2261_v36, %v2261_v36  ;;  %v2202_v41 = vsel %vm1946_vm12, %v4081_v30, %v2074_v34  ;;  %vm1944_vm14 = vcmp.gt.f32.partialorder %v1493_v38, 0.0  ;;  %v2072_v42 = vmul.f32 0.2, %v1493_v38 }
 0x136   : > { %2838 = vst.msk [vmem:[%s4681_s8 + $0x44] sm:$0xf] %vm2820_vm3, %v3874_v35  ;;  %v3879_v43 = vpack.c.bf16 %v2202_v41, %v2202_v41  ;;  %v2266_v44 = vsel %vm2010_vm13, %v4145_v31, %v2138_v37  ;;  %vm2008_vm15 = vcmp.gt.f32.partialorder %v1749_v39, 0.0  ;;  %v2136_v45 = vmul.f32 0.2, %v1749_v39  ;;  %v4082_v46 = vpop.f32.mrf.mxu0  ;;  %v4146_v47 = vpop.f32.mrf.mxu1 }
 0x137   : > { %2902 = vst.msk [vmem:[%s4681_s8 + $0x144] sm:$0xf] %vm2820_vm3, %v3938_v40  ;;  %v3943_v48 = vpack.c.bf16 %v2266_v44, %v2266_v44  ;;  %v2200_v49 = vsel %vm1944_vm14, %v1493_v38, %v2072_v42  ;;  %vm1947_vm0 = vcmp.gt.f32.partialorder %v4082_v46, 0.0  ;;  %v2075_v50 = vmul.f32 0.2, %v4082_v46 }
 0x138   : > { %2843 = vst.msk [vmem:[%s4681_s8 + $0x58] sm:$0xf] %vm2820_vm3, %v3879_v43  ;;  %v3877_v51 = vpack.c.bf16 %v2200_v49, %v2200_v49  ;;  %v2264_v52 = vsel %vm2008_vm15, %v1749_v39, %v2136_v45  ;;  %vm2011_vm1 = vcmp.gt.f32.partialorder %v4146_v47, 0.0  ;;  %v2139_v53 = vmul.f32 0.2, %v4146_v47  ;;  %v1496_v54 = vpop.f32.mrf.mxu0  ;;  %v1752_v55 = vpop.f32.mrf.mxu1 }
 0x139   : > { %2907 = vst.msk [vmem:[%s4681_s8 + $0x158] sm:$0xf] %vm2820_vm3, %v3943_v48  ;;  %v3941_v56 = vpack.c.bf16 %v2264_v52, %v2264_v52  ;;  %v2203_v57 = vsel %vm1947_vm0, %v4082_v46, %v2075_v50  ;;  %vm1945_vm2 = vcmp.gt.f32.partialorder %v1496_v54, 0.0  ;;  %v2073_v58 = vmul.f32 0.2, %v1496_v54 }
 0x13a   : > { %2841 = vst.msk [vmem:[%s4681_s8 + $0x50] sm:$0xf] %vm2820_vm3, %v3877_v51  ;;  %v3880_v59 = vpack.c.bf16 %v2203_v57, %v2203_v57  ;;  %v2267_v60 = vsel %vm2011_vm1, %v4146_v47, %v2139_v53  ;;  %vm2009_vm4 = vcmp.gt.f32.partialorder %v1752_v55, 0.0  ;;  %v2137_v61 = vmul.f32 0.2, %v1752_v55  ;;  %v4085_v62 = vpop.f32.mrf.mxu0  ;;  %v4149_v63 = vpop.f32.mrf.mxu1 }
 0x13b   : > { %2905 = vst.msk [vmem:[%s4681_s8 + $0x150] sm:$0xf] %vm2820_vm3, %v3941_v56  ;;  %v3944_v0 = vpack.c.bf16 %v2267_v60, %v2267_v60  ;;  %v2201_v1 = vsel %vm1945_vm2, %v1496_v54, %v2073_v58  ;;  %vm1950_vm5 = vcmp.gt.f32.partialorder %v4085_v62, 0.0  ;;  %v2078_v2 = vmul.f32 0.2, %v4085_v62 }
 0x13c   : > { %2844 = vst.msk [vmem:[%s4681_s8 + $0x5c] sm:$0xf] %vm2820_vm3, %v3880_v59  ;;  %v3878_v3 = vpack.c.bf16 %v2201_v1, %v2201_v1  ;;  %v2265_v4 = vsel %vm2009_vm4, %v1752_v55, %v2137_v61  ;;  %vm2014_vm6 = vcmp.gt.f32.partialorder %v4149_v63, 0.0  ;;  %v2142_v5 = vmul.f32 0.2, %v4149_v63  ;;  %v1509_v6 = vpop.f32.mrf.mxu0  ;;  %v1765_v7 = vpop.f32.mrf.mxu1 }
 0x13d   : > { %2908 = vst.msk [vmem:[%s4681_s8 + $0x15c] sm:$0xf] %vm2820_vm3, %v3944_v0  ;;  %v3942_v8 = vpack.c.bf16 %v2265_v4, %v2265_v4  ;;  %v2206_v9 = vsel %vm1950_vm5, %v4085_v62, %v2078_v2  ;;  %vm1948_vm7 = vcmp.gt.f32.partialorder %v1509_v6, 0.0  ;;  %v2076_v10 = vmul.f32 0.2, %v1509_v6 }
 0x13e   : > { %2842 = vst.msk [vmem:[%s4681_s8 + $0x54] sm:$0xf] %vm2820_vm3, %v3878_v3  ;;  %v3883_v11 = vpack.c.bf16 %v2206_v9, %v2206_v9  ;;  %v2270_v12 = vsel %vm2014_vm6, %v4149_v63, %v2142_v5  ;;  %vm2012_vm8 = vcmp.gt.f32.partialorder %v1765_v7, 0.0  ;;  %v2140_v13 = vmul.f32 0.2, %v1765_v7  ;;  %v4086_v14 = vpop.f32.mrf.mxu0  ;;  %v4150_v15 = vpop.f32.mrf.mxu1 }
 0x13f   : > { %2906 = vst.msk [vmem:[%s4681_s8 + $0x154] sm:$0xf] %vm2820_vm3, %v3942_v8  ;;  %v3947_v16 = vpack.c.bf16 %v2270_v12, %v2270_v12  ;;  %v2204_v17 = vsel %vm1948_vm7, %v1509_v6, %v2076_v10  ;;  %vm1951_vm9 = vcmp.gt.f32.partialorder %v4086_v14, 0.0  ;;  %v2079_v18 = vmul.f32 0.2, %v4086_v14 }
 0x140   : > { %2847 = vst.msk [vmem:[%s4681_s8 + $0x68] sm:$0xf] %vm2820_vm3, %v3883_v11  ;;  %v3881_v19 = vpack.c.bf16 %v2204_v17, %v2204_v17  ;;  %v2268_v20 = vsel %vm2012_vm8, %v1765_v7, %v2140_v13  ;;  %vm2015_vm10 = vcmp.gt.f32.partialorder %v4150_v15, 0.0  ;;  %v2143_v21 = vmul.f32 0.2, %v4150_v15  ;;  %v1512_v22 = vpop.f32.mrf.mxu0  ;;  %v1768_v23 = vpop.f32.mrf.mxu1 }
 0x141   : > { %2911 = vst.msk [vmem:[%s4681_s8 + $0x168] sm:$0xf] %vm2820_vm3, %v3947_v16  ;;  %v3945_v24 = vpack.c.bf16 %v2268_v20, %v2268_v20  ;;  %v2207_v25 = vsel %vm1951_vm9, %v4086_v14, %v2079_v18  ;;  %vm1949_vm11 = vcmp.gt.f32.partialorder %v1512_v22, 0.0  ;;  %v2077_v26 = vmul.f32 0.2, %v1512_v22 }
 0x142   : > { %2845 = vst.msk [vmem:[%s4681_s8 + $0x60] sm:$0xf] %vm2820_vm3, %v3881_v19  ;;  %v3884_v27 = vpack.c.bf16 %v2207_v25, %v2207_v25  ;;  %v2271_v28 = vsel %vm2015_vm10, %v4150_v15, %v2143_v21  ;;  %vm2013_vm12 = vcmp.gt.f32.partialorder %v1768_v23, 0.0  ;;  %v2141_v29 = vmul.f32 0.2, %v1768_v23  ;;  %v4089_v30 = vpop.f32.mrf.mxu0  ;;  %v4153_v31 = vpop.f32.mrf.mxu1 }
 0x143   : > { %2909 = vst.msk [vmem:[%s4681_s8 + $0x160] sm:$0xf] %vm2820_vm3, %v3945_v24  ;;  %v3948_v32 = vpack.c.bf16 %v2271_v28, %v2271_v28  ;;  %v2205_v33 = vsel %vm1949_vm11, %v1512_v22, %v2077_v26  ;;  %vm1954_vm13 = vcmp.gt.f32.partialorder %v4089_v30, 0.0  ;;  %v2082_v34 = vmul.f32 0.2, %v4089_v30 }
 0x144   : > { %2848 = vst.msk [vmem:[%s4681_s8 + $0x6c] sm:$0xf] %vm2820_vm3, %v3884_v27  ;;  %v3882_v35 = vpack.c.bf16 %v2205_v33, %v2205_v33  ;;  %v2269_v36 = vsel %vm2013_vm12, %v1768_v23, %v2141_v29  ;;  %vm2018_vm14 = vcmp.gt.f32.partialorder %v4153_v31, 0.0  ;;  %v2146_v37 = vmul.f32 0.2, %v4153_v31  ;;  %v1525_v38 = vpop.f32.mrf.mxu0  ;;  %v1781_v39 = vpop.f32.mrf.mxu1 }
 0x145   : > { %2912 = vst.msk [vmem:[%s4681_s8 + $0x16c] sm:$0xf] %vm2820_vm3, %v3948_v32  ;;  %v3946_v40 = vpack.c.bf16 %v2269_v36, %v2269_v36  ;;  %v2210_v41 = vsel %vm1954_vm13, %v4089_v30, %v2082_v34  ;;  %vm1952_vm15 = vcmp.gt.f32.partialorder %v1525_v38, 0.0  ;;  %v2080_v42 = vmul.f32 0.2, %v1525_v38 }
 0x146   : > { %2846 = vst.msk [vmem:[%s4681_s8 + $0x64] sm:$0xf] %vm2820_vm3, %v3882_v35  ;;  %v3887_v43 = vpack.c.bf16 %v2210_v41, %v2210_v41  ;;  %v2274_v44 = vsel %vm2018_vm14, %v4153_v31, %v2146_v37  ;;  %vm2016_vm0 = vcmp.gt.f32.partialorder %v1781_v39, 0.0  ;;  %v2144_v45 = vmul.f32 0.2, %v1781_v39  ;;  %v4090_v46 = vpop.f32.mrf.mxu0  ;;  %v4154_v47 = vpop.f32.mrf.mxu1 }
 0x147   : > { %2910 = vst.msk [vmem:[%s4681_s8 + $0x164] sm:$0xf] %vm2820_vm3, %v3946_v40  ;;  %v3951_v48 = vpack.c.bf16 %v2274_v44, %v2274_v44  ;;  %v2208_v49 = vsel %vm1952_vm15, %v1525_v38, %v2080_v42  ;;  %vm1955_vm1 = vcmp.gt.f32.partialorder %v4090_v46, 0.0  ;;  %v2083_v50 = vmul.f32 0.2, %v4090_v46 }
 0x148   : > { %2851 = vst.msk [vmem:[%s4681_s8 + $0x78] sm:$0xf] %vm2820_vm3, %v3887_v43  ;;  %v3885_v51 = vpack.c.bf16 %v2208_v49, %v2208_v49  ;;  %v2272_v52 = vsel %vm2016_vm0, %v1781_v39, %v2144_v45  ;;  %vm2019_vm2 = vcmp.gt.f32.partialorder %v4154_v47, 0.0  ;;  %v2147_v53 = vmul.f32 0.2, %v4154_v47  ;;  %v1528_v54 = vpop.f32.mrf.mxu0  ;;  %v1784_v55 = vpop.f32.mrf.mxu1 }
 0x149   : > { %2915 = vst.msk [vmem:[%s4681_s8 + $0x178] sm:$0xf] %vm2820_vm3, %v3951_v48  ;;  %v3949_v56 = vpack.c.bf16 %v2272_v52, %v2272_v52  ;;  %v2211_v57 = vsel %vm1955_vm1, %v4090_v46, %v2083_v50  ;;  %vm1953_vm4 = vcmp.gt.f32.partialorder %v1528_v54, 0.0  ;;  %v2081_v58 = vmul.f32 0.2, %v1528_v54 }
 0x14a   : > { %2849 = vst.msk [vmem:[%s4681_s8 + $0x70] sm:$0xf] %vm2820_vm3, %v3885_v51  ;;  %v3888_v59 = vpack.c.bf16 %v2211_v57, %v2211_v57  ;;  %v2275_v60 = vsel %vm2019_vm2, %v4154_v47, %v2147_v53  ;;  %vm2017_vm5 = vcmp.gt.f32.partialorder %v1784_v55, 0.0  ;;  %v2145_v61 = vmul.f32 0.2, %v1784_v55  ;;  %v4093_v62 = vpop.f32.mrf.mxu0  ;;  %v4157_v63 = vpop.f32.mrf.mxu1 }
 0x14b   : > { %2913 = vst.msk [vmem:[%s4681_s8 + $0x170] sm:$0xf] %vm2820_vm3, %v3949_v56  ;;  %v3952_v0 = vpack.c.bf16 %v2275_v60, %v2275_v60  ;;  %v2209_v1 = vsel %vm1953_vm4, %v1528_v54, %v2081_v58  ;;  %vm1958_vm6 = vcmp.gt.f32.partialorder %v4093_v62, 0.0  ;;  %v2086_v2 = vmul.f32 0.2, %v4093_v62 }
 0x14c   : > { %2852 = vst.msk [vmem:[%s4681_s8 + $0x7c] sm:$0xf] %vm2820_vm3, %v3888_v59  ;;  %v3886_v3 = vpack.c.bf16 %v2209_v1, %v2209_v1  ;;  %v2273_v4 = vsel %vm2017_vm5, %v1784_v55, %v2145_v61  ;;  %vm2022_vm7 = vcmp.gt.f32.partialorder %v4157_v63, 0.0  ;;  %v2150_v5 = vmul.f32 0.2, %v4157_v63  ;;  %v1541_v6 = vpop.f32.mrf.mxu0  ;;  %v1797_v7 = vpop.f32.mrf.mxu1 }
 0x14d   : > { %2916 = vst.msk [vmem:[%s4681_s8 + $0x17c] sm:$0xf] %vm2820_vm3, %v3952_v0  ;;  %v3950_v8 = vpack.c.bf16 %v2273_v4, %v2273_v4  ;;  %v2214_v9 = vsel %vm1958_vm6, %v4093_v62, %v2086_v2  ;;  %vm1956_vm8 = vcmp.gt.f32.partialorder %v1541_v6, 0.0  ;;  %v2084_v10 = vmul.f32 0.2, %v1541_v6 }
 0x14e   : > { %2850 = vst.msk [vmem:[%s4681_s8 + $0x74] sm:$0xf] %vm2820_vm3, %v3886_v3  ;;  %v3891_v11 = vpack.c.bf16 %v2214_v9, %v2214_v9  ;;  %v2278_v12 = vsel %vm2022_vm7, %v4157_v63, %v2150_v5  ;;  %vm2020_vm9 = vcmp.gt.f32.partialorder %v1797_v7, 0.0  ;;  %v2148_v13 = vmul.f32 0.2, %v1797_v7  ;;  %v4094_v14 = vpop.f32.mrf.mxu0  ;;  %v4158_v15 = vpop.f32.mrf.mxu1 }
 0x14f   : > { %2914 = vst.msk [vmem:[%s4681_s8 + $0x174] sm:$0xf] %vm2820_vm3, %v3950_v8  ;;  %v3955_v16 = vpack.c.bf16 %v2278_v12, %v2278_v12  ;;  %v2212_v17 = vsel %vm1956_vm8, %v1541_v6, %v2084_v10  ;;  %vm1959_vm10 = vcmp.gt.f32.partialorder %v4094_v14, 0.0  ;;  %v2087_v18 = vmul.f32 0.2, %v4094_v14 }
 0x150   : > { %2855 = vst.msk [vmem:[%s4681_s8 + $0x88] sm:$0xf] %vm2820_vm3, %v3891_v11  ;;  %v3889_v19 = vpack.c.bf16 %v2212_v17, %v2212_v17  ;;  %v2276_v20 = vsel %vm2020_vm9, %v1797_v7, %v2148_v13  ;;  %vm2023_vm11 = vcmp.gt.f32.partialorder %v4158_v15, 0.0  ;;  %v2151_v21 = vmul.f32 0.2, %v4158_v15  ;;  %v1544_v22 = vpop.f32.mrf.mxu0  ;;  %v1800_v23 = vpop.f32.mrf.mxu1 }
 0x151   : > { %2919 = vst.msk [vmem:[%s4681_s8 + $0x188] sm:$0xf] %vm2820_vm3, %v3955_v16  ;;  %v3953_v24 = vpack.c.bf16 %v2276_v20, %v2276_v20  ;;  %v2215_v25 = vsel %vm1959_vm10, %v4094_v14, %v2087_v18  ;;  %vm1957_vm12 = vcmp.gt.f32.partialorder %v1544_v22, 0.0  ;;  %v2085_v26 = vmul.f32 0.2, %v1544_v22 }
 0x152   : > { %2853 = vst.msk [vmem:[%s4681_s8 + $0x80] sm:$0xf] %vm2820_vm3, %v3889_v19  ;;  %v3892_v27 = vpack.c.bf16 %v2215_v25, %v2215_v25  ;;  %v2279_v28 = vsel %vm2023_vm11, %v4158_v15, %v2151_v21  ;;  %vm2021_vm13 = vcmp.gt.f32.partialorder %v1800_v23, 0.0  ;;  %v2149_v29 = vmul.f32 0.2, %v1800_v23  ;;  %v4097_v30 = vpop.f32.mrf.mxu0  ;;  %v4161_v31 = vpop.f32.mrf.mxu1 }
 0x153   : > { %2917 = vst.msk [vmem:[%s4681_s8 + $0x180] sm:$0xf] %vm2820_vm3, %v3953_v24  ;;  %v3956_v32 = vpack.c.bf16 %v2279_v28, %v2279_v28  ;;  %v2213_v33 = vsel %vm1957_vm12, %v1544_v22, %v2085_v26  ;;  %vm1962_vm14 = vcmp.gt.f32.partialorder %v4097_v30, 0.0  ;;  %v2090_v34 = vmul.f32 0.2, %v4097_v30 }
 0x154   : > { %2856 = vst.msk [vmem:[%s4681_s8 + $0x8c] sm:$0xf] %vm2820_vm3, %v3892_v27  ;;  %v3890_v35 = vpack.c.bf16 %v2213_v33, %v2213_v33  ;;  %v2277_v36 = vsel %vm2021_vm13, %v1800_v23, %v2149_v29  ;;  %vm2026_vm15 = vcmp.gt.f32.partialorder %v4161_v31, 0.0  ;;  %v2154_v37 = vmul.f32 0.2, %v4161_v31  ;;  %v1557_v38 = vpop.f32.mrf.mxu0  ;;  %v1813_v39 = vpop.f32.mrf.mxu1 }
 0x155   : > { %2920 = vst.msk [vmem:[%s4681_s8 + $0x18c] sm:$0xf] %vm2820_vm3, %v3956_v32  ;;  %v3954_v40 = vpack.c.bf16 %v2277_v36, %v2277_v36  ;;  %v2218_v41 = vsel %vm1962_vm14, %v4097_v30, %v2090_v34  ;;  %vm1960_vm0 = vcmp.gt.f32.partialorder %v1557_v38, 0.0  ;;  %v2088_v42 = vmul.f32 0.2, %v1557_v38 }
 0x156   : > { %2854 = vst.msk [vmem:[%s4681_s8 + $0x84] sm:$0xf] %vm2820_vm3, %v3890_v35  ;;  %v3895_v43 = vpack.c.bf16 %v2218_v41, %v2218_v41  ;;  %v2282_v44 = vsel %vm2026_vm15, %v4161_v31, %v2154_v37  ;;  %vm2024_vm1 = vcmp.gt.f32.partialorder %v1813_v39, 0.0  ;;  %v2152_v45 = vmul.f32 0.2, %v1813_v39  ;;  %v4098_v46 = vpop.f32.mrf.mxu0  ;;  %v4162_v47 = vpop.f32.mrf.mxu1 }
 0x157   : > { %2918 = vst.msk [vmem:[%s4681_s8 + $0x184] sm:$0xf] %vm2820_vm3, %v3954_v40  ;;  %v3959_v48 = vpack.c.bf16 %v2282_v44, %v2282_v44  ;;  %v2216_v49 = vsel %vm1960_vm0, %v1557_v38, %v2088_v42  ;;  %vm1963_vm2 = vcmp.gt.f32.partialorder %v4098_v46, 0.0  ;;  %v2091_v50 = vmul.f32 0.2, %v4098_v46 }
 0x158   : > { %2859 = vst.msk [vmem:[%s4681_s8 + $0x98] sm:$0xf] %vm2820_vm3, %v3895_v43  ;;  %v3893_v51 = vpack.c.bf16 %v2216_v49, %v2216_v49  ;;  %v2280_v52 = vsel %vm2024_vm1, %v1813_v39, %v2152_v45  ;;  %vm2027_vm4 = vcmp.gt.f32.partialorder %v4162_v47, 0.0  ;;  %v2155_v53 = vmul.f32 0.2, %v4162_v47  ;;  %v1560_v54 = vpop.f32.mrf.mxu0  ;;  %v1816_v55 = vpop.f32.mrf.mxu1 }
 0x159   : > { %2923 = vst.msk [vmem:[%s4681_s8 + $0x198] sm:$0xf] %vm2820_vm3, %v3959_v48  ;;  %v3957_v56 = vpack.c.bf16 %v2280_v52, %v2280_v52  ;;  %v2219_v57 = vsel %vm1963_vm2, %v4098_v46, %v2091_v50  ;;  %vm1961_vm5 = vcmp.gt.f32.partialorder %v1560_v54, 0.0  ;;  %v2089_v58 = vmul.f32 0.2, %v1560_v54 }
 0x15a   : > { %2857 = vst.msk [vmem:[%s4681_s8 + $0x90] sm:$0xf] %vm2820_vm3, %v3893_v51  ;;  %v3896_v59 = vpack.c.bf16 %v2219_v57, %v2219_v57  ;;  %v2283_v60 = vsel %vm2027_vm4, %v4162_v47, %v2155_v53  ;;  %vm2025_vm6 = vcmp.gt.f32.partialorder %v1816_v55, 0.0  ;;  %v2153_v61 = vmul.f32 0.2, %v1816_v55  ;;  %v4101_v62 = vpop.f32.mrf.mxu0  ;;  %v4165_v63 = vpop.f32.mrf.mxu1 }
 0x15b   : > { %2921 = vst.msk [vmem:[%s4681_s8 + $0x190] sm:$0xf] %vm2820_vm3, %v3957_v56  ;;  %v3960_v0 = vpack.c.bf16 %v2283_v60, %v2283_v60  ;;  %v2217_v1 = vsel %vm1961_vm5, %v1560_v54, %v2089_v58  ;;  %vm1966_vm7 = vcmp.gt.f32.partialorder %v4101_v62, 0.0  ;;  %v2094_v2 = vmul.f32 0.2, %v4101_v62 }
 0x15c   : > { %2860 = vst.msk [vmem:[%s4681_s8 + $0x9c] sm:$0xf] %vm2820_vm3, %v3896_v59  ;;  %v3894_v3 = vpack.c.bf16 %v2217_v1, %v2217_v1  ;;  %v2281_v4 = vsel %vm2025_vm6, %v1816_v55, %v2153_v61  ;;  %vm2030_vm8 = vcmp.gt.f32.partialorder %v4165_v63, 0.0  ;;  %v2158_v5 = vmul.f32 0.2, %v4165_v63  ;;  %v1573_v6 = vpop.f32.mrf.mxu0  ;;  %v1829_v7 = vpop.f32.mrf.mxu1 }
 0x15d   : > { %2924 = vst.msk [vmem:[%s4681_s8 + $0x19c] sm:$0xf] %vm2820_vm3, %v3960_v0  ;;  %v3958_v8 = vpack.c.bf16 %v2281_v4, %v2281_v4  ;;  %v2222_v9 = vsel %vm1966_vm7, %v4101_v62, %v2094_v2  ;;  %vm1964_vm9 = vcmp.gt.f32.partialorder %v1573_v6, 0.0  ;;  %v2092_v10 = vmul.f32 0.2, %v1573_v6 }
 0x15e   : > { %2858 = vst.msk [vmem:[%s4681_s8 + $0x94] sm:$0xf] %vm2820_vm3, %v3894_v3  ;;  %v3899_v11 = vpack.c.bf16 %v2222_v9, %v2222_v9  ;;  %v2286_v12 = vsel %vm2030_vm8, %v4165_v63, %v2158_v5  ;;  %vm2028_vm10 = vcmp.gt.f32.partialorder %v1829_v7, 0.0  ;;  %v2156_v13 = vmul.f32 0.2, %v1829_v7  ;;  %v4102_v14 = vpop.f32.mrf.mxu0  ;;  %v4166_v15 = vpop.f32.mrf.mxu1 }
 0x15f   : > { %2922 = vst.msk [vmem:[%s4681_s8 + $0x194] sm:$0xf] %vm2820_vm3, %v3958_v8  ;;  %v3963_v16 = vpack.c.bf16 %v2286_v12, %v2286_v12  ;;  %v2220_v17 = vsel %vm1964_vm9, %v1573_v6, %v2092_v10  ;;  %vm1967_vm11 = vcmp.gt.f32.partialorder %v4102_v14, 0.0  ;;  %v2095_v18 = vmul.f32 0.2, %v4102_v14 }
 0x160   : > { %2863 = vst.msk [vmem:[%s4681_s8 + $0xa8] sm:$0xf] %vm2820_vm3, %v3899_v11  ;;  %v3897_v19 = vpack.c.bf16 %v2220_v17, %v2220_v17  ;;  %v2284_v20 = vsel %vm2028_vm10, %v1829_v7, %v2156_v13  ;;  %vm2031_vm12 = vcmp.gt.f32.partialorder %v4166_v15, 0.0  ;;  %v2159_v21 = vmul.f32 0.2, %v4166_v15  ;;  %v1576_v22 = vpop.f32.mrf.mxu0  ;;  %v1832_v23 = vpop.f32.mrf.mxu1 }
 0x161   : > { %2927 = vst.msk [vmem:[%s4681_s8 + $0x1a8] sm:$0xf] %vm2820_vm3, %v3963_v16  ;;  %v3961_v24 = vpack.c.bf16 %v2284_v20, %v2284_v20  ;;  %v2223_v25 = vsel %vm1967_vm11, %v4102_v14, %v2095_v18  ;;  %vm1965_vm13 = vcmp.gt.f32.partialorder %v1576_v22, 0.0  ;;  %v2093_v26 = vmul.f32 0.2, %v1576_v22 }
 0x162   : > { %2861 = vst.msk [vmem:[%s4681_s8 + $0xa0] sm:$0xf] %vm2820_vm3, %v3897_v19  ;;  %v3900_v27 = vpack.c.bf16 %v2223_v25, %v2223_v25  ;;  %v2287_v28 = vsel %vm2031_vm12, %v4166_v15, %v2159_v21  ;;  %vm2029_vm14 = vcmp.gt.f32.partialorder %v1832_v23, 0.0  ;;  %v2157_v29 = vmul.f32 0.2, %v1832_v23  ;;  %v4105_v30 = vpop.f32.mrf.mxu0  ;;  %v4169_v31 = vpop.f32.mrf.mxu1 }
 0x163   : > { %2925 = vst.msk [vmem:[%s4681_s8 + $0x1a0] sm:$0xf] %vm2820_vm3, %v3961_v24  ;;  %v3964_v32 = vpack.c.bf16 %v2287_v28, %v2287_v28  ;;  %v2221_v33 = vsel %vm1965_vm13, %v1576_v22, %v2093_v26  ;;  %vm1970_vm15 = vcmp.gt.f32.partialorder %v4105_v30, 0.0  ;;  %v2098_v34 = vmul.f32 0.2, %v4105_v30 }
 0x164   : > { %2864 = vst.msk [vmem:[%s4681_s8 + $0xac] sm:$0xf] %vm2820_vm3, %v3900_v27  ;;  %v3898_v35 = vpack.c.bf16 %v2221_v33, %v2221_v33  ;;  %v2285_v36 = vsel %vm2029_vm14, %v1832_v23, %v2157_v29  ;;  %vm2034_vm0 = vcmp.gt.f32.partialorder %v4169_v31, 0.0  ;;  %v2162_v37 = vmul.f32 0.2, %v4169_v31  ;;  %v1589_v38 = vpop.f32.mrf.mxu0  ;;  %v1845_v39 = vpop.f32.mrf.mxu1 }
 0x165   : > { %2928 = vst.msk [vmem:[%s4681_s8 + $0x1ac] sm:$0xf] %vm2820_vm3, %v3964_v32  ;;  %v3962_v40 = vpack.c.bf16 %v2285_v36, %v2285_v36  ;;  %v2226_v41 = vsel %vm1970_vm15, %v4105_v30, %v2098_v34  ;;  %vm1968_vm1 = vcmp.gt.f32.partialorder %v1589_v38, 0.0  ;;  %v2096_v42 = vmul.f32 0.2, %v1589_v38 }
 0x166   : > { %2862 = vst.msk [vmem:[%s4681_s8 + $0xa4] sm:$0xf] %vm2820_vm3, %v3898_v35  ;;  %v3903_v43 = vpack.c.bf16 %v2226_v41, %v2226_v41  ;;  %v2290_v44 = vsel %vm2034_vm0, %v4169_v31, %v2162_v37  ;;  %vm2032_vm2 = vcmp.gt.f32.partialorder %v1845_v39, 0.0  ;;  %v2160_v45 = vmul.f32 0.2, %v1845_v39  ;;  %v4106_v46 = vpop.f32.mrf.mxu0  ;;  %v4170_v47 = vpop.f32.mrf.mxu1 }
 0x167   : > { %2926 = vst.msk [vmem:[%s4681_s8 + $0x1a4] sm:$0xf] %vm2820_vm3, %v3962_v40  ;;  %v3967_v48 = vpack.c.bf16 %v2290_v44, %v2290_v44  ;;  %v2224_v49 = vsel %vm1968_vm1, %v1589_v38, %v2096_v42  ;;  %vm1971_vm4 = vcmp.gt.f32.partialorder %v4106_v46, 0.0  ;;  %v2099_v50 = vmul.f32 0.2, %v4106_v46 }
 0x168   : > { %2867 = vst.msk [vmem:[%s4681_s8 + $0xb8] sm:$0xf] %vm2820_vm3, %v3903_v43  ;;  %v3901_v51 = vpack.c.bf16 %v2224_v49, %v2224_v49  ;;  %v2288_v52 = vsel %vm2032_vm2, %v1845_v39, %v2160_v45  ;;  %vm2035_vm5 = vcmp.gt.f32.partialorder %v4170_v47, 0.0  ;;  %v2163_v53 = vmul.f32 0.2, %v4170_v47  ;;  %v1592_v54 = vpop.f32.mrf.mxu0  ;;  %v1848_v55 = vpop.f32.mrf.mxu1 }
 0x169   : > { %2931 = vst.msk [vmem:[%s4681_s8 + $0x1b8] sm:$0xf] %vm2820_vm3, %v3967_v48  ;;  %v3965_v56 = vpack.c.bf16 %v2288_v52, %v2288_v52  ;;  %v2227_v57 = vsel %vm1971_vm4, %v4106_v46, %v2099_v50  ;;  %vm1969_vm6 = vcmp.gt.f32.partialorder %v1592_v54, 0.0  ;;  %v2097_v58 = vmul.f32 0.2, %v1592_v54 }
 0x16a   : > { %2865 = vst.msk [vmem:[%s4681_s8 + $0xb0] sm:$0xf] %vm2820_vm3, %v3901_v51  ;;  %v3904_v59 = vpack.c.bf16 %v2227_v57, %v2227_v57  ;;  %v2291_v60 = vsel %vm2035_vm5, %v4170_v47, %v2163_v53  ;;  %vm2033_vm7 = vcmp.gt.f32.partialorder %v1848_v55, 0.0  ;;  %v2161_v61 = vmul.f32 0.2, %v1848_v55  ;;  %v4109_v62 = vpop.f32.mrf.mxu0  ;;  %v4173_v63 = vpop.f32.mrf.mxu1 }
 0x16b   : > { %2929 = vst.msk [vmem:[%s4681_s8 + $0x1b0] sm:$0xf] %vm2820_vm3, %v3965_v56  ;;  %v3968_v0 = vpack.c.bf16 %v2291_v60, %v2291_v60  ;;  %v2225_v1 = vsel %vm1969_vm6, %v1592_v54, %v2097_v58  ;;  %vm1974_vm8 = vcmp.gt.f32.partialorder %v4109_v62, 0.0  ;;  %v2102_v2 = vmul.f32 0.2, %v4109_v62 }
 0x16c   : > { %2868 = vst.msk [vmem:[%s4681_s8 + $0xbc] sm:$0xf] %vm2820_vm3, %v3904_v59  ;;  %v3902_v3 = vpack.c.bf16 %v2225_v1, %v2225_v1  ;;  %v2289_v4 = vsel %vm2033_vm7, %v1848_v55, %v2161_v61  ;;  %vm2038_vm9 = vcmp.gt.f32.partialorder %v4173_v63, 0.0  ;;  %v2166_v5 = vmul.f32 0.2, %v4173_v63  ;;  %v1605_v6 = vpop.f32.mrf.mxu0  ;;  %v1861_v7 = vpop.f32.mrf.mxu1 }
 0x16d   : > { %2932 = vst.msk [vmem:[%s4681_s8 + $0x1bc] sm:$0xf] %vm2820_vm3, %v3968_v0  ;;  %v3966_v8 = vpack.c.bf16 %v2289_v4, %v2289_v4  ;;  %v2230_v9 = vsel %vm1974_vm8, %v4109_v62, %v2102_v2  ;;  %vm1972_vm10 = vcmp.gt.f32.partialorder %v1605_v6, 0.0  ;;  %v2100_v10 = vmul.f32 0.2, %v1605_v6 }
 0x16e   : > { %2866 = vst.msk [vmem:[%s4681_s8 + $0xb4] sm:$0xf] %vm2820_vm3, %v3902_v3  ;;  %v3907_v11 = vpack.c.bf16 %v2230_v9, %v2230_v9  ;;  %v2294_v12 = vsel %vm2038_vm9, %v4173_v63, %v2166_v5  ;;  %vm2036_vm11 = vcmp.gt.f32.partialorder %v1861_v7, 0.0  ;;  %v2164_v13 = vmul.f32 0.2, %v1861_v7  ;;  %v4110_v14 = vpop.f32.mrf.mxu0  ;;  %v4174_v15 = vpop.f32.mrf.mxu1 }
 0x16f   : > { %2930 = vst.msk [vmem:[%s4681_s8 + $0x1b4] sm:$0xf] %vm2820_vm3, %v3966_v8  ;;  %v3971_v16 = vpack.c.bf16 %v2294_v12, %v2294_v12  ;;  %v2228_v17 = vsel %vm1972_vm10, %v1605_v6, %v2100_v10  ;;  %vm1975_vm12 = vcmp.gt.f32.partialorder %v4110_v14, 0.0  ;;  %v2103_v18 = vmul.f32 0.2, %v4110_v14 }
 0x170   : > { %2871 = vst.msk [vmem:[%s4681_s8 + $0xc8] sm:$0xf] %vm2820_vm3, %v3907_v11  ;;  %v3905_v19 = vpack.c.bf16 %v2228_v17, %v2228_v17  ;;  %v2292_v20 = vsel %vm2036_vm11, %v1861_v7, %v2164_v13  ;;  %vm2039_vm13 = vcmp.gt.f32.partialorder %v4174_v15, 0.0  ;;  %v2167_v21 = vmul.f32 0.2, %v4174_v15  ;;  %v1608_v22 = vpop.f32.mrf.mxu0  ;;  %v1864_v23 = vpop.f32.mrf.mxu1 }
 0x171   : > { %2935 = vst.msk [vmem:[%s4681_s8 + $0x1c8] sm:$0xf] %vm2820_vm3, %v3971_v16  ;;  %v3969_v24 = vpack.c.bf16 %v2292_v20, %v2292_v20  ;;  %v2231_v25 = vsel %vm1975_vm12, %v4110_v14, %v2103_v18  ;;  %vm1973_vm14 = vcmp.gt.f32.partialorder %v1608_v22, 0.0  ;;  %v2101_v26 = vmul.f32 0.2, %v1608_v22 }
 0x172   : > { %2869 = vst.msk [vmem:[%s4681_s8 + $0xc0] sm:$0xf] %vm2820_vm3, %v3905_v19  ;;  %v3908_v27 = vpack.c.bf16 %v2231_v25, %v2231_v25  ;;  %v2295_v28 = vsel %vm2039_vm13, %v4174_v15, %v2167_v21  ;;  %vm2037_vm15 = vcmp.gt.f32.partialorder %v1864_v23, 0.0  ;;  %v2165_v29 = vmul.f32 0.2, %v1864_v23  ;;  %v4113_v30 = vpop.f32.mrf.mxu0  ;;  %v4177_v31 = vpop.f32.mrf.mxu1 }
 0x173   : > { %2933 = vst.msk [vmem:[%s4681_s8 + $0x1c0] sm:$0xf] %vm2820_vm3, %v3969_v24  ;;  %v3972_v32 = vpack.c.bf16 %v2295_v28, %v2295_v28  ;;  %v2229_v33 = vsel %vm1973_vm14, %v1608_v22, %v2101_v26  ;;  %vm1978_vm0 = vcmp.gt.f32.partialorder %v4113_v30, 0.0  ;;  %v2106_v34 = vmul.f32 0.2, %v4113_v30 }
 0x174   : > { %2872 = vst.msk [vmem:[%s4681_s8 + $0xcc] sm:$0xf] %vm2820_vm3, %v3908_v27  ;;  %v3906_v35 = vpack.c.bf16 %v2229_v33, %v2229_v33  ;;  %v2293_v36 = vsel %vm2037_vm15, %v1864_v23, %v2165_v29  ;;  %vm2042_vm1 = vcmp.gt.f32.partialorder %v4177_v31, 0.0  ;;  %v2170_v37 = vmul.f32 0.2, %v4177_v31  ;;  %v1621_v38 = vpop.f32.mrf.mxu0  ;;  %v1877_v39 = vpop.f32.mrf.mxu1 }
 0x175   : > { %2936 = vst.msk [vmem:[%s4681_s8 + $0x1cc] sm:$0xf] %vm2820_vm3, %v3972_v32  ;;  %v3970_v40 = vpack.c.bf16 %v2293_v36, %v2293_v36  ;;  %v2234_v41 = vsel %vm1978_vm0, %v4113_v30, %v2106_v34  ;;  %vm1976_vm2 = vcmp.gt.f32.partialorder %v1621_v38, 0.0  ;;  %v2104_v42 = vmul.f32 0.2, %v1621_v38 }
 0x176   : > { %2870 = vst.msk [vmem:[%s4681_s8 + $0xc4] sm:$0xf] %vm2820_vm3, %v3906_v35  ;;  %v3911_v43 = vpack.c.bf16 %v2234_v41, %v2234_v41  ;;  %v2298_v44 = vsel %vm2042_vm1, %v4177_v31, %v2170_v37  ;;  %vm2040_vm4 = vcmp.gt.f32.partialorder %v1877_v39, 0.0  ;;  %v2168_v45 = vmul.f32 0.2, %v1877_v39  ;;  %v4114_v46 = vpop.f32.mrf.mxu0  ;;  %v4178_v47 = vpop.f32.mrf.mxu1 }
 0x177   : > { %2934 = vst.msk [vmem:[%s4681_s8 + $0x1c4] sm:$0xf] %vm2820_vm3, %v3970_v40  ;;  %v3975_v48 = vpack.c.bf16 %v2298_v44, %v2298_v44  ;;  %v2232_v49 = vsel %vm1976_vm2, %v1621_v38, %v2104_v42  ;;  %vm1979_vm5 = vcmp.gt.f32.partialorder %v4114_v46, 0.0  ;;  %v2107_v50 = vmul.f32 0.2, %v4114_v46 }
 0x178   : > { %2875 = vst.msk [vmem:[%s4681_s8 + $0xd8] sm:$0xf] %vm2820_vm3, %v3911_v43  ;;  %v3909_v51 = vpack.c.bf16 %v2232_v49, %v2232_v49  ;;  %v2296_v52 = vsel %vm2040_vm4, %v1877_v39, %v2168_v45  ;;  %vm2043_vm6 = vcmp.gt.f32.partialorder %v4178_v47, 0.0  ;;  %v2171_v53 = vmul.f32 0.2, %v4178_v47  ;;  %v1624_v54 = vpop.f32.mrf.mxu0  ;;  %v1880_v55 = vpop.f32.mrf.mxu1 }
 0x179   : > { %2939 = vst.msk [vmem:[%s4681_s8 + $0x1d8] sm:$0xf] %vm2820_vm3, %v3975_v48  ;;  %v3973_v56 = vpack.c.bf16 %v2296_v52, %v2296_v52  ;;  %v2235_v57 = vsel %vm1979_vm5, %v4114_v46, %v2107_v50  ;;  %vm1977_vm7 = vcmp.gt.f32.partialorder %v1624_v54, 0.0  ;;  %v2105_v58 = vmul.f32 0.2, %v1624_v54 }
 0x17a   : > { %2873 = vst.msk [vmem:[%s4681_s8 + $0xd0] sm:$0xf] %vm2820_vm3, %v3909_v51  ;;  %v3912_v59 = vpack.c.bf16 %v2235_v57, %v2235_v57  ;;  %v2299_v60 = vsel %vm2043_vm6, %v4178_v47, %v2171_v53  ;;  %vm2041_vm8 = vcmp.gt.f32.partialorder %v1880_v55, 0.0  ;;  %v2169_v61 = vmul.f32 0.2, %v1880_v55  ;;  %v4117_v62 = vpop.f32.mrf.mxu0  ;;  %v4181_v63 = vpop.f32.mrf.mxu1 }
 0x17b   : > { %2937 = vst.msk [vmem:[%s4681_s8 + $0x1d0] sm:$0xf] %vm2820_vm3, %v3973_v56  ;;  %v3976_v0 = vpack.c.bf16 %v2299_v60, %v2299_v60  ;;  %v2233_v1 = vsel %vm1977_vm7, %v1624_v54, %v2105_v58  ;;  %vm1982_vm9 = vcmp.gt.f32.partialorder %v4117_v62, 0.0  ;;  %v2110_v2 = vmul.f32 0.2, %v4117_v62 }
 0x17c   : > { %2876 = vst.msk [vmem:[%s4681_s8 + $0xdc] sm:$0xf] %vm2820_vm3, %v3912_v59  ;;  %v3910_v3 = vpack.c.bf16 %v2233_v1, %v2233_v1  ;;  %v2297_v4 = vsel %vm2041_vm8, %v1880_v55, %v2169_v61  ;;  %vm2046_vm10 = vcmp.gt.f32.partialorder %v4181_v63, 0.0  ;;  %v2174_v5 = vmul.f32 0.2, %v4181_v63  ;;  %v1637_v6 = vpop.f32.mrf.mxu0  ;;  %v1893_v7 = vpop.f32.mrf.mxu1 }
 0x17d   : > { %2940 = vst.msk [vmem:[%s4681_s8 + $0x1dc] sm:$0xf] %vm2820_vm3, %v3976_v0  ;;  %v3974_v8 = vpack.c.bf16 %v2297_v4, %v2297_v4  ;;  %v2238_v9 = vsel %vm1982_vm9, %v4117_v62, %v2110_v2  ;;  %vm1980_vm11 = vcmp.gt.f32.partialorder %v1637_v6, 0.0  ;;  %v2108_v10 = vmul.f32 0.2, %v1637_v6  ;;  %v2982_v4 = vld [vmem:[%s4681_s8 + $0x8] sm:$0xff] (%p4390_p6)  }
 0x17e   : > { %2874 = vst.msk [vmem:[%s4681_s8 + $0xd4] sm:$0xf] %vm2820_vm3, %v3910_v3  ;;  %v3915_v11 = vpack.c.bf16 %v2238_v9, %v2238_v9  ;;  %v2302_v12 = vsel %vm2046_vm10, %v4181_v63, %v2174_v5  ;;  %vm2044_vm12 = vcmp.gt.f32.partialorder %v1893_v7, 0.0  ;;  %v2172_v13 = vmul.f32 0.2, %v1893_v7  ;;  %v4118_v14 = vpop.f32.mrf.mxu0  ;;  %v4182_v15 = vpop.f32.mrf.mxu1  ;;  %v2978_v3 = vld [vmem:[%s4681_s8] sm:$0xff] (%p4390_p6)  }
 0x17f   : > { %2938 = vst.msk [vmem:[%s4681_s8 + $0x1d4] sm:$0xf] %vm2820_vm3, %v3974_v8  ;;  %v3979_v16 = vpack.c.bf16 %v2302_v12, %v2302_v12  ;;  %v2236_v17 = vsel %vm1980_vm11, %v1637_v6, %v2108_v10  ;;  %vm1983_vm13 = vcmp.gt.f32.partialorder %v4118_v14, 0.0  ;;  %v2111_v18 = vmul.f32 0.2, %v4118_v14  ;;  %v2986_v5 = vld [vmem:[%s4681_s8 + $0x10] sm:$0xff] (%p4390_p6)   ;;  %2979 = vst [vmem:[%s4948_s17] sm:$0xff] (%p4390_p6), %v2978_v3  }
 0x180   : > { %2879 = vst.msk [vmem:[%s4681_s8 + $0xe8] sm:$0xf] %vm2820_vm3, %v3915_v11  ;;  %v3913_v19 = vpack.c.bf16 %v2236_v17, %v2236_v17  ;;  %v2300_v20 = vsel %vm2044_vm12, %v1893_v7, %v2172_v13  ;;  %vm2047_vm14 = vcmp.gt.f32.partialorder %v4182_v15, 0.0  ;;  %v2175_v21 = vmul.f32 0.2, %v4182_v15  ;;  %v1640_v22 = vpop.f32.mrf.mxu0  ;;  %v1896_v23 = vpop.f32.mrf.mxu1  ;;  %v2990_v6 = vld [vmem:[%s4681_s8 + $0x18] sm:$0xff] (%p4390_p6)  }
 0x181   : > { %2943 = vst.msk [vmem:[%s4681_s8 + $0x1e8] sm:$0xf] %vm2820_vm3, %v3979_v16  ;;  %v3977_v24 = vpack.c.bf16 %v2300_v20, %v2300_v20  ;;  %v2239_v25 = vsel %vm1983_vm13, %v4118_v14, %v2111_v18  ;;  %vm1981_vm15 = vcmp.gt.f32.partialorder %v1640_v22, 0.0  ;;  %v2109_v26 = vmul.f32 0.2, %v1640_v22  ;;  %v2994_v7 = vld [vmem:[%s4681_s8 + $0x20] sm:$0xff] (%p4390_p6)  }
 0x182   : > { %2877 = vst.msk [vmem:[%s4681_s8 + $0xe0] sm:$0xf] %vm2820_vm3, %v3913_v19  ;;  %v3916_v27 = vpack.c.bf16 %v2239_v25, %v2239_v25  ;;  %v2303_v28 = vsel %vm2047_vm14, %v4182_v15, %v2175_v21  ;;  %vm2045_vm0 = vcmp.gt.f32.partialorder %v1896_v23, 0.0  ;;  %v2173_v29 = vmul.f32 0.2, %v1896_v23  ;;  %v4121_v30 = vpop.f32.mrf.mxu0  ;;  %v4185_v31 = vpop.f32.mrf.mxu1  ;;  %v2998_v8 = vld [vmem:[%s4681_s8 + $0x28] sm:$0xff] (%p4390_p6)  }
 0x183   : > { %2941 = vst.msk [vmem:[%s4681_s8 + $0x1e0] sm:$0xf] %vm2820_vm3, %v3977_v24  ;;  %v3980_v32 = vpack.c.bf16 %v2303_v28, %v2303_v28  ;;  %v2237_v33 = vsel %vm1981_vm15, %v1640_v22, %v2109_v26  ;;  %vm1986_vm1 = vcmp.gt.f32.partialorder %v4121_v30, 0.0  ;;  %v2114_v34 = vmul.f32 0.2, %v4121_v30  ;;  %2983 = vst [vmem:[%s4948_s17 + $0x8] sm:$0xff] (%p4390_p6), %v2982_v4  }
 0x184   : > { %2880 = vst.msk [vmem:[%s4681_s8 + $0xec] sm:$0xf] %vm2820_vm3, %v3916_v27  ;;  %v3914_v35 = vpack.c.bf16 %v2237_v33, %v2237_v33  ;;  %v2301_v36 = vsel %vm2045_vm0, %v1896_v23, %v2173_v29  ;;  %vm2050_vm2 = vcmp.gt.f32.partialorder %v4185_v31, 0.0  ;;  %v2178_v37 = vmul.f32 0.2, %v4185_v31  ;;  %v1653_v38 = vpop.f32.mrf.mxu0  ;;  %v1909_v39 = vpop.f32.mrf.mxu1  ;;  %2987 = vst [vmem:[%s4948_s17 + $0x10] sm:$0xff] (%p4390_p6), %v2986_v5  }
 0x185   : > { %2944 = vst.msk [vmem:[%s4681_s8 + $0x1ec] sm:$0xf] %vm2820_vm3, %v3980_v32  ;;  %v3978_v40 = vpack.c.bf16 %v2301_v36, %v2301_v36  ;;  %v2242_v41 = vsel %vm1986_vm1, %v4121_v30, %v2114_v34  ;;  %vm1984_vm4 = vcmp.gt.f32.partialorder %v1653_v38, 0.0  ;;  %v2112_v42 = vmul.f32 0.2, %v1653_v38  ;;  %2991 = vst [vmem:[%s4948_s17 + $0x18] sm:$0xff] (%p4390_p6), %v2990_v6  }
 0x186   : > { %2878 = vst.msk [vmem:[%s4681_s8 + $0xe4] sm:$0xf] %vm2820_vm3, %v3914_v35  ;;  %v3919_v43 = vpack.c.bf16 %v2242_v41, %v2242_v41  ;;  %v2306_v44 = vsel %vm2050_vm2, %v4185_v31, %v2178_v37  ;;  %vm2048_vm5 = vcmp.gt.f32.partialorder %v1909_v39, 0.0  ;;  %v2176_v45 = vmul.f32 0.2, %v1909_v39  ;;  %v4122_v46 = vpop.f32.mrf.mxu0  ;;  %v4186_v47 = vpop.f32.mrf.mxu1  ;;  %2995 = vst [vmem:[%s4948_s17 + $0x20] sm:$0xff] (%p4390_p6), %v2994_v7  }
 0x187   : > { %2942 = vst.msk [vmem:[%s4681_s8 + $0x1e4] sm:$0xf] %vm2820_vm3, %v3978_v40  ;;  %v3983_v48 = vpack.c.bf16 %v2306_v44, %v2306_v44  ;;  %v2240_v49 = vsel %vm1984_vm4, %v1653_v38, %v2112_v42  ;;  %vm1987_vm6 = vcmp.gt.f32.partialorder %v4122_v46, 0.0  ;;  %v2115_v50 = vmul.f32 0.2, %v4122_v46  ;;  %2999 = vst [vmem:[%s4948_s17 + $0x28] sm:$0xff] (%p4390_p6), %v2998_v8  }
 0x188   : > { %2883 = vst.msk [vmem:[%s4681_s8 + $0xf8] sm:$0xf] %vm2820_vm3, %v3919_v43  ;;  %v3917_v51 = vpack.c.bf16 %v2240_v49, %v2240_v49  ;;  %v2304_v52 = vsel %vm2048_vm5, %v1909_v39, %v2176_v45  ;;  %vm2051_vm7 = vcmp.gt.f32.partialorder %v4186_v47, 0.0  ;;  %v2179_v53 = vmul.f32 0.2, %v4186_v47  ;;  %v1656_v54 = vpop.f32.mrf.mxu0  ;;  %v1912_v55 = vpop.f32.mrf.mxu1  ;;  %v3002_v9 = vld [vmem:[%s4681_s8 + $0x30] sm:$0xff] (%p4390_p6)  }
 0x189   : > { %2947 = vst.msk [vmem:[%s4681_s8 + $0x1f8] sm:$0xf] %vm2820_vm3, %v3983_v48  ;;  %v3981_v56 = vpack.c.bf16 %v2304_v52, %v2304_v52  ;;  %v2243_v57 = vsel %vm1987_vm6, %v4122_v46, %v2115_v50  ;;  %vm1985_vm8 = vcmp.gt.f32.partialorder %v1656_v54, 0.0  ;;  %v2113_v58 = vmul.f32 0.2, %v1656_v54  ;;  %v3006_v10 = vld [vmem:[%s4681_s8 + $0x38] sm:$0xff] (%p4390_p6)  }
 0x18a   : > { %2881 = vst.msk [vmem:[%s4681_s8 + $0xf0] sm:$0xf] %vm2820_vm3, %v3917_v51  ;;  %v3920_v59 = vpack.c.bf16 %v2243_v57, %v2243_v57  ;;  %v2307_v60 = vsel %vm2051_vm7, %v4186_v47, %v2179_v53  ;;  %vm2049_vm9 = vcmp.gt.f32.partialorder %v1912_v55, 0.0  ;;  %v2177_v61 = vmul.f32 0.2, %v1912_v55  ;;  %v3010_v11 = vld [vmem:[%s4681_s8 + $0x40] sm:$0xff] (%p4390_p6)  }
 0x18b   : > { %2945 = vst.msk [vmem:[%s4681_s8 + $0x1f0] sm:$0xf] %vm2820_vm3, %v3981_v56  ;;  %v3984_v62 = vpack.c.bf16 %v2307_v60, %v2307_v60  ;;  %v2241_v63 = vsel %vm1985_vm8, %v1656_v54, %v2113_v58  ;;  %2955 = sbr.rel (!%p4390_p6) target bundleno = 427 (0x1ab), region = 73  ;;  %3003 = vst [vmem:[%s4948_s17 + $0x30] sm:$0xff] (%p4390_p6), %v3002_v9   ;;  %v3014_v12 = vld [vmem:[%s4681_s8 + $0x48] sm:$0xff] (%p4390_p6)   ;;  %v3018_v13 = vld [vmem:[%s4681_s8 + $0x50] sm:$0xff] (%p4390_p6)  }
 0x18c   : > { %2884 = vst.msk [vmem:[%s4681_s8 + $0xfc] sm:$0xf] %vm2820_vm3, %v3920_v59  ;;  %v3918_v0 = vpack.c.bf16 %v2241_v63, %v2241_v63  ;;  %v2305_v1 = vsel %vm2049_vm9, %v1912_v55, %v2177_v61  ;;  %3007 = vst [vmem:[%s4948_s17 + $0x38] sm:$0xff] (%p4390_p6), %v3006_v10   ;;  %v3022_v14 = vld [vmem:[%s4681_s8 + $0x58] sm:$0xff] (%p4390_p6)   ;;  %v3026_v15 = vld [vmem:[%s4681_s8 + $0x60] sm:$0xff] (%p4390_p6)  }
 0x18d   : > { %2948 = vst.msk [vmem:[%s4681_s8 + $0x1fc] sm:$0xf] %vm2820_vm3, %v3984_v62  ;;  %v3982_v2 = vpack.c.bf16 %v2305_v1, %v2305_v1  ;;  %3011 = vst [vmem:[%s4948_s17 + $0x40] sm:$0xff] (%p4390_p6), %v3010_v11   ;;  %v3030_v16 = vld [vmem:[%s4681_s8 + $0x68] sm:$0xff] (%p4390_p6)   ;;  %v3034_v17 = vld [vmem:[%s4681_s8 + $0x70] sm:$0xff] (%p4390_p6)  }
 0x18e   : > { %2882 = vst.msk [vmem:[%s4681_s8 + $0xf4] sm:$0xf] %vm2820_vm3, %v3918_v0  ;;  %3015 = vst [vmem:[%s4948_s17 + $0x48] sm:$0xff] (%p4390_p6), %v3014_v12   ;;  %v3038_v18 = vld [vmem:[%s4681_s8 + $0x78] sm:$0xff] (%p4390_p6)   ;;  %v3042_v19 = vld [vmem:[%s4681_s8 + $0x80] sm:$0xff] (%p4390_p6)  }
 0x18f   : > { %2946 = vst.msk [vmem:[%s4681_s8 + $0x1f4] sm:$0xf] %vm2820_vm3, %v3982_v2  ;;  %3019 = vst [vmem:[%s4948_s17 + $0x50] sm:$0xff] (%p4390_p6), %v3018_v13   ;;  %v3046_v20 = vld [vmem:[%s4681_s8 + $0x88] sm:$0xff] (%p4390_p6)   ;;  %v3050_v21 = vld [vmem:[%s4681_s8 + $0x90] sm:$0xff] (%p4390_p6)  }
 0x190   : > { %3023 = vst [vmem:[%s4948_s17 + $0x58] sm:$0xff] %v3022_v14   ;;  %3027 = vst [vmem:[%s4948_s17 + $0x60] sm:$0xff] %v3026_v15   ;;  %v3054_v22 = vld [vmem:[%s4681_s8 + $0x98] sm:$0xff]   ;;  %v3058_v23 = vld [vmem:[%s4681_s8 + $0xa0] sm:$0xff]  }
 0x191   : > { %3031 = vst [vmem:[%s4948_s17 + $0x68] sm:$0xff] %v3030_v16   ;;  %3035 = vst [vmem:[%s4948_s17 + $0x70] sm:$0xff] %v3034_v17   ;;  %v3062_v24 = vld [vmem:[%s4681_s8 + $0xa8] sm:$0xff]   ;;  %v3066_v25 = vld [vmem:[%s4681_s8 + $0xb0] sm:$0xff]  }
 0x192   : > { %3039 = vst [vmem:[%s4948_s17 + $0x78] sm:$0xff] %v3038_v18   ;;  %3043 = vst [vmem:[%s4948_s17 + $0x80] sm:$0xff] %v3042_v19   ;;  %v3070_v26 = vld [vmem:[%s4681_s8 + $0xb8] sm:$0xff]   ;;  %v3074_v27 = vld [vmem:[%s4681_s8 + $0xc0] sm:$0xff]  }
 0x193   : > { %3047 = vst [vmem:[%s4948_s17 + $0x88] sm:$0xff] %v3046_v20   ;;  %3051 = vst [vmem:[%s4948_s17 + $0x90] sm:$0xff] %v3050_v21   ;;  %v3078_v28 = vld [vmem:[%s4681_s8 + $0xc8] sm:$0xff]   ;;  %v3082_v29 = vld [vmem:[%s4681_s8 + $0xd0] sm:$0xff]  }
 0x194   : > { %3055 = vst [vmem:[%s4948_s17 + $0x98] sm:$0xff] %v3054_v22   ;;  %3059 = vst [vmem:[%s4948_s17 + $0xa0] sm:$0xff] %v3058_v23   ;;  %v3086_v30 = vld [vmem:[%s4681_s8 + $0xd8] sm:$0xff]   ;;  %v3090_v31 = vld [vmem:[%s4681_s8 + $0xe0] sm:$0xff]  }
 0x195   : > { %3063 = vst [vmem:[%s4948_s17 + $0xa8] sm:$0xff] %v3062_v24   ;;  %3067 = vst [vmem:[%s4948_s17 + $0xb0] sm:$0xff] %v3066_v25   ;;  %v3094_v32 = vld [vmem:[%s4681_s8 + $0xe8] sm:$0xff]   ;;  %v3098_v33 = vld [vmem:[%s4681_s8 + $0xf0] sm:$0xff]  }
 0x196   : > { %3071 = vst [vmem:[%s4948_s17 + $0xb8] sm:$0xff] %v3070_v26   ;;  %3075 = vst [vmem:[%s4948_s17 + $0xc0] sm:$0xff] %v3074_v27   ;;  %v3102_v34 = vld [vmem:[%s4681_s8 + $0xf8] sm:$0xff]   ;;  %v3106_v35 = vld [vmem:[%s4681_s8 + $0x100] sm:$0xff]  }
 0x197   : > { %3079 = vst [vmem:[%s4948_s17 + $0xc8] sm:$0xff] %v3078_v28   ;;  %3083 = vst [vmem:[%s4948_s17 + $0xd0] sm:$0xff] %v3082_v29   ;;  %v3110_v36 = vld [vmem:[%s4681_s8 + $0x108] sm:$0xff]   ;;  %v3114_v37 = vld [vmem:[%s4681_s8 + $0x110] sm:$0xff]  }
 0x198   : > { %3087 = vst [vmem:[%s4948_s17 + $0xd8] sm:$0xff] %v3086_v30   ;;  %3091 = vst [vmem:[%s4948_s17 + $0xe0] sm:$0xff] %v3090_v31   ;;  %v3118_v38 = vld [vmem:[%s4681_s8 + $0x118] sm:$0xff]   ;;  %v3122_v39 = vld [vmem:[%s4681_s8 + $0x120] sm:$0xff]  }
 0x199   : > { %3095 = vst [vmem:[%s4948_s17 + $0xe8] sm:$0xff] %v3094_v32   ;;  %3099 = vst [vmem:[%s4948_s17 + $0xf0] sm:$0xff] %v3098_v33   ;;  %v3126_v40 = vld [vmem:[%s4681_s8 + $0x128] sm:$0xff]   ;;  %v3130_v41 = vld [vmem:[%s4681_s8 + $0x130] sm:$0xff]  }
 0x19a   : > { %3103 = vst [vmem:[%s4948_s17 + $0xf8] sm:$0xff] %v3102_v34   ;;  %3107 = vst [vmem:[%s4948_s17 + $0x200] sm:$0xff] %v3106_v35   ;;  %v3134_v42 = vld [vmem:[%s4681_s8 + $0x138] sm:$0xff]   ;;  %v3138_v43 = vld [vmem:[%s4681_s8 + $0x140] sm:$0xff]  }
 0x19b   : > { %3111 = vst [vmem:[%s4948_s17 + $0x208] sm:$0xff] %v3110_v36   ;;  %3115 = vst [vmem:[%s4948_s17 + $0x210] sm:$0xff] %v3114_v37   ;;  %v3142_v44 = vld [vmem:[%s4681_s8 + $0x148] sm:$0xff]   ;;  %v3146_v45 = vld [vmem:[%s4681_s8 + $0x150] sm:$0xff]  }
 0x19c   : > { %3119 = vst [vmem:[%s4948_s17 + $0x218] sm:$0xff] %v3118_v38   ;;  %3123 = vst [vmem:[%s4948_s17 + $0x220] sm:$0xff] %v3122_v39   ;;  %v3150_v46 = vld [vmem:[%s4681_s8 + $0x158] sm:$0xff]   ;;  %v3154_v47 = vld [vmem:[%s4681_s8 + $0x160] sm:$0xff]  }
 0x19d   : > { %3127 = vst [vmem:[%s4948_s17 + $0x228] sm:$0xff] %v3126_v40   ;;  %3131 = vst [vmem:[%s4948_s17 + $0x230] sm:$0xff] %v3130_v41   ;;  %v3158_v48 = vld [vmem:[%s4681_s8 + $0x168] sm:$0xff]   ;;  %v3162_v49 = vld [vmem:[%s4681_s8 + $0x170] sm:$0xff]  }
 0x19e   : > { %3135 = vst [vmem:[%s4948_s17 + $0x238] sm:$0xff] %v3134_v42   ;;  %3139 = vst [vmem:[%s4948_s17 + $0x240] sm:$0xff] %v3138_v43   ;;  %v3166_v50 = vld [vmem:[%s4681_s8 + $0x178] sm:$0xff]   ;;  %v3170_v51 = vld [vmem:[%s4681_s8 + $0x180] sm:$0xff]  }
 0x19f   : > { %3143 = vst [vmem:[%s4948_s17 + $0x248] sm:$0xff] %v3142_v44   ;;  %3147 = vst [vmem:[%s4948_s17 + $0x250] sm:$0xff] %v3146_v45   ;;  %v3174_v52 = vld [vmem:[%s4681_s8 + $0x188] sm:$0xff]   ;;  %v3178_v53 = vld [vmem:[%s4681_s8 + $0x190] sm:$0xff]  }
 0x1a0   : > { %3151 = vst [vmem:[%s4948_s17 + $0x258] sm:$0xff] %v3150_v46   ;;  %3155 = vst [vmem:[%s4948_s17 + $0x260] sm:$0xff] %v3154_v47   ;;  %v3182_v54 = vld [vmem:[%s4681_s8 + $0x198] sm:$0xff]   ;;  %v3186_v55 = vld [vmem:[%s4681_s8 + $0x1a0] sm:$0xff]  }
 0x1a1   : > { %3159 = vst [vmem:[%s4948_s17 + $0x268] sm:$0xff] %v3158_v48   ;;  %3163 = vst [vmem:[%s4948_s17 + $0x270] sm:$0xff] %v3162_v49   ;;  %v3190_v56 = vld [vmem:[%s4681_s8 + $0x1a8] sm:$0xff]   ;;  %v3194_v57 = vld [vmem:[%s4681_s8 + $0x1b0] sm:$0xff]  }
 0x1a2   : > { %3167 = vst [vmem:[%s4948_s17 + $0x278] sm:$0xff] %v3166_v50   ;;  %3171 = vst [vmem:[%s4948_s17 + $0x280] sm:$0xff] %v3170_v51   ;;  %v3198_v58 = vld [vmem:[%s4681_s8 + $0x1b8] sm:$0xff]   ;;  %v3202_v59 = vld [vmem:[%s4681_s8 + $0x1c0] sm:$0xff]  }
 0x1a3   : > { %3175 = vst [vmem:[%s4948_s17 + $0x288] sm:$0xff] %v3174_v52   ;;  %3179 = vst [vmem:[%s4948_s17 + $0x290] sm:$0xff] %v3178_v53   ;;  %v3206_v60 = vld [vmem:[%s4681_s8 + $0x1c8] sm:$0xff]   ;;  %v3210_v61 = vld [vmem:[%s4681_s8 + $0x1d0] sm:$0xff]  }
 0x1a4   : > { %3183 = vst [vmem:[%s4948_s17 + $0x298] sm:$0xff] %v3182_v54   ;;  %3187 = vst [vmem:[%s4948_s17 + $0x2a0] sm:$0xff] %v3186_v55   ;;  %v3214_v62 = vld [vmem:[%s4681_s8 + $0x1d8] sm:$0xff]   ;;  %v3218_v63 = vld [vmem:[%s4681_s8 + $0x1e0] sm:$0xff]  }
 0x1a5   : > { %3191 = vst [vmem:[%s4948_s17 + $0x2a8] sm:$0xff] %v3190_v56   ;;  %3195 = vst [vmem:[%s4948_s17 + $0x2b0] sm:$0xff] %v3194_v57   ;;  %v3222_v0 = vld [vmem:[%s4681_s8 + $0x1e8] sm:$0xff]   ;;  %v3226_v1 = vld [vmem:[%s4681_s8 + $0x1f0] sm:$0xff]  }
 0x1a6   : > { %3199 = vst [vmem:[%s4948_s17 + $0x2b8] sm:$0xff] %v3198_v58   ;;  %3203 = vst [vmem:[%s4948_s17 + $0x2c0] sm:$0xff] %v3202_v59   ;;  %v3230_v2 = vld [vmem:[%s4681_s8 + $0x1f8] sm:$0xff]  }
 0x1a7   : > { %3207 = vst [vmem:[%s4948_s17 + $0x2c8] sm:$0xff] %v3206_v60   ;;  %3211 = vst [vmem:[%s4948_s17 + $0x2d0] sm:$0xff] %v3210_v61  }
 0x1a8   : > { %3215 = vst [vmem:[%s4948_s17 + $0x2d8] sm:$0xff] %v3214_v62   ;;  %3219 = vst [vmem:[%s4948_s17 + $0x2e0] sm:$0xff] %v3218_v63  }
 0x1a9   : > { %3223 = vst [vmem:[%s4948_s17 + $0x2e8] sm:$0xff] %v3222_v0   ;;  %3227 = vst [vmem:[%s4948_s17 + $0x2f0] sm:$0xff] %v3226_v1  }
 0x1aa   : > { %3231 = vst [vmem:[%s4948_s17 + $0x2f8] sm:$0xff] %v3230_v2  }
 0x1ab PF: > { %s12_s13 = sadd.s32 1, %s4338_s13   ;;  %s5094_s9 = smov %s4326_s10 }
 0x1ac   : > { %p9_p11 = scmp.ge.s32.totalorder %s12_s13, 4   ;;  %s5095_s10 = smov %s4395_s19 }
 0x1ad   : > { %s5096_s11 = smov %s4334_s12  ;;  %s5097_s12 = smov %s5099_s14 }
 0x1ae   :  { %11 = sbr.rel (!%p9_p11) target bundleno = 3 (0x3), region = 145 }

// kernel: acgan_discriminator_forward.6
= control target key start
LH: loop header
LB: loop body
LE: loop exit
PB: predicated region body
PF: predicated region fallthrough
CT: control target
= control target key end

     0   :  { %v1683_v0 = vmov 0   ;;  %vm1261_vm2 = vcmask 257024   ;;  %s2227_s1 = inlined_call_operand.vmem [shape: bf16[256,32], index: 1, kind: input, shape index: {}]   ;;  %s2228_s0 = inlined_call_operand.vmem [shape: bf16[2,256,256], index: 0, kind: input, shape index: {}]   ;;  %s2229_s2 = inlined_call_operand.vmem [shape: bf16[2,256,32], index: 2, kind: output, shape index: {}]  }
   0x1   :  { %524 = vmatprep.subr.bf16.mxu0 %v1683_v0  ;;  %1538 = vmatprep.subr.bf16.mxu1 %v1683_v0  ;;  %v1571_v1 = vld [vmem:[%s2227_s1 + $0x38] sm:$0xff]   ;;  %v1572_v2 = vld [vmem:[%s2227_s1 + $0x30] sm:$0xff]   ;;  %v1573_v3 = vld [vmem:[%s2227_s1 + $0x28] sm:$0xff]  }
   0x2   :  { %525 = vmatpush1.bf16.msra.mxu0 %v1571_v1  ;;  %1554 = vmatpush1.bf16.msra.mxu1 %v1571_v1  ;;  %v1574_v4 = vld [vmem:[%s2227_s1 + $0x20] sm:$0xff]   ;;  %v1575_v5 = vld [vmem:[%s2227_s1 + $0x18] sm:$0xff]   ;;  %v1576_v7 = vld [vmem:[%s2227_s1 + $0x10] sm:$0xff]  }
   0x3   :  { %526 = vmatprep.subr.bf16.mxu0 %v1683_v0  ;;  %1539 = vmatprep.subr.bf16.mxu1 %v1683_v0  ;;  %v1589_v6 = vld [vmem:[%s2228_s0 + $0x4] ss:$8 sps:$4 sm:$0xff]   ;;  %v1579_v11 = vld [vmem:[%s2227_s1 + $0x78] sm:$0xff]   ;;  %v1580_v12 = vld [vmem:[%s2227_s1 + $0x70] sm:$0xff]  }
   0x4   :  { %v1592_v8 = vld [vmem:[%s2228_s0 + $0x104] ss:$8 sps:$4 sm:$0xff]   ;;  %556 = vmatprep.mubr.bf16.mxu0 %v1589_v6  ;;  %v1583_v15 = vld [vmem:[%s2227_s1 + $0x58] sm:$0xff]   ;;  %v1584_v16 = vld [vmem:[%s2227_s1 + $0x50] sm:$0xff]  }
   0x5   :  { %684 = vmatprep.mubr.bf16.mxu1 %v1592_v8  ;;  %v1577_v9 = vld [vmem:[%s2227_s1 + $0x8] sm:$0xff]   ;;  %v1578_v10 = vld [vmem:[%s2227_s1] sm:$0xff]   ;;  %v1593_v21 = vld [vmem:[%s2228_s0 + $0x14] ss:$8 sps:$4 sm:$0xff]  }
   0x6   :  { %527 = vmatpush1.bf16.msra.mxu0 %v1572_v2  ;;  %1555 = vmatpush1.bf16.msra.mxu1 %v1572_v2  ;;  %v1581_v13 = vld [vmem:[%s2227_s1 + $0x68] sm:$0xff]   ;;  %v1582_v14 = vld [vmem:[%s2227_s1 + $0x60] sm:$0xff]   ;;  %v1595_v22 = vld [vmem:[%s2228_s0 + $0x114] ss:$8 sps:$4 sm:$0xff]  }
   0x7   :  { %528 = vmatprep.subr.bf16.mxu0 %v1683_v0  ;;  %1540 = vmatprep.subr.bf16.mxu1 %v1683_v0  ;;  %v1585_v17 = vld [vmem:[%s2227_s1 + $0x48] sm:$0xff]   ;;  %v1586_v18 = vld [vmem:[%s2227_s1 + $0x40] sm:$0xff]   ;;  %v1597_v23 = vld [vmem:[%s2228_s0 + $0x10] ss:$8 sps:$4 sm:$0xff]  }
   0x8   :  { %v1587_v19 = vld [vmem:[%s2228_s0] ss:$8 sps:$4 sm:$0xff]   ;;  %v1598_v24 = vld [vmem:[%s2228_s0 + $0x110] ss:$8 sps:$4 sm:$0xff]   ;;  %v1599_v25 = vld [vmem:[%s2228_s0 + $0x24] ss:$8 sps:$4 sm:$0xff]  }
   0x9   :  { %v1590_v20 = vld [vmem:[%s2228_s0 + $0x100] ss:$8 sps:$4 sm:$0xff]   ;;  %v1601_v26 = vld [vmem:[%s2228_s0 + $0x124] ss:$8 sps:$4 sm:$0xff]   ;;  %v1605_v29 = vld [vmem:[%s2228_s0 + $0x34] ss:$8 sps:$4 sm:$0xff]  }
   0xa   :  { %529 = vmatpush1.bf16.msra.mxu0 %v1573_v3  ;;  %1556 = vmatpush1.bf16.msra.mxu1 %v1573_v3  ;;  %v1603_v27 = vld [vmem:[%s2228_s0 + $0x20] ss:$8 sps:$4 sm:$0xff]   ;;  %v1607_v30 = vld [vmem:[%s2228_s0 + $0x134] ss:$8 sps:$4 sm:$0xff]   ;;  %v1609_v31 = vld [vmem:[%s2228_s0 + $0x30] ss:$8 sps:$4 sm:$0xff]  }
   0xb   :  { %530 = vmatprep.subr.bf16.mxu0 %v1683_v0  ;;  %1541 = vmatprep.subr.bf16.mxu1 %v1683_v0  ;;  %v1604_v28 = vld [vmem:[%s2228_s0 + $0x120] ss:$8 sps:$4 sm:$0xff]   ;;  %v1610_v32 = vld [vmem:[%s2228_s0 + $0x130] ss:$8 sps:$4 sm:$0xff]   ;;  %v1611_v33 = vld [vmem:[%s2228_s0 + $0x44] ss:$8 sps:$4 sm:$0xff]  }
   0xc   :  { %v1613_v34 = vld [vmem:[%s2228_s0 + $0x144] ss:$8 sps:$4 sm:$0xff]   ;;  %v1615_v35 = vld [vmem:[%s2228_s0 + $0x40] ss:$8 sps:$4 sm:$0xff]   ;;  %v1617_v37 = vld [vmem:[%s2228_s0 + $0x54] ss:$8 sps:$4 sm:$0xff]  }
   0xd   :  { %v1616_v36 = vld [vmem:[%s2228_s0 + $0x140] ss:$8 sps:$4 sm:$0xff]   ;;  %v1619_v38 = vld [vmem:[%s2228_s0 + $0x154] ss:$8 sps:$4 sm:$0xff]   ;;  %v1621_v39 = vld [vmem:[%s2228_s0 + $0x50] ss:$8 sps:$4 sm:$0xff]  }
   0xe   :  { %531 = vmatpush1.bf16.msra.mxu0 %v1574_v4  ;;  %1557 = vmatpush1.bf16.msra.mxu1 %v1574_v4  ;;  %v1622_v40 = vld [vmem:[%s2228_s0 + $0x150] ss:$8 sps:$4 sm:$0xff]   ;;  %v1623_v41 = vld [vmem:[%s2228_s0 + $0x64] ss:$8 sps:$4 sm:$0xff]   ;;  %v1627_v43 = vld [vmem:[%s2228_s0 + $0x60] ss:$8 sps:$4 sm:$0xff]  }
   0xf   :  { %532 = vmatprep.subr.bf16.mxu0 %v1683_v0  ;;  %1542 = vmatprep.subr.bf16.mxu1 %v1683_v0  ;;  %v1625_v42 = vld [vmem:[%s2228_s0 + $0x164] ss:$8 sps:$4 sm:$0xff]   ;;  %v1628_v44 = vld [vmem:[%s2228_s0 + $0x160] ss:$8 sps:$4 sm:$0xff]   ;;  %v1629_v45 = vld [vmem:[%s2228_s0 + $0x74] ss:$8 sps:$4 sm:$0xff]  }
  0x10   :  { %v1631_v46 = vld [vmem:[%s2228_s0 + $0x174] ss:$8 sps:$4 sm:$0xff]   ;;  %v1633_v47 = vld [vmem:[%s2228_s0 + $0x70] ss:$8 sps:$4 sm:$0xff]   ;;  %v1635_v49 = vld [vmem:[%s2228_s0 + $0x84] ss:$8 sps:$4 sm:$0xff]  }
  0x11   :  { %v1634_v48 = vld [vmem:[%s2228_s0 + $0x170] ss:$8 sps:$4 sm:$0xff]   ;;  %v1637_v50 = vld [vmem:[%s2228_s0 + $0x184] ss:$8 sps:$4 sm:$0xff]   ;;  %v1639_v51 = vld [vmem:[%s2228_s0 + $0x80] ss:$8 sps:$4 sm:$0xff]  }
  0x12   :  { %533 = vmatpush1.bf16.msra.mxu0 %v1575_v5  ;;  %1558 = vmatpush1.bf16.msra.mxu1 %v1575_v5  ;;  %v1640_v52 = vld [vmem:[%s2228_s0 + $0x180] ss:$8 sps:$4 sm:$0xff]   ;;  %v1641_v53 = vld [vmem:[%s2228_s0 + $0x94] ss:$8 sps:$4 sm:$0xff]   ;;  %v1645_v55 = vld [vmem:[%s2228_s0 + $0x90] ss:$8 sps:$4 sm:$0xff]  }
  0x13   :  { %534 = vmatprep.subr.bf16.mxu0 %v1683_v0  ;;  %1543 = vmatprep.subr.bf16.mxu1 %v1683_v0  ;;  %v1643_v54 = vld [vmem:[%s2228_s0 + $0x194] ss:$8 sps:$4 sm:$0xff]   ;;  %v1646_v56 = vld [vmem:[%s2228_s0 + $0x190] ss:$8 sps:$4 sm:$0xff]   ;;  %v1647_v57 = vld [vmem:[%s2228_s0 + $0xa4] ss:$8 sps:$4 sm:$0xff]  }
  0x14   :  { %v1649_v58 = vld [vmem:[%s2228_s0 + $0x1a4] ss:$8 sps:$4 sm:$0xff]   ;;  %v1651_v59 = vld [vmem:[%s2228_s0 + $0xa0] ss:$8 sps:$4 sm:$0xff]   ;;  %v1653_v61 = vld [vmem:[%s2228_s0 + $0xb4] ss:$8 sps:$4 sm:$0xff]  }
  0x15   :  { %v1652_v60 = vld [vmem:[%s2228_s0 + $0x1a0] ss:$8 sps:$4 sm:$0xff]   ;;  %v1655_v62 = vld [vmem:[%s2228_s0 + $0x1b4] ss:$8 sps:$4 sm:$0xff]   ;;  %v1657_v63 = vld [vmem:[%s2228_s0 + $0xb0] ss:$8 sps:$4 sm:$0xff]  }
  0x16   :  { %535 = vmatpush1.bf16.msra.mxu0 %v1576_v7  ;;  %1559 = vmatpush1.bf16.msra.mxu1 %v1576_v7  ;;  %v1659_v1 = vld [vmem:[%s2228_s0 + $0xc4] ss:$8 sps:$4 sm:$0xff]   ;;  %v1663_v3 = vld [vmem:[%s2228_s0 + $0xc0] ss:$8 sps:$4 sm:$0xff]   ;;  %v1665_v5 = vld [vmem:[%s2228_s0 + $0xd4] ss:$8 sps:$4 sm:$0xff]  }
  0x17   :  { %536 = vmatprep.subr.bf16.mxu0 %v1683_v0  ;;  %1544 = vmatprep.subr.bf16.mxu1 %v1683_v0  ;;  %v1661_v2 = vld [vmem:[%s2228_s0 + $0x1c4] ss:$8 sps:$4 sm:$0xff]   ;;  %v1664_v4 = vld [vmem:[%s2228_s0 + $0x1c0] ss:$8 sps:$4 sm:$0xff]   ;;  %v1667_v6 = vld [vmem:[%s2228_s0 + $0x1d4] ss:$8 sps:$4 sm:$0xff]  }
  0x18   :  { %v1669_v7 = vld [vmem:[%s2228_s0 + $0xd0] ss:$8 sps:$4 sm:$0xff]  }
  0x19   :  { %v1670_v8 = vld [vmem:[%s2228_s0 + $0x1d0] ss:$8 sps:$4 sm:$0xff]  }
  0x1a   :  { %537 = vmatpush1.bf16.msra.mxu0 %v1577_v9  ;;  %1560 = vmatpush1.bf16.msra.mxu1 %v1577_v9  ;;  %v1671_v9 = vld [vmem:[%s2228_s0 + $0xe4] ss:$8 sps:$4 sm:$0xff]  }
  0x1b   :  { %538 = vmatprep.subr.bf16.mxu0 %v1683_v0  ;;  %1545 = vmatprep.subr.bf16.mxu1 %v1683_v0 }
  0x1e   :  { %539 = vmatpush1.bf16.msra.mxu0 %v1578_v10  ;;  %1561 = vmatpush1.bf16.msra.mxu1 %v1578_v10  ;;  %v1673_v10 = vld [vmem:[%s2228_s0 + $0x1e4] ss:$8 sps:$4 sm:$0xff]  }
  0x1f   :  { %540 = vmatprep.subr.bf16.mxu0 %v1683_v0  ;;  %1546 = vmatprep.subr.bf16.mxu1 %v1683_v0 }
  0x22   :  { %541 = vmatpush2.bf16.msra.mxu0 %v1579_v11  ;;  %1562 = vmatpush2.bf16.msra.mxu1 %v1579_v11  ;;  %v1675_v11 = vld [vmem:[%s2228_s0 + $0xe0] ss:$8 sps:$4 sm:$0xff]  }
  0x23   :  { %542 = vmatprep.subr.bf16.mxu0 %v1683_v0  ;;  %1547 = vmatprep.subr.bf16.mxu1 %v1683_v0 }
  0x26   :  { %543 = vmatpush2.bf16.msra.mxu0 %v1580_v12  ;;  %1563 = vmatpush2.bf16.msra.mxu1 %v1580_v12  ;;  %v1676_v12 = vld [vmem:[%s2228_s0 + $0x1e0] ss:$8 sps:$4 sm:$0xff]  }
  0x27   :  { %544 = vmatprep.subr.bf16.mxu0 %v1683_v0  ;;  %1548 = vmatprep.subr.bf16.mxu1 %v1683_v0 }
  0x2a   :  { %545 = vmatpush2.bf16.msra.mxu0 %v1581_v13  ;;  %1564 = vmatpush2.bf16.msra.mxu1 %v1581_v13  ;;  %v1677_v13 = vld [vmem:[%s2228_s0 + $0xf4] ss:$8 sps:$4 sm:$0xff]  }
  0x2b   :  { %546 = vmatprep.subr.bf16.mxu0 %v1683_v0  ;;  %1549 = vmatprep.subr.bf16.mxu1 %v1683_v0 }
  0x2e   :  { %547 = vmatpush2.bf16.msra.mxu0 %v1582_v14  ;;  %1565 = vmatpush2.bf16.msra.mxu1 %v1582_v14  ;;  %v1679_v14 = vld [vmem:[%s2228_s0 + $0x1f4] ss:$8 sps:$4 sm:$0xff]  }
  0x2f   :  { %548 = vmatprep.subr.bf16.mxu0 %v1683_v0  ;;  %1550 = vmatprep.subr.bf16.mxu1 %v1683_v0 }
  0x32   :  { %549 = vmatpush2.bf16.msra.mxu0 %v1583_v15  ;;  %1566 = vmatpush2.bf16.msra.mxu1 %v1583_v15  ;;  %v1681_v15 = vld [vmem:[%s2228_s0 + $0xf0] ss:$8 sps:$4 sm:$0xff]  }
  0x33   :  { %550 = vmatprep.subr.bf16.mxu0 %v1683_v0  ;;  %1551 = vmatprep.subr.bf16.mxu1 %v1683_v0 }
  0x36   :  { %551 = vmatpush2.bf16.msra.mxu0 %v1584_v16  ;;  %1567 = vmatpush2.bf16.msra.mxu1 %v1584_v16  ;;  %v1682_v16 = vld [vmem:[%s2228_s0 + $0x1f0] ss:$8 sps:$4 sm:$0xff]  }
  0x37   :  { %552 = vmatprep.subr.bf16.mxu0 %v1683_v0  ;;  %1552 = vmatprep.subr.bf16.mxu1 %v1683_v0 }
  0x3a   :  { %553 = vmatpush2.bf16.msra.mxu0 %v1585_v17  ;;  %1568 = vmatpush2.bf16.msra.mxu1 %v1585_v17 }
  0x3b   :  { %554 = vmatprep.subr.bf16.mxu0 %v1683_v0  ;;  %1553 = vmatprep.subr.bf16.mxu1 %v1683_v0  ;;  %v1658_v0 = vld [vmem:[%s2228_s0 + $0x1b0] ss:$8 sps:$4 sm:$0xff]  }
  0x3e   :  { %555 = vmatpush2.bf16.msra.mxu0 %v1586_v18  ;;  %1569 = vmatpush2.bf16.msra.mxu1 %v1586_v18 }
  0x41   :  { %557 = vmatmul.mubr.bf16.vlgmr.msra.gmra.mxu0 %v1587_v19  ;;  %685 = vmatmul.mubr.bf16.vlgmr.msra.gmra.mxu1 %v1590_v20 }
  0x42   :  { %564 = vmatprep.mubr.bf16.mxu0 %v1593_v21  ;;  %692 = vmatprep.mubr.bf16.mxu1 %v1595_v22 }
  0x49   :  { %565 = vmatmul.mubr.bf16.gmra.mxu0 %v1597_v23  ;;  %693 = vmatmul.mubr.bf16.gmra.mxu1 %v1598_v24 }
  0x4a   :  { %572 = vmatprep.mubr.bf16.mxu0 %v1599_v25  ;;  %700 = vmatprep.mubr.bf16.mxu1 %v1601_v26 }
  0x51   :  { %573 = vmatmul.mubr.bf16.gmra.mxu0 %v1603_v27  ;;  %701 = vmatmul.mubr.bf16.gmra.mxu1 %v1604_v28 }
  0x52   :  { %580 = vmatprep.mubr.bf16.mxu0 %v1605_v29  ;;  %708 = vmatprep.mubr.bf16.mxu1 %v1607_v30 }
  0x59   :  { %581 = vmatmul.mubr.bf16.gmra.mxu0 %v1609_v31  ;;  %709 = vmatmul.mubr.bf16.gmra.mxu1 %v1610_v32 }
  0x5a   :  { %588 = vmatprep.mubr.bf16.mxu0 %v1611_v33  ;;  %716 = vmatprep.mubr.bf16.mxu1 %v1613_v34 }
  0x61   :  { %589 = vmatmul.mubr.bf16.gmra.mxu0 %v1615_v35  ;;  %717 = vmatmul.mubr.bf16.gmra.mxu1 %v1616_v36 }
  0x62   :  { %596 = vmatprep.mubr.bf16.mxu0 %v1617_v37  ;;  %724 = vmatprep.mubr.bf16.mxu1 %v1619_v38 }
  0x69   :  { %597 = vmatmul.mubr.bf16.gmra.mxu0 %v1621_v39  ;;  %725 = vmatmul.mubr.bf16.gmra.mxu1 %v1622_v40 }
  0x6a   :  { %604 = vmatprep.mubr.bf16.mxu0 %v1623_v41  ;;  %732 = vmatprep.mubr.bf16.mxu1 %v1625_v42 }
  0x71   :  { %605 = vmatmul.mubr.bf16.gmra.mxu0 %v1627_v43  ;;  %733 = vmatmul.mubr.bf16.gmra.mxu1 %v1628_v44 }
  0x72   :  { %612 = vmatprep.mubr.bf16.mxu0 %v1629_v45  ;;  %740 = vmatprep.mubr.bf16.mxu1 %v1631_v46 }
  0x79   :  { %613 = vmatmul.mubr.bf16.gmra.mxu0 %v1633_v47  ;;  %741 = vmatmul.mubr.bf16.gmra.mxu1 %v1634_v48 }
  0x7a   :  { %620 = vmatprep.mubr.bf16.mxu0 %v1635_v49  ;;  %748 = vmatprep.mubr.bf16.mxu1 %v1637_v50 }
  0x81   :  { %621 = vmatmul.mubr.bf16.gmra.mxu0 %v1639_v51  ;;  %749 = vmatmul.mubr.bf16.gmra.mxu1 %v1640_v52 }
  0x82   :  { %628 = vmatprep.mubr.bf16.mxu0 %v1641_v53  ;;  %756 = vmatprep.mubr.bf16.mxu1 %v1643_v54 }
  0x89   :  { %629 = vmatmul.mubr.bf16.gmra.mxu0 %v1645_v55  ;;  %757 = vmatmul.mubr.bf16.gmra.mxu1 %v1646_v56 }
  0x8a   :  { %636 = vmatprep.mubr.bf16.mxu0 %v1647_v57  ;;  %764 = vmatprep.mubr.bf16.mxu1 %v1649_v58 }
  0x91   :  { %637 = vmatmul.mubr.bf16.gmra.mxu0 %v1651_v59  ;;  %765 = vmatmul.mubr.bf16.gmra.mxu1 %v1652_v60 }
  0x92   :  { %644 = vmatprep.mubr.bf16.mxu0 %v1653_v61  ;;  %772 = vmatprep.mubr.bf16.mxu1 %v1655_v62 }
  0x99   :  { %645 = vmatmul.mubr.bf16.gmra.mxu0 %v1657_v63  ;;  %773 = vmatmul.mubr.bf16.gmra.mxu1 %v1658_v0 }
  0x9a   :  { %652 = vmatprep.mubr.bf16.mxu0 %v1659_v1  ;;  %780 = vmatprep.mubr.bf16.mxu1 %v1661_v2 }
  0xa1   :  { %653 = vmatmul.mubr.bf16.gmra.mxu0 %v1663_v3  ;;  %781 = vmatmul.mubr.bf16.gmra.mxu1 %v1664_v4 }
  0xa2   :  { %660 = vmatprep.mubr.bf16.mxu0 %v1665_v5  ;;  %788 = vmatprep.mubr.bf16.mxu1 %v1667_v6 }
  0xa9   :  { %661 = vmatmul.mubr.bf16.gmra.mxu0 %v1669_v7  ;;  %789 = vmatmul.mubr.bf16.gmra.mxu1 %v1670_v8 }
  0xaa   :  { %668 = vmatprep.mubr.bf16.mxu0 %v1671_v9  ;;  %796 = vmatprep.mubr.bf16.mxu1 %v1673_v10 }
  0xb1   :  { %669 = vmatmul.mubr.bf16.gmra.mxu0 %v1675_v11  ;;  %797 = vmatmul.mubr.bf16.gmra.mxu1 %v1676_v12 }
  0xb2   :  { %676 = vmatprep.mubr.bf16.mxu0 %v1677_v13  ;;  %804 = vmatprep.mubr.bf16.mxu1 %v1679_v14 }
  0xb9   :  { %677 = vmatmul.mubr.bf16.gmra.mxu0 %v1681_v15  ;;  %805 = vmatmul.mubr.bf16.gmra.mxu1 %v1682_v16 }
 0x101   :  { %v558_v17 = vpop.f32.mrf.mxu0  ;;  %v686_v18 = vpop.f32.mrf.mxu1 }
 0x102   :  { %vm813_vm0 = vcmp.gt.f32.partialorder %v558_v17, 0.0  ;;  %v877_v19 = vmul.f32 0.2, %v558_v17  ;;  %vm845_vm1 = vcmp.gt.f32.partialorder %v686_v18, 0.0  ;;  %v909_v20 = vmul.f32 0.2, %v686_v18 }
 0x103   :  { %v560_v21 = vpop.f32.mrf.mxu0  ;;  %v688_v22 = vpop.f32.mrf.mxu1 }
 0x104   :  { %v941_v23 = vsel %vm813_vm0, %v558_v17, %v877_v19  ;;  %v973_v24 = vsel %vm845_vm1, %v686_v18, %v909_v20 }
 0x105   :  { %v1474_v25 = vpack.c.bf16 %v941_v23, %v941_v23  ;;  %v1506_v26 = vpack.c.bf16 %v973_v24, %v973_v24  ;;  %v561_v27 = vpop.f32.mrf.mxu0  ;;  %v689_v28 = vpop.f32.mrf.mxu1 }
 0x106   :  { %vm814_vm3 = vcmp.gt.f32.partialorder %v561_v27, 0.0  ;;  %v878_v29 = vmul.f32 0.2, %v561_v27  ;;  %vm846_vm4 = vcmp.gt.f32.partialorder %v689_v28, 0.0  ;;  %v910_v30 = vmul.f32 0.2, %v689_v28 }
 0x107   :  { %1262 = vst.msk [vmem:[%s2229_s2] sm:$0xf] %vm1261_vm2, %v1474_v25  ;;  %1294 = vst.msk [vmem:[%s2229_s2 + $0x80] sm:$0xf] %vm1261_vm2, %v1506_v26  ;;  %v563_v31 = vpop.f32.mrf.mxu0  ;;  %v691_v32 = vpop.f32.mrf.mxu1 }
 0x108   :  { %v942_v33 = vsel %vm814_vm3, %v561_v27, %v878_v29  ;;  %v974_v34 = vsel %vm846_vm4, %v689_v28, %v910_v30 }
 0x109   :  { %v1475_v35 = vpack.c.bf16 %v942_v33, %v942_v33  ;;  %v1507_v36 = vpack.c.bf16 %v974_v34, %v974_v34  ;;  %v566_v37 = vpop.f32.mrf.mxu0  ;;  %v694_v38 = vpop.f32.mrf.mxu1 }
 0x10a   :  { %vm815_vm5 = vcmp.gt.f32.partialorder %v566_v37, 0.0  ;;  %v879_v39 = vmul.f32 0.2, %v566_v37  ;;  %vm847_vm6 = vcmp.gt.f32.partialorder %v694_v38, 0.0  ;;  %v911_v40 = vmul.f32 0.2, %v694_v38 }
 0x10b   :  { %1263 = vst.msk [vmem:[%s2229_s2 + $0x4] sm:$0xf] %vm1261_vm2, %v1475_v35  ;;  %1295 = vst.msk [vmem:[%s2229_s2 + $0x84] sm:$0xf] %vm1261_vm2, %v1507_v36  ;;  %v568_v41 = vpop.f32.mrf.mxu0  ;;  %v696_v42 = vpop.f32.mrf.mxu1 }
 0x10c   :  { %v943_v43 = vsel %vm815_vm5, %v566_v37, %v879_v39  ;;  %v975_v44 = vsel %vm847_vm6, %v694_v38, %v911_v40 }
 0x10d   :  { %v1476_v45 = vpack.c.bf16 %v943_v43, %v943_v43  ;;  %v1508_v46 = vpack.c.bf16 %v975_v44, %v975_v44  ;;  %v569_v47 = vpop.f32.mrf.mxu0  ;;  %v697_v48 = vpop.f32.mrf.mxu1 }
 0x10e   :  { %vm816_vm7 = vcmp.gt.f32.partialorder %v569_v47, 0.0  ;;  %v880_v49 = vmul.f32 0.2, %v569_v47  ;;  %vm848_vm8 = vcmp.gt.f32.partialorder %v697_v48, 0.0  ;;  %v912_v50 = vmul.f32 0.2, %v697_v48 }
 0x10f   :  { %1264 = vst.msk [vmem:[%s2229_s2 + $0x8] sm:$0xf] %vm1261_vm2, %v1476_v45  ;;  %1296 = vst.msk [vmem:[%s2229_s2 + $0x88] sm:$0xf] %vm1261_vm2, %v1508_v46  ;;  %v571_v51 = vpop.f32.mrf.mxu0  ;;  %v699_v52 = vpop.f32.mrf.mxu1 }
 0x110   :  { %v944_v53 = vsel %vm816_vm7, %v569_v47, %v880_v49  ;;  %v976_v54 = vsel %vm848_vm8, %v697_v48, %v912_v50 }
 0x111   :  { %v1477_v55 = vpack.c.bf16 %v944_v53, %v944_v53  ;;  %v1509_v56 = vpack.c.bf16 %v976_v54, %v976_v54  ;;  %v574_v57 = vpop.f32.mrf.mxu0  ;;  %v702_v58 = vpop.f32.mrf.mxu1 }
 0x112   :  { %vm817_vm9 = vcmp.gt.f32.partialorder %v574_v57, 0.0  ;;  %v881_v59 = vmul.f32 0.2, %v574_v57  ;;  %vm849_vm10 = vcmp.gt.f32.partialorder %v702_v58, 0.0  ;;  %v913_v60 = vmul.f32 0.2, %v702_v58 }
 0x113   :  { %1265 = vst.msk [vmem:[%s2229_s2 + $0xc] sm:$0xf] %vm1261_vm2, %v1477_v55  ;;  %1297 = vst.msk [vmem:[%s2229_s2 + $0x8c] sm:$0xf] %vm1261_vm2, %v1509_v56  ;;  %v576_v61 = vpop.f32.mrf.mxu0  ;;  %v704_v62 = vpop.f32.mrf.mxu1 }
 0x114   :  { %v945_v63 = vsel %vm817_vm9, %v574_v57, %v881_v59  ;;  %v977_v0 = vsel %vm849_vm10, %v702_v58, %v913_v60 }
 0x115   :  { %v1478_v1 = vpack.c.bf16 %v945_v63, %v945_v63  ;;  %v1510_v2 = vpack.c.bf16 %v977_v0, %v977_v0  ;;  %v577_v3 = vpop.f32.mrf.mxu0  ;;  %v705_v4 = vpop.f32.mrf.mxu1 }
 0x116   :  { %vm818_vm11 = vcmp.gt.f32.partialorder %v577_v3, 0.0  ;;  %v882_v5 = vmul.f32 0.2, %v577_v3  ;;  %vm850_vm12 = vcmp.gt.f32.partialorder %v705_v4, 0.0  ;;  %v914_v6 = vmul.f32 0.2, %v705_v4 }
 0x117   :  { %1266 = vst.msk [vmem:[%s2229_s2 + $0x10] sm:$0xf] %vm1261_vm2, %v1478_v1  ;;  %1298 = vst.msk [vmem:[%s2229_s2 + $0x90] sm:$0xf] %vm1261_vm2, %v1510_v2  ;;  %v579_v7 = vpop.f32.mrf.mxu0  ;;  %v707_v8 = vpop.f32.mrf.mxu1 }
 0x118   :  { %v946_v9 = vsel %vm818_vm11, %v577_v3, %v882_v5  ;;  %v978_v10 = vsel %vm850_vm12, %v705_v4, %v914_v6 }
 0x119   :  { %v1479_v11 = vpack.c.bf16 %v946_v9, %v946_v9  ;;  %v1511_v12 = vpack.c.bf16 %v978_v10, %v978_v10  ;;  %v582_v13 = vpop.f32.mrf.mxu0  ;;  %v710_v14 = vpop.f32.mrf.mxu1 }
 0x11a   :  { %vm819_vm13 = vcmp.gt.f32.partialorder %v582_v13, 0.0  ;;  %v883_v15 = vmul.f32 0.2, %v582_v13  ;;  %vm851_vm14 = vcmp.gt.f32.partialorder %v710_v14, 0.0  ;;  %v915_v16 = vmul.f32 0.2, %v710_v14 }
 0x11b   :  { %1267 = vst.msk [vmem:[%s2229_s2 + $0x14] sm:$0xf] %vm1261_vm2, %v1479_v11  ;;  %1299 = vst.msk [vmem:[%s2229_s2 + $0x94] sm:$0xf] %vm1261_vm2, %v1511_v12  ;;  %v584_v17 = vpop.f32.mrf.mxu0  ;;  %v712_v18 = vpop.f32.mrf.mxu1 }
 0x11c   :  { %v947_v19 = vsel %vm819_vm13, %v582_v13, %v883_v15  ;;  %v979_v20 = vsel %vm851_vm14, %v710_v14, %v915_v16 }
 0x11d   :  { %v1480_v21 = vpack.c.bf16 %v947_v19, %v947_v19  ;;  %v1512_v22 = vpack.c.bf16 %v979_v20, %v979_v20  ;;  %v585_v23 = vpop.f32.mrf.mxu0  ;;  %v713_v24 = vpop.f32.mrf.mxu1 }
 0x11e   :  { %vm820_vm15 = vcmp.gt.f32.partialorder %v585_v23, 0.0  ;;  %v884_v25 = vmul.f32 0.2, %v585_v23  ;;  %vm852_vm0 = vcmp.gt.f32.partialorder %v713_v24, 0.0  ;;  %v916_v26 = vmul.f32 0.2, %v713_v24 }
 0x11f   :  { %1268 = vst.msk [vmem:[%s2229_s2 + $0x18] sm:$0xf] %vm1261_vm2, %v1480_v21  ;;  %1300 = vst.msk [vmem:[%s2229_s2 + $0x98] sm:$0xf] %vm1261_vm2, %v1512_v22  ;;  %v587_v27 = vpop.f32.mrf.mxu0  ;;  %v715_v28 = vpop.f32.mrf.mxu1 }
 0x120   :  { %v948_v29 = vsel %vm820_vm15, %v585_v23, %v884_v25  ;;  %v980_v30 = vsel %vm852_vm0, %v713_v24, %v916_v26 }
 0x121   :  { %v1481_v31 = vpack.c.bf16 %v948_v29, %v948_v29  ;;  %v1513_v32 = vpack.c.bf16 %v980_v30, %v980_v30  ;;  %v590_v33 = vpop.f32.mrf.mxu0  ;;  %v718_v34 = vpop.f32.mrf.mxu1 }
 0x122   :  { %vm821_vm1 = vcmp.gt.f32.partialorder %v590_v33, 0.0  ;;  %v885_v35 = vmul.f32 0.2, %v590_v33  ;;  %vm853_vm3 = vcmp.gt.f32.partialorder %v718_v34, 0.0  ;;  %v917_v36 = vmul.f32 0.2, %v718_v34 }
 0x123   :  { %1269 = vst.msk [vmem:[%s2229_s2 + $0x1c] sm:$0xf] %vm1261_vm2, %v1481_v31  ;;  %1301 = vst.msk [vmem:[%s2229_s2 + $0x9c] sm:$0xf] %vm1261_vm2, %v1513_v32  ;;  %v592_v37 = vpop.f32.mrf.mxu0  ;;  %v720_v38 = vpop.f32.mrf.mxu1 }
 0x124   :  { %v949_v39 = vsel %vm821_vm1, %v590_v33, %v885_v35  ;;  %v981_v40 = vsel %vm853_vm3, %v718_v34, %v917_v36 }
 0x125   :  { %v1482_v41 = vpack.c.bf16 %v949_v39, %v949_v39  ;;  %v1514_v42 = vpack.c.bf16 %v981_v40, %v981_v40  ;;  %v593_v43 = vpop.f32.mrf.mxu0  ;;  %v721_v44 = vpop.f32.mrf.mxu1 }
 0x126   :  { %vm822_vm4 = vcmp.gt.f32.partialorder %v593_v43, 0.0  ;;  %v886_v45 = vmul.f32 0.2, %v593_v43  ;;  %vm854_vm5 = vcmp.gt.f32.partialorder %v721_v44, 0.0  ;;  %v918_v46 = vmul.f32 0.2, %v721_v44 }
 0x127   :  { %1270 = vst.msk [vmem:[%s2229_s2 + $0x20] sm:$0xf] %vm1261_vm2, %v1482_v41  ;;  %1302 = vst.msk [vmem:[%s2229_s2 + $0xa0] sm:$0xf] %vm1261_vm2, %v1514_v42  ;;  %v595_v47 = vpop.f32.mrf.mxu0  ;;  %v723_v48 = vpop.f32.mrf.mxu1 }
 0x128   :  { %v950_v49 = vsel %vm822_vm4, %v593_v43, %v886_v45  ;;  %v982_v50 = vsel %vm854_vm5, %v721_v44, %v918_v46 }
 0x129   :  { %v1483_v51 = vpack.c.bf16 %v950_v49, %v950_v49  ;;  %v1515_v52 = vpack.c.bf16 %v982_v50, %v982_v50  ;;  %v598_v53 = vpop.f32.mrf.mxu0  ;;  %v726_v54 = vpop.f32.mrf.mxu1 }
 0x12a   :  { %vm823_vm6 = vcmp.gt.f32.partialorder %v598_v53, 0.0  ;;  %v887_v55 = vmul.f32 0.2, %v598_v53  ;;  %vm855_vm7 = vcmp.gt.f32.partialorder %v726_v54, 0.0  ;;  %v919_v56 = vmul.f32 0.2, %v726_v54 }
 0x12b   :  { %1271 = vst.msk [vmem:[%s2229_s2 + $0x24] sm:$0xf] %vm1261_vm2, %v1483_v51  ;;  %1303 = vst.msk [vmem:[%s2229_s2 + $0xa4] sm:$0xf] %vm1261_vm2, %v1515_v52  ;;  %v600_v57 = vpop.f32.mrf.mxu0  ;;  %v728_v58 = vpop.f32.mrf.mxu1 }
 0x12c   :  { %v951_v59 = vsel %vm823_vm6, %v598_v53, %v887_v55  ;;  %v983_v60 = vsel %vm855_vm7, %v726_v54, %v919_v56 }
 0x12d   :  { %v1484_v61 = vpack.c.bf16 %v951_v59, %v951_v59  ;;  %v1516_v62 = vpack.c.bf16 %v983_v60, %v983_v60  ;;  %v601_v63 = vpop.f32.mrf.mxu0  ;;  %v729_v0 = vpop.f32.mrf.mxu1 }
 0x12e   :  { %vm824_vm8 = vcmp.gt.f32.partialorder %v601_v63, 0.0  ;;  %v888_v1 = vmul.f32 0.2, %v601_v63  ;;  %vm856_vm9 = vcmp.gt.f32.partialorder %v729_v0, 0.0  ;;  %v920_v2 = vmul.f32 0.2, %v729_v0 }
 0x12f   :  { %1272 = vst.msk [vmem:[%s2229_s2 + $0x28] sm:$0xf] %vm1261_vm2, %v1484_v61  ;;  %1304 = vst.msk [vmem:[%s2229_s2 + $0xa8] sm:$0xf] %vm1261_vm2, %v1516_v62  ;;  %v603_v3 = vpop.f32.mrf.mxu0  ;;  %v731_v4 = vpop.f32.mrf.mxu1 }
 0x130   :  { %v952_v5 = vsel %vm824_vm8, %v601_v63, %v888_v1  ;;  %v984_v6 = vsel %vm856_vm9, %v729_v0, %v920_v2 }
 0x131   :  { %v1485_v7 = vpack.c.bf16 %v952_v5, %v952_v5  ;;  %v1517_v8 = vpack.c.bf16 %v984_v6, %v984_v6  ;;  %v606_v9 = vpop.f32.mrf.mxu0  ;;  %v734_v10 = vpop.f32.mrf.mxu1 }
 0x132   :  { %vm825_vm10 = vcmp.gt.f32.partialorder %v606_v9, 0.0  ;;  %v889_v11 = vmul.f32 0.2, %v606_v9  ;;  %vm857_vm11 = vcmp.gt.f32.partialorder %v734_v10, 0.0  ;;  %v921_v12 = vmul.f32 0.2, %v734_v10 }
 0x133   :  { %1273 = vst.msk [vmem:[%s2229_s2 + $0x2c] sm:$0xf] %vm1261_vm2, %v1485_v7  ;;  %1305 = vst.msk [vmem:[%s2229_s2 + $0xac] sm:$0xf] %vm1261_vm2, %v1517_v8  ;;  %v608_v13 = vpop.f32.mrf.mxu0  ;;  %v736_v14 = vpop.f32.mrf.mxu1 }
 0x134   :  { %v953_v15 = vsel %vm825_vm10, %v606_v9, %v889_v11  ;;  %v985_v16 = vsel %vm857_vm11, %v734_v10, %v921_v12 }
 0x135   :  { %v1486_v17 = vpack.c.bf16 %v953_v15, %v953_v15  ;;  %v1518_v18 = vpack.c.bf16 %v985_v16, %v985_v16  ;;  %v609_v19 = vpop.f32.mrf.mxu0  ;;  %v737_v20 = vpop.f32.mrf.mxu1 }
 0x136   :  { %vm826_vm12 = vcmp.gt.f32.partialorder %v609_v19, 0.0  ;;  %v890_v21 = vmul.f32 0.2, %v609_v19  ;;  %vm858_vm13 = vcmp.gt.f32.partialorder %v737_v20, 0.0  ;;  %v922_v22 = vmul.f32 0.2, %v737_v20 }
 0x137   :  { %1274 = vst.msk [vmem:[%s2229_s2 + $0x30] sm:$0xf] %vm1261_vm2, %v1486_v17  ;;  %1306 = vst.msk [vmem:[%s2229_s2 + $0xb0] sm:$0xf] %vm1261_vm2, %v1518_v18  ;;  %v611_v23 = vpop.f32.mrf.mxu0  ;;  %v739_v24 = vpop.f32.mrf.mxu1 }
 0x138   :  { %v954_v25 = vsel %vm826_vm12, %v609_v19, %v890_v21  ;;  %v986_v26 = vsel %vm858_vm13, %v737_v20, %v922_v22 }
 0x139   :  { %v1487_v27 = vpack.c.bf16 %v954_v25, %v954_v25  ;;  %v1519_v28 = vpack.c.bf16 %v986_v26, %v986_v26  ;;  %v614_v29 = vpop.f32.mrf.mxu0  ;;  %v742_v30 = vpop.f32.mrf.mxu1 }
 0x13a   :  { %vm827_vm14 = vcmp.gt.f32.partialorder %v614_v29, 0.0  ;;  %v891_v31 = vmul.f32 0.2, %v614_v29  ;;  %vm859_vm15 = vcmp.gt.f32.partialorder %v742_v30, 0.0  ;;  %v923_v32 = vmul.f32 0.2, %v742_v30 }
 0x13b   :  { %1275 = vst.msk [vmem:[%s2229_s2 + $0x34] sm:$0xf] %vm1261_vm2, %v1487_v27  ;;  %1307 = vst.msk [vmem:[%s2229_s2 + $0xb4] sm:$0xf] %vm1261_vm2, %v1519_v28  ;;  %v616_v33 = vpop.f32.mrf.mxu0  ;;  %v744_v34 = vpop.f32.mrf.mxu1 }
 0x13c   :  { %v955_v35 = vsel %vm827_vm14, %v614_v29, %v891_v31  ;;  %v987_v36 = vsel %vm859_vm15, %v742_v30, %v923_v32 }
 0x13d   :  { %v1488_v37 = vpack.c.bf16 %v955_v35, %v955_v35  ;;  %v1520_v38 = vpack.c.bf16 %v987_v36, %v987_v36  ;;  %v617_v39 = vpop.f32.mrf.mxu0  ;;  %v745_v40 = vpop.f32.mrf.mxu1 }
 0x13e   :  { %vm828_vm0 = vcmp.gt.f32.partialorder %v617_v39, 0.0  ;;  %v892_v41 = vmul.f32 0.2, %v617_v39  ;;  %vm860_vm1 = vcmp.gt.f32.partialorder %v745_v40, 0.0  ;;  %v924_v42 = vmul.f32 0.2, %v745_v40 }
 0x13f   :  { %1276 = vst.msk [vmem:[%s2229_s2 + $0x38] sm:$0xf] %vm1261_vm2, %v1488_v37  ;;  %1308 = vst.msk [vmem:[%s2229_s2 + $0xb8] sm:$0xf] %vm1261_vm2, %v1520_v38  ;;  %v619_v43 = vpop.f32.mrf.mxu0  ;;  %v747_v44 = vpop.f32.mrf.mxu1 }
 0x140   :  { %v956_v45 = vsel %vm828_vm0, %v617_v39, %v892_v41  ;;  %v988_v46 = vsel %vm860_vm1, %v745_v40, %v924_v42 }
 0x141   :  { %v1489_v47 = vpack.c.bf16 %v956_v45, %v956_v45  ;;  %v1521_v48 = vpack.c.bf16 %v988_v46, %v988_v46  ;;  %v622_v49 = vpop.f32.mrf.mxu0  ;;  %v750_v50 = vpop.f32.mrf.mxu1 }
 0x142   :  { %vm829_vm3 = vcmp.gt.f32.partialorder %v622_v49, 0.0  ;;  %v893_v51 = vmul.f32 0.2, %v622_v49  ;;  %vm861_vm4 = vcmp.gt.f32.partialorder %v750_v50, 0.0  ;;  %v925_v52 = vmul.f32 0.2, %v750_v50 }
 0x143   :  { %1277 = vst.msk [vmem:[%s2229_s2 + $0x3c] sm:$0xf] %vm1261_vm2, %v1489_v47  ;;  %1309 = vst.msk [vmem:[%s2229_s2 + $0xbc] sm:$0xf] %vm1261_vm2, %v1521_v48  ;;  %v624_v53 = vpop.f32.mrf.mxu0  ;;  %v752_v54 = vpop.f32.mrf.mxu1 }
 0x144   :  { %v957_v55 = vsel %vm829_vm3, %v622_v49, %v893_v51  ;;  %v989_v56 = vsel %vm861_vm4, %v750_v50, %v925_v52 }
 0x145   :  { %v1490_v57 = vpack.c.bf16 %v957_v55, %v957_v55  ;;  %v1522_v58 = vpack.c.bf16 %v989_v56, %v989_v56  ;;  %v625_v59 = vpop.f32.mrf.mxu0  ;;  %v753_v60 = vpop.f32.mrf.mxu1 }
 0x146   :  { %vm830_vm5 = vcmp.gt.f32.partialorder %v625_v59, 0.0  ;;  %v894_v61 = vmul.f32 0.2, %v625_v59  ;;  %vm862_vm6 = vcmp.gt.f32.partialorder %v753_v60, 0.0  ;;  %v926_v62 = vmul.f32 0.2, %v753_v60 }
 0x147   :  { %1278 = vst.msk [vmem:[%s2229_s2 + $0x40] sm:$0xf] %vm1261_vm2, %v1490_v57  ;;  %1310 = vst.msk [vmem:[%s2229_s2 + $0xc0] sm:$0xf] %vm1261_vm2, %v1522_v58  ;;  %v627_v63 = vpop.f32.mrf.mxu0  ;;  %v755_v0 = vpop.f32.mrf.mxu1 }
 0x148   :  { %v958_v1 = vsel %vm830_vm5, %v625_v59, %v894_v61  ;;  %v990_v2 = vsel %vm862_vm6, %v753_v60, %v926_v62 }
 0x149   :  { %v1491_v3 = vpack.c.bf16 %v958_v1, %v958_v1  ;;  %v1523_v4 = vpack.c.bf16 %v990_v2, %v990_v2  ;;  %v630_v5 = vpop.f32.mrf.mxu0  ;;  %v758_v6 = vpop.f32.mrf.mxu1 }
 0x14a   :  { %vm831_vm7 = vcmp.gt.f32.partialorder %v630_v5, 0.0  ;;  %v895_v7 = vmul.f32 0.2, %v630_v5  ;;  %vm863_vm8 = vcmp.gt.f32.partialorder %v758_v6, 0.0  ;;  %v927_v8 = vmul.f32 0.2, %v758_v6 }
 0x14b   :  { %1279 = vst.msk [vmem:[%s2229_s2 + $0x44] sm:$0xf] %vm1261_vm2, %v1491_v3  ;;  %1311 = vst.msk [vmem:[%s2229_s2 + $0xc4] sm:$0xf] %vm1261_vm2, %v1523_v4  ;;  %v632_v9 = vpop.f32.mrf.mxu0  ;;  %v760_v10 = vpop.f32.mrf.mxu1 }
 0x14c   :  { %v959_v11 = vsel %vm831_vm7, %v630_v5, %v895_v7  ;;  %v991_v12 = vsel %vm863_vm8, %v758_v6, %v927_v8 }
 0x14d   :  { %v1492_v13 = vpack.c.bf16 %v959_v11, %v959_v11  ;;  %v1524_v14 = vpack.c.bf16 %v991_v12, %v991_v12  ;;  %v633_v15 = vpop.f32.mrf.mxu0  ;;  %v761_v16 = vpop.f32.mrf.mxu1 }
 0x14e   :  { %vm832_vm9 = vcmp.gt.f32.partialorder %v633_v15, 0.0  ;;  %v896_v17 = vmul.f32 0.2, %v633_v15  ;;  %vm864_vm10 = vcmp.gt.f32.partialorder %v761_v16, 0.0  ;;  %v928_v18 = vmul.f32 0.2, %v761_v16 }
 0x14f   :  { %1280 = vst.msk [vmem:[%s2229_s2 + $0x48] sm:$0xf] %vm1261_vm2, %v1492_v13  ;;  %1312 = vst.msk [vmem:[%s2229_s2 + $0xc8] sm:$0xf] %vm1261_vm2, %v1524_v14  ;;  %v635_v19 = vpop.f32.mrf.mxu0  ;;  %v763_v20 = vpop.f32.mrf.mxu1 }
 0x150   :  { %v960_v21 = vsel %vm832_vm9, %v633_v15, %v896_v17  ;;  %v992_v22 = vsel %vm864_vm10, %v761_v16, %v928_v18 }
 0x151   :  { %v1493_v23 = vpack.c.bf16 %v960_v21, %v960_v21  ;;  %v1525_v24 = vpack.c.bf16 %v992_v22, %v992_v22  ;;  %v638_v25 = vpop.f32.mrf.mxu0  ;;  %v766_v26 = vpop.f32.mrf.mxu1 }
 0x152   :  { %vm833_vm11 = vcmp.gt.f32.partialorder %v638_v25, 0.0  ;;  %v897_v27 = vmul.f32 0.2, %v638_v25  ;;  %vm865_vm12 = vcmp.gt.f32.partialorder %v766_v26, 0.0  ;;  %v929_v28 = vmul.f32 0.2, %v766_v26 }
 0x153   :  { %1281 = vst.msk [vmem:[%s2229_s2 + $0x4c] sm:$0xf] %vm1261_vm2, %v1493_v23  ;;  %1313 = vst.msk [vmem:[%s2229_s2 + $0xcc] sm:$0xf] %vm1261_vm2, %v1525_v24  ;;  %v640_v29 = vpop.f32.mrf.mxu0  ;;  %v768_v30 = vpop.f32.mrf.mxu1 }
 0x154   :  { %v961_v31 = vsel %vm833_vm11, %v638_v25, %v897_v27  ;;  %v993_v32 = vsel %vm865_vm12, %v766_v26, %v929_v28 }
 0x155   :  { %v1494_v33 = vpack.c.bf16 %v961_v31, %v961_v31  ;;  %v1526_v34 = vpack.c.bf16 %v993_v32, %v993_v32  ;;  %v641_v35 = vpop.f32.mrf.mxu0  ;;  %v769_v36 = vpop.f32.mrf.mxu1 }
 0x156   :  { %vm834_vm13 = vcmp.gt.f32.partialorder %v641_v35, 0.0  ;;  %v898_v37 = vmul.f32 0.2, %v641_v35  ;;  %vm866_vm14 = vcmp.gt.f32.partialorder %v769_v36, 0.0  ;;  %v930_v38 = vmul.f32 0.2, %v769_v36 }
 0x157   :  { %1282 = vst.msk [vmem:[%s2229_s2 + $0x50] sm:$0xf] %vm1261_vm2, %v1494_v33  ;;  %1314 = vst.msk [vmem:[%s2229_s2 + $0xd0] sm:$0xf] %vm1261_vm2, %v1526_v34  ;;  %v643_v39 = vpop.f32.mrf.mxu0  ;;  %v771_v40 = vpop.f32.mrf.mxu1 }
 0x158   :  { %v962_v41 = vsel %vm834_vm13, %v641_v35, %v898_v37  ;;  %v994_v42 = vsel %vm866_vm14, %v769_v36, %v930_v38 }
 0x159   :  { %v1495_v43 = vpack.c.bf16 %v962_v41, %v962_v41  ;;  %v1527_v44 = vpack.c.bf16 %v994_v42, %v994_v42  ;;  %v646_v45 = vpop.f32.mrf.mxu0  ;;  %v774_v46 = vpop.f32.mrf.mxu1 }
 0x15a   :  { %vm835_vm15 = vcmp.gt.f32.partialorder %v646_v45, 0.0  ;;  %v899_v47 = vmul.f32 0.2, %v646_v45  ;;  %vm867_vm0 = vcmp.gt.f32.partialorder %v774_v46, 0.0  ;;  %v931_v48 = vmul.f32 0.2, %v774_v46 }
 0x15b   :  { %1283 = vst.msk [vmem:[%s2229_s2 + $0x54] sm:$0xf] %vm1261_vm2, %v1495_v43  ;;  %1315 = vst.msk [vmem:[%s2229_s2 + $0xd4] sm:$0xf] %vm1261_vm2, %v1527_v44  ;;  %v648_v49 = vpop.f32.mrf.mxu0  ;;  %v776_v50 = vpop.f32.mrf.mxu1 }
 0x15c   :  { %v963_v51 = vsel %vm835_vm15, %v646_v45, %v899_v47  ;;  %v995_v52 = vsel %vm867_vm0, %v774_v46, %v931_v48 }
 0x15d   :  { %v1496_v53 = vpack.c.bf16 %v963_v51, %v963_v51  ;;  %v1528_v54 = vpack.c.bf16 %v995_v52, %v995_v52  ;;  %v649_v55 = vpop.f32.mrf.mxu0  ;;  %v777_v56 = vpop.f32.mrf.mxu1 }
 0x15e   :  { %vm836_vm1 = vcmp.gt.f32.partialorder %v649_v55, 0.0  ;;  %v900_v57 = vmul.f32 0.2, %v649_v55  ;;  %vm868_vm3 = vcmp.gt.f32.partialorder %v777_v56, 0.0  ;;  %v932_v58 = vmul.f32 0.2, %v777_v56 }
 0x15f   :  { %1284 = vst.msk [vmem:[%s2229_s2 + $0x58] sm:$0xf] %vm1261_vm2, %v1496_v53  ;;  %1316 = vst.msk [vmem:[%s2229_s2 + $0xd8] sm:$0xf] %vm1261_vm2, %v1528_v54  ;;  %v651_v59 = vpop.f32.mrf.mxu0  ;;  %v779_v60 = vpop.f32.mrf.mxu1 }
 0x160   :  { %v964_v61 = vsel %vm836_vm1, %v649_v55, %v900_v57  ;;  %v996_v62 = vsel %vm868_vm3, %v777_v56, %v932_v58 }
 0x161   :  { %v1497_v63 = vpack.c.bf16 %v964_v61, %v964_v61  ;;  %v1529_v0 = vpack.c.bf16 %v996_v62, %v996_v62  ;;  %v654_v1 = vpop.f32.mrf.mxu0  ;;  %v782_v2 = vpop.f32.mrf.mxu1 }
 0x162   :  { %vm837_vm4 = vcmp.gt.f32.partialorder %v654_v1, 0.0  ;;  %v901_v3 = vmul.f32 0.2, %v654_v1  ;;  %vm869_vm5 = vcmp.gt.f32.partialorder %v782_v2, 0.0  ;;  %v933_v4 = vmul.f32 0.2, %v782_v2 }
 0x163   :  { %1285 = vst.msk [vmem:[%s2229_s2 + $0x5c] sm:$0xf] %vm1261_vm2, %v1497_v63  ;;  %1317 = vst.msk [vmem:[%s2229_s2 + $0xdc] sm:$0xf] %vm1261_vm2, %v1529_v0  ;;  %v656_v5 = vpop.f32.mrf.mxu0  ;;  %v784_v6 = vpop.f32.mrf.mxu1 }
 0x164   :  { %v965_v7 = vsel %vm837_vm4, %v654_v1, %v901_v3  ;;  %v997_v8 = vsel %vm869_vm5, %v782_v2, %v933_v4 }
 0x165   :  { %v1498_v9 = vpack.c.bf16 %v965_v7, %v965_v7  ;;  %v1530_v10 = vpack.c.bf16 %v997_v8, %v997_v8  ;;  %v657_v11 = vpop.f32.mrf.mxu0  ;;  %v785_v12 = vpop.f32.mrf.mxu1 }
 0x166   :  { %vm838_vm6 = vcmp.gt.f32.partialorder %v657_v11, 0.0  ;;  %v902_v13 = vmul.f32 0.2, %v657_v11  ;;  %vm870_vm7 = vcmp.gt.f32.partialorder %v785_v12, 0.0  ;;  %v934_v14 = vmul.f32 0.2, %v785_v12 }
 0x167   :  { %1286 = vst.msk [vmem:[%s2229_s2 + $0x60] sm:$0xf] %vm1261_vm2, %v1498_v9  ;;  %1318 = vst.msk [vmem:[%s2229_s2 + $0xe0] sm:$0xf] %vm1261_vm2, %v1530_v10  ;;  %v659_v15 = vpop.f32.mrf.mxu0  ;;  %v787_v16 = vpop.f32.mrf.mxu1 }
 0x168   :  { %v966_v17 = vsel %vm838_vm6, %v657_v11, %v902_v13  ;;  %v998_v18 = vsel %vm870_vm7, %v785_v12, %v934_v14 }
 0x169   :  { %v1499_v19 = vpack.c.bf16 %v966_v17, %v966_v17  ;;  %v1531_v20 = vpack.c.bf16 %v998_v18, %v998_v18  ;;  %v662_v21 = vpop.f32.mrf.mxu0  ;;  %v790_v22 = vpop.f32.mrf.mxu1 }
 0x16a   :  { %vm839_vm8 = vcmp.gt.f32.partialorder %v662_v21, 0.0  ;;  %v903_v23 = vmul.f32 0.2, %v662_v21  ;;  %vm871_vm9 = vcmp.gt.f32.partialorder %v790_v22, 0.0  ;;  %v935_v24 = vmul.f32 0.2, %v790_v22 }
 0x16b   :  { %1287 = vst.msk [vmem:[%s2229_s2 + $0x64] sm:$0xf] %vm1261_vm2, %v1499_v19  ;;  %1319 = vst.msk [vmem:[%s2229_s2 + $0xe4] sm:$0xf] %vm1261_vm2, %v1531_v20  ;;  %v664_v25 = vpop.f32.mrf.mxu0  ;;  %v792_v26 = vpop.f32.mrf.mxu1 }
 0x16c   :  { %v967_v27 = vsel %vm839_vm8, %v662_v21, %v903_v23  ;;  %v999_v28 = vsel %vm871_vm9, %v790_v22, %v935_v24 }
 0x16d   :  { %v1500_v29 = vpack.c.bf16 %v967_v27, %v967_v27  ;;  %v1532_v30 = vpack.c.bf16 %v999_v28, %v999_v28  ;;  %v665_v31 = vpop.f32.mrf.mxu0  ;;  %v793_v32 = vpop.f32.mrf.mxu1 }
 0x16e   :  { %vm840_vm10 = vcmp.gt.f32.partialorder %v665_v31, 0.0  ;;  %v904_v33 = vmul.f32 0.2, %v665_v31  ;;  %vm872_vm11 = vcmp.gt.f32.partialorder %v793_v32, 0.0  ;;  %v936_v34 = vmul.f32 0.2, %v793_v32 }
 0x16f   :  { %1288 = vst.msk [vmem:[%s2229_s2 + $0x68] sm:$0xf] %vm1261_vm2, %v1500_v29  ;;  %1320 = vst.msk [vmem:[%s2229_s2 + $0xe8] sm:$0xf] %vm1261_vm2, %v1532_v30  ;;  %v667_v35 = vpop.f32.mrf.mxu0  ;;  %v795_v36 = vpop.f32.mrf.mxu1 }
 0x170   :  { %v968_v37 = vsel %vm840_vm10, %v665_v31, %v904_v33  ;;  %v1000_v38 = vsel %vm872_vm11, %v793_v32, %v936_v34 }
 0x171   :  { %v1501_v39 = vpack.c.bf16 %v968_v37, %v968_v37  ;;  %v1533_v40 = vpack.c.bf16 %v1000_v38, %v1000_v38  ;;  %v670_v41 = vpop.f32.mrf.mxu0  ;;  %v798_v42 = vpop.f32.mrf.mxu1 }
 0x172   :  { %vm841_vm12 = vcmp.gt.f32.partialorder %v670_v41, 0.0  ;;  %v905_v43 = vmul.f32 0.2, %v670_v41  ;;  %vm873_vm13 = vcmp.gt.f32.partialorder %v798_v42, 0.0  ;;  %v937_v44 = vmul.f32 0.2, %v798_v42 }
 0x173   :  { %1289 = vst.msk [vmem:[%s2229_s2 + $0x6c] sm:$0xf] %vm1261_vm2, %v1501_v39  ;;  %1321 = vst.msk [vmem:[%s2229_s2 + $0xec] sm:$0xf] %vm1261_vm2, %v1533_v40  ;;  %v672_v45 = vpop.f32.mrf.mxu0  ;;  %v800_v46 = vpop.f32.mrf.mxu1 }
 0x174   :  { %v969_v47 = vsel %vm841_vm12, %v670_v41, %v905_v43  ;;  %v1001_v48 = vsel %vm873_vm13, %v798_v42, %v937_v44 }
 0x175   :  { %v1502_v49 = vpack.c.bf16 %v969_v47, %v969_v47  ;;  %v1534_v50 = vpack.c.bf16 %v1001_v48, %v1001_v48  ;;  %v673_v51 = vpop.f32.mrf.mxu0  ;;  %v801_v52 = vpop.f32.mrf.mxu1 }
 0x176   :  { %vm842_vm14 = vcmp.gt.f32.partialorder %v673_v51, 0.0  ;;  %v906_v53 = vmul.f32 0.2, %v673_v51  ;;  %vm874_vm15 = vcmp.gt.f32.partialorder %v801_v52, 0.0  ;;  %v938_v54 = vmul.f32 0.2, %v801_v52 }
 0x177   :  { %1290 = vst.msk [vmem:[%s2229_s2 + $0x70] sm:$0xf] %vm1261_vm2, %v1502_v49  ;;  %1322 = vst.msk [vmem:[%s2229_s2 + $0xf0] sm:$0xf] %vm1261_vm2, %v1534_v50  ;;  %v675_v55 = vpop.f32.mrf.mxu0  ;;  %v803_v56 = vpop.f32.mrf.mxu1 }
 0x178   :  { %v970_v57 = vsel %vm842_vm14, %v673_v51, %v906_v53  ;;  %v1002_v58 = vsel %vm874_vm15, %v801_v52, %v938_v54 }
 0x179   :  { %v1503_v59 = vpack.c.bf16 %v970_v57, %v970_v57  ;;  %v1535_v60 = vpack.c.bf16 %v1002_v58, %v1002_v58  ;;  %v678_v61 = vpop.f32.mrf.mxu0  ;;  %v806_v62 = vpop.f32.mrf.mxu1 }
 0x17a   :  { %vm843_vm0 = vcmp.gt.f32.partialorder %v678_v61, 0.0  ;;  %v907_v63 = vmul.f32 0.2, %v678_v61  ;;  %vm875_vm1 = vcmp.gt.f32.partialorder %v806_v62, 0.0  ;;  %v939_v0 = vmul.f32 0.2, %v806_v62 }
 0x17b   :  { %1291 = vst.msk [vmem:[%s2229_s2 + $0x74] sm:$0xf] %vm1261_vm2, %v1503_v59  ;;  %1323 = vst.msk [vmem:[%s2229_s2 + $0xf4] sm:$0xf] %vm1261_vm2, %v1535_v60  ;;  %v680_v1 = vpop.f32.mrf.mxu0  ;;  %v808_v2 = vpop.f32.mrf.mxu1 }
 0x17c   :  { %v971_v3 = vsel %vm843_vm0, %v678_v61, %v907_v63  ;;  %v1003_v4 = vsel %vm875_vm1, %v806_v62, %v939_v0 }
 0x17d   :  { %v1504_v5 = vpack.c.bf16 %v971_v3, %v971_v3  ;;  %v1536_v6 = vpack.c.bf16 %v1003_v4, %v1003_v4  ;;  %v681_v7 = vpop.f32.mrf.mxu0  ;;  %v809_v8 = vpop.f32.mrf.mxu1 }
 0x17e   :  { %vm844_vm3 = vcmp.gt.f32.partialorder %v681_v7, 0.0  ;;  %v908_v9 = vmul.f32 0.2, %v681_v7  ;;  %vm876_vm4 = vcmp.gt.f32.partialorder %v809_v8, 0.0  ;;  %v940_v10 = vmul.f32 0.2, %v809_v8 }
 0x17f   :  { %1292 = vst.msk [vmem:[%s2229_s2 + $0x78] sm:$0xf] %vm1261_vm2, %v1504_v5  ;;  %1324 = vst.msk [vmem:[%s2229_s2 + $0xf8] sm:$0xf] %vm1261_vm2, %v1536_v6  ;;  %v683_v11 = vpop.f32.mrf.mxu0  ;;  %v811_v12 = vpop.f32.mrf.mxu1 }
 0x180   :  { %v972_v13 = vsel %vm844_vm3, %v681_v7, %v908_v9  ;;  %v1004_v14 = vsel %vm876_vm4, %v809_v8, %v940_v10 }
 0x181   :  { %v1505_v15 = vpack.c.bf16 %v972_v13, %v972_v13  ;;  %v1537_v16 = vpack.c.bf16 %v1004_v14, %v1004_v14 }
 0x183   :  { %1293 = vst.msk [vmem:[%s2229_s2 + $0x7c] sm:$0xf] %vm1261_vm2, %v1505_v15  ;;  %1325 = vst.msk [vmem:[%s2229_s2 + $0xfc] sm:$0xf] %vm1261_vm2, %v1537_v16 }

// kernel: acgan_discriminator_forward.7
= control target key start
LH: loop header
LB: loop body
LE: loop exit
PB: predicated region body
PF: predicated region fallthrough
CT: control target
= control target key end

     0   :  { %vm766_vm1 = vcmask 519168   ;;  %s1362_s1 = inlined_call_operand.vmem [shape: bf16[512,64], index: 1, kind: input, shape index: {}]   ;;  %s1363_s0 = inlined_call_operand.vmem [shape: bf16[2,64,512], index: 0, kind: input, shape index: {}]   ;;  %s1364_s2 = inlined_call_operand.vmem [shape: bf16[2,64,64], index: 2, kind: output, shape index: {}]  }
   0x1   :  { %v1011_v0 = vld [vmem:[%s1362_s1 + $0x78] sm:$0xff]   ;;  %v1015_v4 = vld [vmem:[%s1362_s1 + $0x70] sm:$0xff]   ;;  %v1019_v8 = vld [vmem:[%s1362_s1 + $0x68] sm:$0xff]  }
   0x2   :  { %v1012_v1 = vld [vmem:[%s1362_s1 + $0xf8] sm:$0xff]   ;;  %883 = vmatprep.subr.bf16.mxu0 %v1011_v0  ;;  %v1016_v5 = vld [vmem:[%s1362_s1 + $0xf0] sm:$0xff]   ;;  %v1020_v9 = vld [vmem:[%s1362_s1 + $0xe8] sm:$0xff]  }
   0x3   :  { %v1013_v2 = vld [vmem:[%s1362_s1 + $0x38] sm:$0xff]   ;;  %947 = vmatprep.subr.bf16.mxu1 %v1012_v1  ;;  %v1017_v6 = vld [vmem:[%s1362_s1 + $0x30] sm:$0xff]   ;;  %v1021_v10 = vld [vmem:[%s1362_s1 + $0x28] sm:$0xff]  }
   0x4   :  { %v1014_v3 = vld [vmem:[%s1362_s1 + $0xb8] sm:$0xff]   ;;  %884 = vmatpush3.bf16.msra.mxu0 %v1013_v2  ;;  %v1018_v7 = vld [vmem:[%s1362_s1 + $0xb0] sm:$0xff]   ;;  %v1022_v11 = vld [vmem:[%s1362_s1 + $0xa8] sm:$0xff]  }
   0x5   :  { %948 = vmatpush3.bf16.msra.mxu1 %v1014_v3  ;;  %885 = vmatprep.subr.bf16.mxu0 %v1015_v4  ;;  %v1023_v12 = vld [vmem:[%s1362_s1 + $0x60] sm:$0xff]   ;;  %v1027_v16 = vld [vmem:[%s1362_s1 + $0x58] sm:$0xff]   ;;  %v1031_v20 = vld [vmem:[%s1362_s1 + $0x50] sm:$0xff]  }
   0x6   :  { %949 = vmatprep.subr.bf16.mxu1 %v1016_v5  ;;  %v1024_v13 = vld [vmem:[%s1362_s1 + $0xe0] sm:$0xff]   ;;  %v1028_v17 = vld [vmem:[%s1362_s1 + $0xd8] sm:$0xff]   ;;  %v1032_v21 = vld [vmem:[%s1362_s1 + $0xd0] sm:$0xff]  }
   0x7   :  { %v1025_v14 = vld [vmem:[%s1362_s1 + $0x20] sm:$0xff]   ;;  %v1029_v18 = vld [vmem:[%s1362_s1 + $0x18] sm:$0xff]   ;;  %v1033_v22 = vld [vmem:[%s1362_s1 + $0x10] sm:$0xff]  }
   0x8   :  { %886 = vmatpush3.bf16.msra.mxu0 %v1017_v6  ;;  %v1026_v15 = vld [vmem:[%s1362_s1 + $0xa0] sm:$0xff]   ;;  %v1030_v19 = vld [vmem:[%s1362_s1 + $0x98] sm:$0xff]   ;;  %v1034_v23 = vld [vmem:[%s1362_s1 + $0x90] sm:$0xff]  }
   0x9   :  { %950 = vmatpush3.bf16.msra.mxu1 %v1018_v7  ;;  %887 = vmatprep.subr.bf16.mxu0 %v1019_v8  ;;  %v1035_v24 = vld [vmem:[%s1362_s1 + $0x48] sm:$0xff]   ;;  %v1039_v28 = vld [vmem:[%s1362_s1 + $0x40] sm:$0xff]  }
   0xa   :  { %951 = vmatprep.subr.bf16.mxu1 %v1020_v9  ;;  %v1036_v25 = vld [vmem:[%s1362_s1 + $0xc8] sm:$0xff]   ;;  %v1040_v29 = vld [vmem:[%s1362_s1 + $0xc0] sm:$0xff]  }
   0xb   :  { %v1037_v26 = vld [vmem:[%s1362_s1 + $0x8] sm:$0xff]   ;;  %v1041_v30 = vld [vmem:[%s1362_s1] sm:$0xff]  }
   0xc   :  { %888 = vmatpush3.bf16.msra.mxu0 %v1021_v10  ;;  %v1038_v27 = vld [vmem:[%s1362_s1 + $0x88] sm:$0xff]   ;;  %v1042_v31 = vld [vmem:[%s1362_s1 + $0x80] sm:$0xff]  }
   0xd   :  { %952 = vmatpush3.bf16.msra.mxu1 %v1022_v11  ;;  %889 = vmatprep.subr.bf16.mxu0 %v1023_v12  ;;  %v1043_v32 = vld [vmem:[%s1363_s0] ss:$16 sps:$4 sm:$0xff]   ;;  %v1045_v33 = vld [vmem:[%s1363_s0 + $0x4] ss:$16 sps:$4 sm:$0xff]   ;;  %v1046_v34 = vld [vmem:[%s1363_s0 + $0x8] ss:$16 sps:$4 sm:$0xff]  }
   0xe   :  { %953 = vmatprep.subr.bf16.mxu1 %v1024_v13  ;;  %v1048_v35 = vld [vmem:[%s1363_s0 + $0xc] ss:$16 sps:$4 sm:$0xff]   ;;  %492 = vmatprep.mubr.bf16.mxu0 %v1045_v33  ;;  %v1049_v36 = vld [vmem:[%s1363_s0 + $0x24] ss:$16 sps:$4 sm:$0xff]   ;;  %v1053_v38 = vld [vmem:[%s1363_s0 + $0x20] ss:$16 sps:$4 sm:$0xff]  }
   0xf   :  { %589 = vmatprep.mubr.bf16.mxu1 %v1048_v35  ;;  %v1051_v37 = vld [vmem:[%s1363_s0 + $0x2c] ss:$16 sps:$4 sm:$0xff]   ;;  %v1054_v39 = vld [vmem:[%s1363_s0 + $0x28] ss:$16 sps:$4 sm:$0xff]   ;;  %v1055_v40 = vld [vmem:[%s1363_s0 + $0x44] ss:$16 sps:$4 sm:$0xff]  }
  0x10   :  { %890 = vmatpush3.bf16.msra.mxu0 %v1025_v14  ;;  %v1057_v41 = vld [vmem:[%s1363_s0 + $0x4c] ss:$16 sps:$4 sm:$0xff]   ;;  %v1059_v42 = vld [vmem:[%s1363_s0 + $0x40] ss:$16 sps:$4 sm:$0xff]   ;;  %v1060_v43 = vld [vmem:[%s1363_s0 + $0x48] ss:$16 sps:$4 sm:$0xff]  }
  0x11   :  { %954 = vmatpush3.bf16.msra.mxu1 %v1026_v15  ;;  %891 = vmatprep.subr.bf16.mxu0 %v1027_v16  ;;  %v1061_v44 = vld [vmem:[%s1363_s0 + $0x64] ss:$16 sps:$4 sm:$0xff]   ;;  %v1063_v45 = vld [vmem:[%s1363_s0 + $0x6c] ss:$16 sps:$4 sm:$0xff]   ;;  %v1065_v46 = vld [vmem:[%s1363_s0 + $0x60] ss:$16 sps:$4 sm:$0xff]  }
  0x12   :  { %955 = vmatprep.subr.bf16.mxu1 %v1028_v17  ;;  %v1066_v47 = vld [vmem:[%s1363_s0 + $0x68] ss:$16 sps:$4 sm:$0xff]   ;;  %v1067_v48 = vld [vmem:[%s1363_s0 + $0x84] ss:$16 sps:$4 sm:$0xff]   ;;  %v1069_v49 = vld [vmem:[%s1363_s0 + $0x8c] ss:$16 sps:$4 sm:$0xff]  }
  0x13   :  { %v1071_v50 = vld [vmem:[%s1363_s0 + $0x80] ss:$16 sps:$4 sm:$0xff]   ;;  %v1072_v51 = vld [vmem:[%s1363_s0 + $0x88] ss:$16 sps:$4 sm:$0xff]   ;;  %v1073_v52 = vld [vmem:[%s1363_s0 + $0xa4] ss:$16 sps:$4 sm:$0xff]  }
  0x14   :  { %892 = vmatpush3.bf16.msra.mxu0 %v1029_v18  ;;  %v1075_v53 = vld [vmem:[%s1363_s0 + $0xac] ss:$16 sps:$4 sm:$0xff]   ;;  %v1077_v54 = vld [vmem:[%s1363_s0 + $0xa0] ss:$16 sps:$4 sm:$0xff]   ;;  %v1078_v55 = vld [vmem:[%s1363_s0 + $0xa8] ss:$16 sps:$4 sm:$0xff]  }
  0x15   :  { %956 = vmatpush3.bf16.msra.mxu1 %v1030_v19  ;;  %893 = vmatprep.subr.bf16.mxu0 %v1031_v20  ;;  %v1079_v56 = vld [vmem:[%s1363_s0 + $0xc4] ss:$16 sps:$4 sm:$0xff]   ;;  %v1081_v57 = vld [vmem:[%s1363_s0 + $0xcc] ss:$16 sps:$4 sm:$0xff]   ;;  %v1083_v58 = vld [vmem:[%s1363_s0 + $0xc0] ss:$16 sps:$4 sm:$0xff]  }
  0x16   :  { %957 = vmatprep.subr.bf16.mxu1 %v1032_v21  ;;  %v1084_v59 = vld [vmem:[%s1363_s0 + $0xc8] ss:$16 sps:$4 sm:$0xff]   ;;  %v1085_v60 = vld [vmem:[%s1363_s0 + $0xe4] ss:$16 sps:$4 sm:$0xff]   ;;  %v1087_v61 = vld [vmem:[%s1363_s0 + $0xec] ss:$16 sps:$4 sm:$0xff]  }
  0x17   :  { %v1089_v62 = vld [vmem:[%s1363_s0 + $0xe0] ss:$16 sps:$4 sm:$0xff]   ;;  %v1090_v63 = vld [vmem:[%s1363_s0 + $0xe8] ss:$16 sps:$4 sm:$0xff]  }
  0x18   :  { %894 = vmatpush3.bf16.msra.mxu0 %v1033_v22 }
  0x19   :  { %958 = vmatpush3.bf16.msra.mxu1 %v1034_v23  ;;  %895 = vmatprep.subr.bf16.mxu0 %v1035_v24 }
  0x1a   :  { %959 = vmatprep.subr.bf16.mxu1 %v1036_v25 }
  0x1c   :  { %896 = vmatpush3.bf16.msra.mxu0 %v1037_v26 }
  0x1d   :  { %960 = vmatpush3.bf16.msra.mxu1 %v1038_v27  ;;  %897 = vmatprep.subr.bf16.mxu0 %v1039_v28 }
  0x1e   :  { %961 = vmatprep.subr.bf16.mxu1 %v1040_v29 }
  0x20   :  { %898 = vmatpush3.bf16.msra.mxu0 %v1041_v30 }
  0x21   :  { %962 = vmatpush3.bf16.msra.mxu1 %v1042_v31 }
  0x23   :  { %493 = vmatmul.mubr.bf16.vlgmr.msra.gmra.mxu0 %v1043_v32 }
  0x24   :  { %590 = vmatmul.mubr.bf16.vlgmr.msra.gmra.mxu1 %v1046_v34  ;;  %500 = vmatprep.mubr.bf16.mxu0 %v1049_v36 }
  0x25   :  { %597 = vmatprep.mubr.bf16.mxu1 %v1051_v37 }
  0x2b   :  { %501 = vmatmul.mubr.bf16.gmra.mxu0 %v1053_v38 }
  0x2c   :  { %598 = vmatmul.mubr.bf16.gmra.mxu1 %v1054_v39  ;;  %508 = vmatprep.mubr.bf16.mxu0 %v1055_v40 }
  0x2d   :  { %605 = vmatprep.mubr.bf16.mxu1 %v1057_v41 }
  0x33   :  { %509 = vmatmul.mubr.bf16.gmra.mxu0 %v1059_v42 }
  0x34   :  { %606 = vmatmul.mubr.bf16.gmra.mxu1 %v1060_v43  ;;  %516 = vmatprep.mubr.bf16.mxu0 %v1061_v44 }
  0x35   :  { %613 = vmatprep.mubr.bf16.mxu1 %v1063_v45 }
  0x3b   :  { %517 = vmatmul.mubr.bf16.gmra.mxu0 %v1065_v46 }
  0x3c   :  { %614 = vmatmul.mubr.bf16.gmra.mxu1 %v1066_v47  ;;  %524 = vmatprep.mubr.bf16.mxu0 %v1067_v48 }
  0x3d   :  { %621 = vmatprep.mubr.bf16.mxu1 %v1069_v49 }
  0x43   :  { %525 = vmatmul.mubr.bf16.gmra.mxu0 %v1071_v50 }
  0x44   :  { %622 = vmatmul.mubr.bf16.gmra.mxu1 %v1072_v51  ;;  %532 = vmatprep.mubr.bf16.mxu0 %v1073_v52 }
  0x45   :  { %629 = vmatprep.mubr.bf16.mxu1 %v1075_v53 }
  0x4b   :  { %533 = vmatmul.mubr.bf16.gmra.mxu0 %v1077_v54 }
  0x4c   :  { %630 = vmatmul.mubr.bf16.gmra.mxu1 %v1078_v55  ;;  %540 = vmatprep.mubr.bf16.mxu0 %v1079_v56 }
  0x4d   :  { %637 = vmatprep.mubr.bf16.mxu1 %v1081_v57 }
  0x53   :  { %541 = vmatmul.mubr.bf16.gmra.mxu0 %v1083_v58 }
  0x54   :  { %638 = vmatmul.mubr.bf16.gmra.mxu1 %v1084_v59  ;;  %548 = vmatprep.mubr.bf16.mxu0 %v1085_v60 }
  0x55   :  { %645 = vmatprep.mubr.bf16.mxu1 %v1087_v61 }
  0x5b   :  { %549 = vmatmul.mubr.bf16.gmra.mxu0 %v1089_v62 }
  0x5c   :  { %646 = vmatmul.mubr.bf16.gmra.mxu1 %v1090_v63 }
  0xe3   :  { %v899_v0 = vpop.f32.mrf.mxu0 }
  0xe4   :  { %v963_v1 = vpop.f32.mrf.mxu1 }
  0xe5   :  { %v900_v2 = vpop.f32.mrf.mxu0 }
  0xe6   :  { %v901_v3 = vadd.f32 %v900_v2, %v899_v0  ;;  %v964_v4 = vpop.f32.mrf.mxu1 }
  0xe7   :  { %v965_v5 = vadd.f32 %v964_v4, %v963_v1  ;;  %v902_v6 = vpop.f32.mrf.mxu0 }
  0xe8   :  { %v966_v7 = vpop.f32.mrf.mxu1 }
  0xe9   :  { %v592_v8 = vadd.f32 %v965_v5, %v901_v3  ;;  %v903_v9 = vpop.f32.mrf.mxu0 }
  0xea   :  { %v904_v10 = vadd.f32 %v903_v9, %v902_v6  ;;  %v967_v11 = vpop.f32.mrf.mxu1 }
  0xeb   :  { %vm654_vm0 = vcmp.gt.f32.partialorder %v592_v8, 0.0  ;;  %v670_v12 = vmul.f32 0.2, %v592_v8  ;;  %v968_v13 = vadd.f32 %v967_v11, %v966_v7  ;;  %v905_v14 = vpop.f32.mrf.mxu0 }
  0xec   :  { %v969_v15 = vpop.f32.mrf.mxu1 }
  0xed   :  { %v686_v16 = vsel %vm654_vm0, %v592_v8, %v670_v12  ;;  %v595_v17 = vadd.f32 %v968_v13, %v904_v10  ;;  %v906_v18 = vpop.f32.mrf.mxu0 }
  0xee   :  { %v867_v19 = vpack.c.bf16 %v686_v16, %v686_v16  ;;  %v907_v20 = vadd.f32 %v906_v18, %v905_v14  ;;  %v970_v21 = vpop.f32.mrf.mxu1 }
  0xef   :  { %vm655_vm2 = vcmp.gt.f32.partialorder %v595_v17, 0.0  ;;  %v671_v22 = vmul.f32 0.2, %v595_v17  ;;  %v971_v23 = vadd.f32 %v970_v21, %v969_v15  ;;  %v908_v24 = vpop.f32.mrf.mxu0 }
  0xf0   :  { %767 = vst.msk [vmem:[%s1364_s2] sm:$0xf] %vm766_vm1, %v867_v19  ;;  %v972_v25 = vpop.f32.mrf.mxu1 }
  0xf1   :  { %v687_v26 = vsel %vm655_vm2, %v595_v17, %v671_v22  ;;  %v600_v27 = vadd.f32 %v971_v23, %v907_v20  ;;  %v909_v28 = vpop.f32.mrf.mxu0 }
  0xf2   :  { %v868_v29 = vpack.c.bf16 %v687_v26, %v687_v26  ;;  %v910_v30 = vadd.f32 %v909_v28, %v908_v24  ;;  %v973_v31 = vpop.f32.mrf.mxu1 }
  0xf3   :  { %vm656_vm3 = vcmp.gt.f32.partialorder %v600_v27, 0.0  ;;  %v672_v32 = vmul.f32 0.2, %v600_v27  ;;  %v974_v33 = vadd.f32 %v973_v31, %v972_v25  ;;  %v911_v34 = vpop.f32.mrf.mxu0 }
  0xf4   :  { %768 = vst.msk [vmem:[%s1364_s2 + $0x4] sm:$0xf] %vm766_vm1, %v868_v29  ;;  %v975_v35 = vpop.f32.mrf.mxu1 }
  0xf5   :  { %v688_v36 = vsel %vm656_vm3, %v600_v27, %v672_v32  ;;  %v603_v37 = vadd.f32 %v974_v33, %v910_v30  ;;  %v912_v38 = vpop.f32.mrf.mxu0 }
  0xf6   :  { %v869_v39 = vpack.c.bf16 %v688_v36, %v688_v36  ;;  %v913_v40 = vadd.f32 %v912_v38, %v911_v34  ;;  %v976_v41 = vpop.f32.mrf.mxu1 }
  0xf7   :  { %vm657_vm4 = vcmp.gt.f32.partialorder %v603_v37, 0.0  ;;  %v673_v42 = vmul.f32 0.2, %v603_v37  ;;  %v977_v43 = vadd.f32 %v976_v41, %v975_v35  ;;  %v914_v44 = vpop.f32.mrf.mxu0 }
  0xf8   :  { %769 = vst.msk [vmem:[%s1364_s2 + $0x8] sm:$0xf] %vm766_vm1, %v869_v39  ;;  %v978_v45 = vpop.f32.mrf.mxu1 }
  0xf9   :  { %v689_v46 = vsel %vm657_vm4, %v603_v37, %v673_v42  ;;  %v608_v47 = vadd.f32 %v977_v43, %v913_v40  ;;  %v915_v48 = vpop.f32.mrf.mxu0 }
  0xfa   :  { %v870_v49 = vpack.c.bf16 %v689_v46, %v689_v46  ;;  %v916_v50 = vadd.f32 %v915_v48, %v914_v44  ;;  %v979_v51 = vpop.f32.mrf.mxu1 }
  0xfb   :  { %vm658_vm5 = vcmp.gt.f32.partialorder %v608_v47, 0.0  ;;  %v674_v52 = vmul.f32 0.2, %v608_v47  ;;  %v980_v53 = vadd.f32 %v979_v51, %v978_v45  ;;  %v917_v54 = vpop.f32.mrf.mxu0 }
  0xfc   :  { %770 = vst.msk [vmem:[%s1364_s2 + $0xc] sm:$0xf] %vm766_vm1, %v870_v49  ;;  %v981_v55 = vpop.f32.mrf.mxu1 }
  0xfd   :  { %v690_v56 = vsel %vm658_vm5, %v608_v47, %v674_v52  ;;  %v611_v57 = vadd.f32 %v980_v53, %v916_v50  ;;  %v918_v58 = vpop.f32.mrf.mxu0 }
  0xfe   :  { %v871_v59 = vpack.c.bf16 %v690_v56, %v690_v56  ;;  %v919_v60 = vadd.f32 %v918_v58, %v917_v54  ;;  %v982_v61 = vpop.f32.mrf.mxu1 }
  0xff   :  { %vm659_vm6 = vcmp.gt.f32.partialorder %v611_v57, 0.0  ;;  %v675_v62 = vmul.f32 0.2, %v611_v57  ;;  %v983_v63 = vadd.f32 %v982_v61, %v981_v55  ;;  %v920_v0 = vpop.f32.mrf.mxu0 }
 0x100   :  { %771 = vst.msk [vmem:[%s1364_s2 + $0x10] sm:$0xf] %vm766_vm1, %v871_v59  ;;  %v984_v1 = vpop.f32.mrf.mxu1 }
 0x101   :  { %v691_v2 = vsel %vm659_vm6, %v611_v57, %v675_v62  ;;  %v616_v3 = vadd.f32 %v983_v63, %v919_v60  ;;  %v921_v4 = vpop.f32.mrf.mxu0 }
 0x102   :  { %v872_v5 = vpack.c.bf16 %v691_v2, %v691_v2  ;;  %v922_v6 = vadd.f32 %v921_v4, %v920_v0  ;;  %v985_v7 = vpop.f32.mrf.mxu1 }
 0x103   :  { %vm660_vm7 = vcmp.gt.f32.partialorder %v616_v3, 0.0  ;;  %v676_v8 = vmul.f32 0.2, %v616_v3  ;;  %v986_v9 = vadd.f32 %v985_v7, %v984_v1  ;;  %v923_v10 = vpop.f32.mrf.mxu0 }
 0x104   :  { %772 = vst.msk [vmem:[%s1364_s2 + $0x14] sm:$0xf] %vm766_vm1, %v872_v5  ;;  %v987_v11 = vpop.f32.mrf.mxu1 }
 0x105   :  { %v692_v12 = vsel %vm660_vm7, %v616_v3, %v676_v8  ;;  %v619_v13 = vadd.f32 %v986_v9, %v922_v6  ;;  %v924_v14 = vpop.f32.mrf.mxu0 }
 0x106   :  { %v873_v15 = vpack.c.bf16 %v692_v12, %v692_v12  ;;  %v925_v16 = vadd.f32 %v924_v14, %v923_v10  ;;  %v988_v17 = vpop.f32.mrf.mxu1 }
 0x107   :  { %vm661_vm8 = vcmp.gt.f32.partialorder %v619_v13, 0.0  ;;  %v677_v18 = vmul.f32 0.2, %v619_v13  ;;  %v989_v19 = vadd.f32 %v988_v17, %v987_v11  ;;  %v926_v20 = vpop.f32.mrf.mxu0 }
 0x108   :  { %773 = vst.msk [vmem:[%s1364_s2 + $0x18] sm:$0xf] %vm766_vm1, %v873_v15  ;;  %v990_v21 = vpop.f32.mrf.mxu1 }
 0x109   :  { %v693_v22 = vsel %vm661_vm8, %v619_v13, %v677_v18  ;;  %v624_v23 = vadd.f32 %v989_v19, %v925_v16  ;;  %v927_v24 = vpop.f32.mrf.mxu0 }
 0x10a   :  { %v874_v25 = vpack.c.bf16 %v693_v22, %v693_v22  ;;  %v928_v26 = vadd.f32 %v927_v24, %v926_v20  ;;  %v991_v27 = vpop.f32.mrf.mxu1 }
 0x10b   :  { %vm662_vm9 = vcmp.gt.f32.partialorder %v624_v23, 0.0  ;;  %v678_v28 = vmul.f32 0.2, %v624_v23  ;;  %v992_v29 = vadd.f32 %v991_v27, %v990_v21  ;;  %v929_v30 = vpop.f32.mrf.mxu0 }
 0x10c   :  { %774 = vst.msk [vmem:[%s1364_s2 + $0x1c] sm:$0xf] %vm766_vm1, %v874_v25  ;;  %v993_v31 = vpop.f32.mrf.mxu1 }
 0x10d   :  { %v694_v32 = vsel %vm662_vm9, %v624_v23, %v678_v28  ;;  %v627_v33 = vadd.f32 %v992_v29, %v928_v26  ;;  %v930_v34 = vpop.f32.mrf.mxu0 }
 0x10e   :  { %v875_v35 = vpack.c.bf16 %v694_v32, %v694_v32  ;;  %v931_v36 = vadd.f32 %v930_v34, %v929_v30  ;;  %v994_v37 = vpop.f32.mrf.mxu1 }
 0x10f   :  { %vm663_vm10 = vcmp.gt.f32.partialorder %v627_v33, 0.0  ;;  %v679_v38 = vmul.f32 0.2, %v627_v33  ;;  %v995_v39 = vadd.f32 %v994_v37, %v993_v31  ;;  %v932_v40 = vpop.f32.mrf.mxu0 }
 0x110   :  { %775 = vst.msk [vmem:[%s1364_s2 + $0x20] sm:$0xf] %vm766_vm1, %v875_v35  ;;  %v996_v41 = vpop.f32.mrf.mxu1 }
 0x111   :  { %v695_v42 = vsel %vm663_vm10, %v627_v33, %v679_v38  ;;  %v632_v43 = vadd.f32 %v995_v39, %v931_v36  ;;  %v933_v44 = vpop.f32.mrf.mxu0 }
 0x112   :  { %v876_v45 = vpack.c.bf16 %v695_v42, %v695_v42  ;;  %v934_v46 = vadd.f32 %v933_v44, %v932_v40  ;;  %v997_v47 = vpop.f32.mrf.mxu1 }
 0x113   :  { %vm664_vm11 = vcmp.gt.f32.partialorder %v632_v43, 0.0  ;;  %v680_v48 = vmul.f32 0.2, %v632_v43  ;;  %v998_v49 = vadd.f32 %v997_v47, %v996_v41  ;;  %v935_v50 = vpop.f32.mrf.mxu0 }
 0x114   :  { %776 = vst.msk [vmem:[%s1364_s2 + $0x24] sm:$0xf] %vm766_vm1, %v876_v45  ;;  %v999_v51 = vpop.f32.mrf.mxu1 }
 0x115   :  { %v696_v52 = vsel %vm664_vm11, %v632_v43, %v680_v48  ;;  %v635_v53 = vadd.f32 %v998_v49, %v934_v46  ;;  %v936_v54 = vpop.f32.mrf.mxu0 }
 0x116   :  { %v877_v55 = vpack.c.bf16 %v696_v52, %v696_v52  ;;  %v937_v56 = vadd.f32 %v936_v54, %v935_v50  ;;  %v1000_v57 = vpop.f32.mrf.mxu1 }
 0x117   :  { %vm665_vm12 = vcmp.gt.f32.partialorder %v635_v53, 0.0  ;;  %v681_v58 = vmul.f32 0.2, %v635_v53  ;;  %v1001_v59 = vadd.f32 %v1000_v57, %v999_v51  ;;  %v938_v60 = vpop.f32.mrf.mxu0 }
 0x118   :  { %777 = vst.msk [vmem:[%s1364_s2 + $0x28] sm:$0xf] %vm766_vm1, %v877_v55  ;;  %v1002_v61 = vpop.f32.mrf.mxu1 }
 0x119   :  { %v697_v62 = vsel %vm665_vm12, %v635_v53, %v681_v58  ;;  %v640_v63 = vadd.f32 %v1001_v59, %v937_v56  ;;  %v939_v0 = vpop.f32.mrf.mxu0 }
 0x11a   :  { %v878_v1 = vpack.c.bf16 %v697_v62, %v697_v62  ;;  %v940_v2 = vadd.f32 %v939_v0, %v938_v60  ;;  %v1003_v3 = vpop.f32.mrf.mxu1 }
 0x11b   :  { %vm666_vm13 = vcmp.gt.f32.partialorder %v640_v63, 0.0  ;;  %v682_v4 = vmul.f32 0.2, %v640_v63  ;;  %v1004_v5 = vadd.f32 %v1003_v3, %v1002_v61  ;;  %v941_v6 = vpop.f32.mrf.mxu0 }
 0x11c   :  { %778 = vst.msk [vmem:[%s1364_s2 + $0x2c] sm:$0xf] %vm766_vm1, %v878_v1  ;;  %v1005_v7 = vpop.f32.mrf.mxu1 }
 0x11d   :  { %v698_v8 = vsel %vm666_vm13, %v640_v63, %v682_v4  ;;  %v643_v9 = vadd.f32 %v1004_v5, %v940_v2  ;;  %v942_v10 = vpop.f32.mrf.mxu0 }
 0x11e   :  { %v879_v11 = vpack.c.bf16 %v698_v8, %v698_v8  ;;  %v943_v12 = vadd.f32 %v942_v10, %v941_v6  ;;  %v1006_v13 = vpop.f32.mrf.mxu1 }
 0x11f   :  { %vm667_vm14 = vcmp.gt.f32.partialorder %v643_v9, 0.0  ;;  %v683_v14 = vmul.f32 0.2, %v643_v9  ;;  %v1007_v15 = vadd.f32 %v1006_v13, %v1005_v7  ;;  %v944_v16 = vpop.f32.mrf.mxu0 }
 0x120   :  { %779 = vst.msk [vmem:[%s1364_s2 + $0x30] sm:$0xf] %vm766_vm1, %v879_v11  ;;  %v1008_v17 = vpop.f32.mrf.mxu1 }
 0x121   :  { %v699_v18 = vsel %vm667_vm14, %v643_v9, %v683_v14  ;;  %v648_v19 = vadd.f32 %v1007_v15, %v943_v12  ;;  %v945_v20 = vpop.f32.mrf.mxu0 }
 0x122   :  { %v880_v21 = vpack.c.bf16 %v699_v18, %v699_v18  ;;  %v946_v22 = vadd.f32 %v945_v20, %v944_v16  ;;  %v1009_v23 = vpop.f32.mrf.mxu1 }
 0x123   :  { %vm668_vm15 = vcmp.gt.f32.partialorder %v648_v19, 0.0  ;;  %v684_v24 = vmul.f32 0.2, %v648_v19  ;;  %v1010_v25 = vadd.f32 %v1009_v23, %v1008_v17 }
 0x124   :  { %780 = vst.msk [vmem:[%s1364_s2 + $0x34] sm:$0xf] %vm766_vm1, %v880_v21 }
 0x125   :  { %v700_v26 = vsel %vm668_vm15, %v648_v19, %v684_v24  ;;  %v651_v27 = vadd.f32 %v1010_v25, %v946_v22 }
 0x126   :  { %v881_v28 = vpack.c.bf16 %v700_v26, %v700_v26 }
 0x127   :  { %vm669_vm0 = vcmp.gt.f32.partialorder %v651_v27, 0.0  ;;  %v685_v29 = vmul.f32 0.2, %v651_v27 }
 0x128   :  { %781 = vst.msk [vmem:[%s1364_s2 + $0x38] sm:$0xf] %vm766_vm1, %v881_v28 }
 0x129   :  { %v701_v30 = vsel %vm669_vm0, %v651_v27, %v685_v29 }
 0x12a   :  { %v882_v31 = vpack.c.bf16 %v701_v30, %v701_v30 }
 0x12c   :  { %782 = vst.msk [vmem:[%s1364_s2 + $0x3c] sm:$0xf] %vm766_vm1, %v882_v31 }

// kernel: acgan_discriminator_forward.8
= control target key start
LH: loop header
LB: loop body
LE: loop exit
PB: predicated region body
PF: predicated region fallthrough
CT: control target
= control target key end

     0   :  { %s1388_s1 = inlined_call_operand.vmem [shape: bf16[1024,128], index: 1, kind: input, shape index: {}]   ;;  %s1389_s0 = inlined_call_operand.vmem [shape: bf16[2,16,1024], index: 0, kind: input, shape index: {}]   ;;  %s1390_s2 = inlined_call_operand.vmem [shape: bf16[2,16,128], index: 2, kind: output, shape index: {}]  }
   0x1   :  { %v1063_v0 = vld [vmem:[%s1388_s1 + $0x78] sm:$0xff]   ;;  %v1067_v4 = vld [vmem:[%s1388_s1 + $0x70] sm:$0xff]   ;;  %v1071_v8 = vld [vmem:[%s1388_s1 + $0x68] sm:$0xff]  }
   0x2   :  { %v1064_v1 = vld [vmem:[%s1388_s1 + $0xf8] sm:$0xff]   ;;  %951 = vmatprep.subr.bf16.mxu0 %v1063_v0  ;;  %v1068_v5 = vld [vmem:[%s1388_s1 + $0xf0] sm:$0xff]   ;;  %v1072_v9 = vld [vmem:[%s1388_s1 + $0xe8] sm:$0xff]  }
   0x3   :  { %v1065_v2 = vld [vmem:[%s1388_s1 + $0x38] sm:$0xff]   ;;  %979 = vmatprep.subr.bf16.mxu1 %v1064_v1  ;;  %v1069_v6 = vld [vmem:[%s1388_s1 + $0x30] sm:$0xff]   ;;  %v1073_v10 = vld [vmem:[%s1388_s1 + $0x28] sm:$0xff]  }
   0x4   :  { %v1066_v3 = vld [vmem:[%s1388_s1 + $0xb8] sm:$0xff]   ;;  %952 = vmatpush3.bf16.msra.mxu0 %v1065_v2  ;;  %v1070_v7 = vld [vmem:[%s1388_s1 + $0xb0] sm:$0xff]   ;;  %v1074_v11 = vld [vmem:[%s1388_s1 + $0xa8] sm:$0xff]  }
   0x5   :  { %980 = vmatpush3.bf16.msra.mxu1 %v1066_v3  ;;  %953 = vmatprep.subr.bf16.mxu0 %v1067_v4  ;;  %v1075_v12 = vld [vmem:[%s1388_s1 + $0x60] sm:$0xff]   ;;  %v1079_v16 = vld [vmem:[%s1388_s1 + $0x58] sm:$0xff]   ;;  %v1083_v20 = vld [vmem:[%s1388_s1 + $0x50] sm:$0xff]  }
   0x6   :  { %981 = vmatprep.subr.bf16.mxu1 %v1068_v5  ;;  %v1076_v13 = vld [vmem:[%s1388_s1 + $0xe0] sm:$0xff]   ;;  %v1080_v17 = vld [vmem:[%s1388_s1 + $0xd8] sm:$0xff]   ;;  %v1084_v21 = vld [vmem:[%s1388_s1 + $0xd0] sm:$0xff]  }
   0x7   :  { %v1077_v14 = vld [vmem:[%s1388_s1 + $0x20] sm:$0xff]   ;;  %v1081_v18 = vld [vmem:[%s1388_s1 + $0x18] sm:$0xff]   ;;  %v1085_v22 = vld [vmem:[%s1388_s1 + $0x10] sm:$0xff]  }
   0x8   :  { %954 = vmatpush3.bf16.msra.mxu0 %v1069_v6  ;;  %v1078_v15 = vld [vmem:[%s1388_s1 + $0xa0] sm:$0xff]   ;;  %v1082_v19 = vld [vmem:[%s1388_s1 + $0x98] sm:$0xff]   ;;  %v1086_v23 = vld [vmem:[%s1388_s1 + $0x90] sm:$0xff]  }
   0x9   :  { %982 = vmatpush3.bf16.msra.mxu1 %v1070_v7  ;;  %955 = vmatprep.subr.bf16.mxu0 %v1071_v8  ;;  %v1087_v24 = vld [vmem:[%s1388_s1 + $0x48] sm:$0xff]   ;;  %v1091_v28 = vld [vmem:[%s1388_s1 + $0x40] sm:$0xff]   ;;  %v1095_v40 = vld [vmem:[%s1388_s1 + $0x178] sm:$0xff]  }
   0xa   :  { %983 = vmatprep.subr.bf16.mxu1 %v1072_v9  ;;  %v1088_v25 = vld [vmem:[%s1388_s1 + $0xc8] sm:$0xff]   ;;  %v1092_v29 = vld [vmem:[%s1388_s1 + $0xc0] sm:$0xff]   ;;  %v1096_v41 = vld [vmem:[%s1388_s1 + $0x1f8] sm:$0xff]  }
   0xb   :  { %v1089_v26 = vld [vmem:[%s1388_s1 + $0x8] sm:$0xff]   ;;  %v1093_v30 = vld [vmem:[%s1388_s1] sm:$0xff]   ;;  %v1097_v42 = vld [vmem:[%s1388_s1 + $0x138] sm:$0xff]  }
   0xc   :  { %956 = vmatpush3.bf16.msra.mxu0 %v1073_v10  ;;  %v1090_v27 = vld [vmem:[%s1388_s1 + $0x88] sm:$0xff]   ;;  %v1094_v31 = vld [vmem:[%s1388_s1 + $0x80] sm:$0xff]   ;;  %v1098_v43 = vld [vmem:[%s1388_s1 + $0x1b8] sm:$0xff]  }
   0xd   :  { %984 = vmatpush3.bf16.msra.mxu1 %v1074_v11  ;;  %957 = vmatprep.subr.bf16.mxu0 %v1075_v12  ;;  %v12_v32 = vld [vmem:[%s1389_s0] sm:$0xff]  ;;  %v13_v34 = vld [vmem:[%s1389_s0 + $0x8] sm:$0xff]  ;;  %v1099_v44 = vld [vmem:[%s1388_s1 + $0x170] sm:$0xff]  }
   0xe   :  { %985 = vmatprep.subr.bf16.mxu1 %v1076_v13  ;;  %v16_v33 = vld [vmem:[%s1389_s0 + $0x20] sm:$0xff]  ;;  %v17_v37 = vld [vmem:[%s1389_s0 + $0x28] sm:$0xff]  ;;  %v1100_v45 = vld [vmem:[%s1388_s1 + $0x1f0] sm:$0xff]  }
   0xf   :  { %v852_v35 = vcombine.low %v12_v32, %v16_v33  ;;  %v853_v36 = vcombine.high %v12_v32, %v16_v33  ;;  %v854_v38 = vcombine.low %v13_v34, %v17_v37  ;;  %v855_v39 = vcombine.high %v13_v34, %v17_v37  ;;  %v1101_v46 = vld [vmem:[%s1388_s1 + $0x130] sm:$0xff]   ;;  %v1103_v48 = vld [vmem:[%s1388_s1 + $0x168] sm:$0xff]   ;;  %v1107_v52 = vld [vmem:[%s1388_s1 + $0x160] sm:$0xff]  }
  0x10   :  { %958 = vmatpush3.bf16.msra.mxu0 %v1077_v14  ;;  %v1102_v47 = vld [vmem:[%s1388_s1 + $0x1b0] sm:$0xff]   ;;  %v1104_v49 = vld [vmem:[%s1388_s1 + $0x1e8] sm:$0xff]   ;;  %v1108_v53 = vld [vmem:[%s1388_s1 + $0x1e0] sm:$0xff]  }
  0x11   :  { %986 = vmatpush3.bf16.msra.mxu1 %v1078_v15  ;;  %959 = vmatprep.subr.bf16.mxu0 %v1079_v16  ;;  %v1105_v50 = vld [vmem:[%s1388_s1 + $0x128] sm:$0xff]   ;;  %v1109_v54 = vld [vmem:[%s1388_s1 + $0x120] sm:$0xff]   ;;  %v1111_v56 = vld [vmem:[%s1388_s1 + $0x158] sm:$0xff]  }
  0x12   :  { %987 = vmatprep.subr.bf16.mxu1 %v1080_v17  ;;  %652 = vmatprep.mubr.bf16.mxu0 %v853_v36  ;;  %v1106_v51 = vld [vmem:[%s1388_s1 + $0x1a8] sm:$0xff]   ;;  %v1110_v55 = vld [vmem:[%s1388_s1 + $0x1a0] sm:$0xff]   ;;  %v1112_v57 = vld [vmem:[%s1388_s1 + $0x1d8] sm:$0xff]  }
  0x13   :  { %701 = vmatprep.mubr.bf16.mxu1 %v855_v39  ;;  %v20_v58 = vld [vmem:[%s1389_s0 + $0x40] sm:$0xff]  ;;  %v21_v61 = vld [vmem:[%s1389_s0 + $0x48] sm:$0xff]  ;;  %v1113_v1 = vld [vmem:[%s1388_s1 + $0x118] sm:$0xff]  }
  0x14   :  { %960 = vmatpush3.bf16.msra.mxu0 %v1081_v18  ;;  %v24_v59 = vld [vmem:[%s1389_s0 + $0x60] sm:$0xff]  ;;  %v25_v62 = vld [vmem:[%s1389_s0 + $0x68] sm:$0xff]  ;;  %v1114_v3 = vld [vmem:[%s1388_s1 + $0x198] sm:$0xff]  }
  0x15   :  { %988 = vmatpush3.bf16.msra.mxu1 %v1082_v19  ;;  %961 = vmatprep.subr.bf16.mxu0 %v1083_v20  ;;  %v861_v60 = vcombine.high %v20_v58, %v24_v59  ;;  %v860_v63 = vcombine.low %v20_v58, %v24_v59  ;;  %v863_v0 = vcombine.high %v21_v61, %v25_v62  ;;  %v1115_v4 = vld [vmem:[%s1388_s1 + $0x150] sm:$0xff]   ;;  %v1119_v8 = vld [vmem:[%s1388_s1 + $0x148] sm:$0xff]   ;;  %v1123_v12 = vld [vmem:[%s1388_s1 + $0x140] sm:$0xff]  }
  0x16   :  { %989 = vmatprep.subr.bf16.mxu1 %v1084_v21  ;;  %v862_v2 = vcombine.low %v21_v61, %v25_v62  ;;  %v1116_v5 = vld [vmem:[%s1388_s1 + $0x1d0] sm:$0xff]   ;;  %v1120_v9 = vld [vmem:[%s1388_s1 + $0x1c8] sm:$0xff]   ;;  %v1124_v13 = vld [vmem:[%s1388_s1 + $0x1c0] sm:$0xff]  }
  0x17   :  { %v1117_v6 = vld [vmem:[%s1388_s1 + $0x110] sm:$0xff]   ;;  %v1121_v10 = vld [vmem:[%s1388_s1 + $0x108] sm:$0xff]   ;;  %v1125_v14 = vld [vmem:[%s1388_s1 + $0x100] sm:$0xff]  }
  0x18   :  { %962 = vmatpush3.bf16.msra.mxu0 %v1085_v22  ;;  %v1118_v7 = vld [vmem:[%s1388_s1 + $0x190] sm:$0xff]   ;;  %v1122_v11 = vld [vmem:[%s1388_s1 + $0x188] sm:$0xff]   ;;  %v1126_v15 = vld [vmem:[%s1388_s1 + $0x180] sm:$0xff]  }
  0x19   :  { %990 = vmatpush3.bf16.msra.mxu1 %v1086_v23  ;;  %963 = vmatprep.subr.bf16.mxu0 %v1087_v24  ;;  %v14_v16 = vld [vmem:[%s1389_s0 + $0x10] sm:$0xff]  ;;  %v15_v18 = vld [vmem:[%s1389_s0 + $0x18] sm:$0xff] }
  0x1a   :  { %991 = vmatprep.subr.bf16.mxu1 %v1088_v25  ;;  %v18_v17 = vld [vmem:[%s1389_s0 + $0x30] sm:$0xff]  ;;  %v19_v19 = vld [vmem:[%s1389_s0 + $0x38] sm:$0xff] }
  0x1b   :  { %v856_v20 = vcombine.low %v14_v16, %v18_v17  ;;  %v857_v21 = vcombine.high %v14_v16, %v18_v17  ;;  %v858_v22 = vcombine.low %v15_v18, %v19_v19  ;;  %v859_v23 = vcombine.high %v15_v18, %v19_v19  ;;  %v22_v24 = vld [vmem:[%s1389_s0 + $0x50] sm:$0xff] }
  0x1c   :  { %964 = vmatpush3.bf16.msra.mxu0 %v1089_v26  ;;  %v26_v25 = vld [vmem:[%s1389_s0 + $0x70] sm:$0xff]  ;;  %v23_v26 = vld [vmem:[%s1389_s0 + $0x58] sm:$0xff] }
  0x1d   :  { %992 = vmatpush3.bf16.msra.mxu1 %v1090_v27  ;;  %965 = vmatprep.subr.bf16.mxu0 %v1091_v28  ;;  %v865_v27 = vcombine.high %v22_v24, %v26_v25  ;;  %v27_v28 = vld [vmem:[%s1389_s0 + $0x78] sm:$0xff] }
  0x1e   :  { %993 = vmatprep.subr.bf16.mxu1 %v1092_v29  ;;  %v867_v29 = vcombine.high %v23_v26, %v27_v28 }
  0x20   :  { %966 = vmatpush3.bf16.msra.mxu0 %v1093_v30  ;;  %v864_v30 = vcombine.low %v22_v24, %v26_v25 }
  0x21   :  { %994 = vmatpush3.bf16.msra.mxu1 %v1094_v31  ;;  %1007 = vmatprep.subr.bf16.mxu0 %v1095_v40  ;;  %v866_v31 = vcombine.low %v23_v26, %v27_v28 }
  0x22   :  { %1035 = vmatprep.subr.bf16.mxu1 %v1096_v41 }
  0x23   :  { %653 = vmatmul.mubr.bf16.vlgmr.msra.gmra.mxu0 %v852_v35 }
  0x24   :  { %702 = vmatmul.mubr.bf16.vlgmr.msra.gmra.mxu1 %v854_v38  ;;  %1008 = vmatpush3.bf16.msra.mxu0 %v1097_v42 }
  0x25   :  { %1036 = vmatpush3.bf16.msra.mxu1 %v1098_v43  ;;  %1009 = vmatprep.subr.bf16.mxu0 %v1099_v44 }
  0x26   :  { %1037 = vmatprep.subr.bf16.mxu1 %v1100_v45  ;;  %660 = vmatprep.mubr.bf16.mxu0 %v861_v60 }
  0x27   :  { %709 = vmatprep.mubr.bf16.mxu1 %v863_v0 }
  0x28   :  { %1010 = vmatpush3.bf16.msra.mxu0 %v1101_v46 }
  0x29   :  { %1038 = vmatpush3.bf16.msra.mxu1 %v1102_v47  ;;  %1011 = vmatprep.subr.bf16.mxu0 %v1103_v48 }
  0x2a   :  { %1039 = vmatprep.subr.bf16.mxu1 %v1104_v49 }
  0x2b   :  { %661 = vmatmul.mubr.bf16.gmra.mxu0 %v860_v63 }
  0x2c   :  { %1012 = vmatpush3.bf16.msra.mxu0 %v1105_v50  ;;  %710 = vmatmul.mubr.bf16.gmra.mxu1 %v862_v2 }
  0x2d   :  { %1040 = vmatpush3.bf16.msra.mxu1 %v1106_v51  ;;  %1013 = vmatprep.subr.bf16.mxu0 %v1107_v52 }
  0x2e   :  { %1041 = vmatprep.subr.bf16.mxu1 %v1108_v53  ;;  %750 = vmatprep.mubr.bf16.mxu0 %v857_v21 }
  0x2f   :  { %799 = vmatprep.mubr.bf16.mxu1 %v859_v23 }
  0x30   :  { %1014 = vmatpush3.bf16.msra.mxu0 %v1109_v54 }
  0x31   :  { %1042 = vmatpush3.bf16.msra.mxu1 %v1110_v55  ;;  %1015 = vmatprep.subr.bf16.mxu0 %v1111_v56 }
  0x32   :  { %1043 = vmatprep.subr.bf16.mxu1 %v1112_v57 }
  0x34   :  { %1016 = vmatpush3.bf16.msra.mxu0 %v1113_v1 }
  0x35   :  { %1044 = vmatpush3.bf16.msra.mxu1 %v1114_v3  ;;  %1017 = vmatprep.subr.bf16.mxu0 %v1115_v4 }
  0x36   :  { %1045 = vmatprep.subr.bf16.mxu1 %v1116_v5 }
  0x38   :  { %1018 = vmatpush3.bf16.msra.mxu0 %v1117_v6 }
  0x39   :  { %1046 = vmatpush3.bf16.msra.mxu1 %v1118_v7  ;;  %1019 = vmatprep.subr.bf16.mxu0 %v1119_v8 }
  0x3a   :  { %1047 = vmatprep.subr.bf16.mxu1 %v1120_v9 }
  0x3c   :  { %1020 = vmatpush3.bf16.msra.mxu0 %v1121_v10 }
  0x3d   :  { %1048 = vmatpush3.bf16.msra.mxu1 %v1122_v11  ;;  %1021 = vmatprep.subr.bf16.mxu0 %v1123_v12 }
  0x3e   :  { %1049 = vmatprep.subr.bf16.mxu1 %v1124_v13 }
  0x40   :  { %1022 = vmatpush3.bf16.msra.mxu0 %v1125_v14 }
  0x41   :  { %1050 = vmatpush3.bf16.msra.mxu1 %v1126_v15 }
  0x43   :  { %751 = vmatmul.mubr.bf16.vlgmr.msra.gmra.mxu0 %v856_v20 }
  0x44   :  { %800 = vmatmul.mubr.bf16.vlgmr.msra.gmra.mxu1 %v858_v22  ;;  %758 = vmatprep.mubr.bf16.mxu0 %v865_v27 }
  0x45   :  { %807 = vmatprep.mubr.bf16.mxu1 %v867_v29 }
  0x4b   :  { %759 = vmatmul.mubr.bf16.gmra.mxu0 %v864_v30 }
  0x4c   :  { %808 = vmatmul.mubr.bf16.gmra.mxu1 %v866_v31 }
  0xe3   :  { %v967_v32 = vpop.f32.mrf.mxu0 }
  0xe4   :  { %v995_v33 = vpop.f32.mrf.mxu1 }
  0xe5   :  { %v968_v34 = vpop.f32.mrf.mxu0 }
  0xe6   :  { %v996_v35 = vpop.f32.mrf.mxu1  ;;  %v969_v48 = vadd.f32 %v968_v34, %v967_v32 }
  0xe7   :  { %v970_v36 = vpop.f32.mrf.mxu0  ;;  %v997_v49 = vadd.f32 %v996_v35, %v995_v33 }
  0xe8   :  { %v998_v37 = vpop.f32.mrf.mxu1 }
  0xe9   :  { %v971_v38 = vpop.f32.mrf.mxu0  ;;  %v704_v56 = vadd.f32 %v997_v49, %v969_v48 }
  0xea   :  { %v999_v39 = vpop.f32.mrf.mxu1  ;;  %v972_v52 = vadd.f32 %v971_v38, %v970_v36 }
  0xeb   :  { %v973_v40 = vpop.f32.mrf.mxu0  ;;  %v1000_v53 = vadd.f32 %v999_v39, %v998_v37 }
  0xec   :  { %v1001_v41 = vpop.f32.mrf.mxu1 }
  0xed   :  { %v974_v42 = vpop.f32.mrf.mxu0  ;;  %v707_v62 = vadd.f32 %v1000_v53, %v972_v52 }
  0xee   :  { %v1002_v43 = vpop.f32.mrf.mxu1  ;;  %v975_v1 = vadd.f32 %v974_v42, %v973_v40 }
  0xef   :  { %v976_v44 = vpop.f32.mrf.mxu0  ;;  %v1003_v2 = vadd.f32 %v1002_v43, %v1001_v41 }
  0xf0   :  { %v1004_v45 = vpop.f32.mrf.mxu1 }
  0xf1   :  { %v977_v46 = vpop.f32.mrf.mxu0  ;;  %v712_v13 = vadd.f32 %v1003_v2, %v975_v1 }
  0xf2   :  { %v1005_v47 = vpop.f32.mrf.mxu1  ;;  %v978_v9 = vadd.f32 %v977_v46, %v976_v44 }
  0xf3   :  { %v1006_v10 = vadd.f32 %v1005_v47, %v1004_v45 }
  0xf5   :  { %v715_v22 = vadd.f32 %v1006_v10, %v978_v9 }
 0x103   :  { %v1023_v50 = vpop.f32.mrf.mxu0 }
 0x104   :  { %v1051_v51 = vpop.f32.mrf.mxu1 }
 0x105   :  { %v1024_v54 = vpop.f32.mrf.mxu0 }
 0x106   :  { %v1052_v55 = vpop.f32.mrf.mxu1  ;;  %v1025_v57 = vadd.f32 %v1024_v54, %v1023_v50 }
 0x107   :  { %v1026_v58 = vpop.f32.mrf.mxu0  ;;  %v1053_v61 = vadd.f32 %v1052_v55, %v1051_v51 }
 0x108   :  { %v1054_v59 = vpop.f32.mrf.mxu1  ;;  %v753_v60 = vadd.f32 %v1025_v57, %v704_v56 }
 0x109   :  { %v1027_v63 = vpop.f32.mrf.mxu0 }
 0x10a   :  { %v1055_v0 = vpop.f32.mrf.mxu1  ;;  %v802_v3 = vadd.f32 %v1053_v61, %v753_v60  ;;  %v1028_v4 = vadd.f32 %v1027_v63, %v1026_v58 }
 0x10b   :  { %v1029_v5 = vpop.f32.mrf.mxu0  ;;  %v1056_v8 = vadd.f32 %v1055_v0, %v1054_v59 }
 0x10c   :  { %v1057_v6 = vpop.f32.mrf.mxu1  ;;  %v756_v7 = vadd.f32 %v1028_v4, %v707_v62  ;;  %v820_v14 = vmul.f32 0.2, %v802_v3  ;;  %vm816_vm0 = vcmp.gt.f32.partialorder %v802_v3, 0.0 }
 0x10d   :  { %v1030_v11 = vpop.f32.mrf.mxu0 }
 0x10e   :  { %v1058_v12 = vpop.f32.mrf.mxu1  ;;  %v805_v15 = vadd.f32 %v1056_v8, %v756_v7  ;;  %v1031_v16 = vadd.f32 %v1030_v11, %v1029_v5  ;;  %v824_v25 = vsel %vm816_vm0, %v802_v3, %v820_v14 }
 0x10f   :  { %v1032_v17 = vpop.f32.mrf.mxu0  ;;  %v1059_v21 = vadd.f32 %v1058_v12, %v1057_v6 }
 0x110   :  { %v1060_v18 = vpop.f32.mrf.mxu1  ;;  %vm817_vm1 = vcmp.gt.f32.partialorder %v805_v15, 0.0  ;;  %v821_v19 = vmul.f32 0.2, %v805_v15  ;;  %v761_v20 = vadd.f32 %v1031_v16, %v712_v13 }
 0x111   :  { %v1033_v23 = vpop.f32.mrf.mxu0 }
 0x112   :  { %v1061_v24 = vpop.f32.mrf.mxu1  ;;  %v825_v26 = vsel %vm817_vm1, %v805_v15, %v821_v19  ;;  %v810_v27 = vadd.f32 %v1059_v21, %v761_v20  ;;  %v1034_v28 = vadd.f32 %v1033_v23, %v1032_v17 }
 0x113   :  { %v943_v29 = vpack.c.bf16 %v825_v26, %v824_v25  ;;  %v1062_v31 = vadd.f32 %v1061_v24, %v1060_v18 }
 0x114   :  { %v764_v30 = vadd.f32 %v1034_v28, %v715_v22  ;;  %v822_v32 = vmul.f32 0.2, %v810_v27  ;;  %vm818_vm2 = vcmp.gt.f32.partialorder %v810_v27, 0.0 }
 0x115   :  { %944 = vst [vmem:[%s1390_s2] sm:$0xff] %v943_v29  }
 0x116   :  { %v813_v33 = vadd.f32 %v1062_v31, %v764_v30  ;;  %v826_v35 = vsel %vm818_vm2, %v810_v27, %v822_v32 }
 0x118   :  { %vm819_vm3 = vcmp.gt.f32.partialorder %v813_v33, 0.0  ;;  %v823_v34 = vmul.f32 0.2, %v813_v33 }
 0x11a   :  { %v827_v36 = vsel %vm819_vm3, %v813_v33, %v823_v34 }
 0x11b   :  { %v948_v37 = vpack.c.bf16 %v827_v36, %v826_v35 }
 0x11d   :  { %950 = vst [vmem:[%s1390_s2 + $0x8] sm:$0xff] %v948_v37  }

// kernel: acgan_discriminator_forward.9
= control target key start
LH: loop header
LB: loop body
LE: loop exit
PB: predicated region body
PF: predicated region fallthrough
CT: control target
= control target key end

     0   :  { %v285_v28 = vlaneseq  ;;  %v2090_v36 = vmov 1966171168   ;;  %s2557_s0 = inlined_call_operand.vmem [shape: bf16[2,2048], index: 0, kind: input, shape index: {}]   ;;  %s2558_s1 = inlined_call_operand.vmem [shape: bf16[2048,16], index: 1, kind: input, shape index: {}]   ;;  %s2559_s2 = inlined_call_operand.vmem [shape: f32[16,11], index: 2, kind: input, shape index: {}]   ;;  %s2560_s3 = inlined_call_operand.vmem [shape: f32[1,11], index: 3, kind: input, shape index: {}]   ;;  %s2561_s4 = inlined_call_operand.vmem [shape: f32[2,1], index: 4, kind: output, shape index: {0}]   ;;  %s2562_s5 = inlined_call_operand.hbm [shape: f32[2,10], index: 5, kind: output, shape index: {1}]  }
   0x1   :  { %v1930_v0 = vld [vmem:[%s2558_s1 + $0x78] sm:$0xff]   ;;  %v1934_v4 = vld [vmem:[%s2558_s1 + $0x70] sm:$0xff]   ;;  %v1938_v8 = vld [vmem:[%s2558_s1 + $0x68] sm:$0xff]   ;;  %v283_v37 = vunpack.c.l.s4 %v2090_v36 }
   0x2   :  { %v1931_v1 = vld [vmem:[%s2558_s1 + $0xf8] sm:$0xff]   ;;  %1739 = vmatprep.subr.bf16.mxu0 %v1930_v0  ;;  %v1935_v5 = vld [vmem:[%s2558_s1 + $0xf0] sm:$0xff]   ;;  %v1939_v9 = vld [vmem:[%s2558_s1 + $0xe8] sm:$0xff]   ;;  %v286_v33 = vshrl.u32 %v285_v28, 7 }
   0x3   :  { %v1932_v2 = vld [vmem:[%s2558_s1 + $0x38] sm:$0xff]   ;;  %1761 = vmatprep.subr.bf16.mxu1 %v1931_v1  ;;  %v1936_v6 = vld [vmem:[%s2558_s1 + $0x30] sm:$0xff]   ;;  %v1940_v10 = vld [vmem:[%s2558_s1 + $0x28] sm:$0xff]   ;;  %v284_v40 = vunpack.c.0.s8 %v283_v37 }
   0x4   :  { %v1933_v3 = vld [vmem:[%s2558_s1 + $0xb8] sm:$0xff]   ;;  %1740 = vmatpush3.bf16.msra.mxu0 %v1932_v2  ;;  %v1937_v7 = vld [vmem:[%s2558_s1 + $0xb0] sm:$0xff]   ;;  %v1941_v11 = vld [vmem:[%s2558_s1 + $0xa8] sm:$0xff]  }
   0x5   :  { %1762 = vmatpush3.bf16.msra.mxu1 %v1933_v3  ;;  %1741 = vmatprep.subr.bf16.mxu0 %v1934_v4  ;;  %v1942_v12 = vld [vmem:[%s2558_s1 + $0x60] sm:$0xff]   ;;  %v1946_v16 = vld [vmem:[%s2558_s1 + $0x58] sm:$0xff]   ;;  %v1950_v20 = vld [vmem:[%s2558_s1 + $0x50] sm:$0xff]   ;;  %v2230_v41 = vsub.s32 %v284_v40, %v286_v33 }
   0x6   :  { %1763 = vmatprep.subr.bf16.mxu1 %v1935_v5  ;;  %v1943_v13 = vld [vmem:[%s2558_s1 + $0xe0] sm:$0xff]   ;;  %v1947_v17 = vld [vmem:[%s2558_s1 + $0xd8] sm:$0xff]   ;;  %v1951_v21 = vld [vmem:[%s2558_s1 + $0xd0] sm:$0xff]  }
   0x7   :  { %v1944_v14 = vld [vmem:[%s2558_s1 + $0x20] sm:$0xff]   ;;  %v1948_v18 = vld [vmem:[%s2558_s1 + $0x18] sm:$0xff]   ;;  %v1952_v22 = vld [vmem:[%s2558_s1 + $0x10] sm:$0xff]  }
   0x8   :  { %1742 = vmatpush3.bf16.msra.mxu0 %v1936_v6  ;;  %v1945_v15 = vld [vmem:[%s2558_s1 + $0xa0] sm:$0xff]   ;;  %v1949_v19 = vld [vmem:[%s2558_s1 + $0x98] sm:$0xff]   ;;  %v1953_v23 = vld [vmem:[%s2558_s1 + $0x90] sm:$0xff]  }
   0x9   :  { %1764 = vmatpush3.bf16.msra.mxu1 %v1937_v7  ;;  %1743 = vmatprep.subr.bf16.mxu0 %v1938_v8  ;;  %v1954_v24 = vld [vmem:[%s2558_s1 + $0x48] sm:$0xff]   ;;  %v1958_v29 = vld [vmem:[%s2558_s1 + $0x40] sm:$0xff]   ;;  %v1963_v35 = vld [vmem:[%s2558_s1 + $0x178] sm:$0xff]  }
   0xa   :  { %1765 = vmatprep.subr.bf16.mxu1 %v1939_v9  ;;  %v1955_v25 = vld [vmem:[%s2558_s1 + $0xc8] sm:$0xff]   ;;  %v1959_v30 = vld [vmem:[%s2558_s1 + $0xc0] sm:$0xff]   ;;  %v1964_v38 = vld [vmem:[%s2558_s1 + $0x1f8] sm:$0xff]  }
   0xb   :  { %v1956_v26 = vld [vmem:[%s2558_s1 + $0x8] sm:$0xff]   ;;  %v1960_v31 = vld [vmem:[%s2558_s1] sm:$0xff]   ;;  %v1965_v48 = vld [vmem:[%s2558_s1 + $0x138] sm:$0xff]  }
   0xc   :  { %1744 = vmatpush3.bf16.msra.mxu0 %v1940_v10  ;;  %v1957_v27 = vld [vmem:[%s2558_s1 + $0x88] sm:$0xff]   ;;  %v1961_v32 = vld [vmem:[%s2558_s1 + $0x80] sm:$0xff]   ;;  %v1967_v51 = vld [vmem:[%s2558_s1 + $0x170] sm:$0xff]  }
   0xd   :  { %1766 = vmatpush3.bf16.msra.mxu1 %v1941_v11  ;;  %1745 = vmatprep.subr.bf16.mxu0 %v1942_v12  ;;  %v21_v34 = vld [vmem:[%s2557_s0] sm:$0xff]  ;;  %v1966_v53 = vld [vmem:[%s2558_s1 + $0x1b8] sm:$0xff]   ;;  %v1968_v54 = vld [vmem:[%s2558_s1 + $0x1f0] sm:$0xff]  }
   0xe   :  { %1767 = vmatprep.subr.bf16.mxu1 %v1943_v13  ;;  %v281_v39 = vcombine.high %v21_v34, %v21_v34  ;;  %v288_v42 = vrot.slane %v21_v34, %v2230_v41  ;;  %v1969_v56 = vld [vmem:[%s2558_s1 + $0x130] sm:$0xff]   ;;  %v1971_v57 = vld [vmem:[%s2558_s1 + $0x168] sm:$0xff]   ;;  %v1975_v61 = vld [vmem:[%s2558_s1 + $0x160] sm:$0xff]  }
   0xf   :  { %v1970_v58 = vld [vmem:[%s2558_s1 + $0x1b0] sm:$0xff]   ;;  %v1972_v59 = vld [vmem:[%s2558_s1 + $0x1e8] sm:$0xff]   ;;  %v1976_v63 = vld [vmem:[%s2558_s1 + $0x1e0] sm:$0xff]  }
  0x10   :  { %1746 = vmatpush3.bf16.msra.mxu0 %v1944_v14  ;;  %v2234_v43 = vrot.slane %v281_v39, %v2230_v41  ;;  %v296_v44 = vcombine.high %v288_v42, %v288_v42  ;;  %v304_v45 = vrot.slane %v288_v42, %v2230_v41  ;;  %v1973_v60 = vld [vmem:[%s2558_s1 + $0x128] sm:$0xff]   ;;  %v1977_v0 = vld [vmem:[%s2558_s1 + $0x120] sm:$0xff]   ;;  %v1979_v1 = vld [vmem:[%s2558_s1 + $0x158] sm:$0xff]  }
  0x11   :  { %1768 = vmatpush3.bf16.msra.mxu1 %v1945_v15  ;;  %1747 = vmatprep.subr.bf16.mxu0 %v1946_v16  ;;  %v1974_v62 = vld [vmem:[%s2558_s1 + $0x1a8] sm:$0xff]   ;;  %v1978_v2 = vld [vmem:[%s2558_s1 + $0x1a0] sm:$0xff]   ;;  %v1980_v3 = vld [vmem:[%s2558_s1 + $0x1d8] sm:$0xff]  }
  0x12   :  { %1769 = vmatprep.subr.bf16.mxu1 %v1947_v17  ;;  %v297_v46 = vcombine.high %v2234_v43, %v2234_v43  ;;  %v318_v47 = vrot.slane %v296_v44, %v2230_v41  ;;  %v326_v50 = vcombine.high %v304_v45, %v304_v45  ;;  %v1981_v4 = vld [vmem:[%s2558_s1 + $0x118] sm:$0xff]   ;;  %v1983_v5 = vld [vmem:[%s2558_s1 + $0x150] sm:$0xff]   ;;  %v1987_v9 = vld [vmem:[%s2558_s1 + $0x148] sm:$0xff]   ;;  %v311_v17 = vrot.slane %v2234_v43, %v2230_v41 }
  0x13   :  { %v1982_v6 = vld [vmem:[%s2558_s1 + $0x198] sm:$0xff]   ;;  %v1984_v7 = vld [vmem:[%s2558_s1 + $0x1d0] sm:$0xff]   ;;  %v1988_v11 = vld [vmem:[%s2558_s1 + $0x1c8] sm:$0xff]  }
  0x14   :  { %1748 = vmatpush3.bf16.msra.mxu0 %v1948_v18  ;;  %v325_v49 = vrot.slane %v297_v46, %v2230_v41  ;;  %1195 = vmatprep.mubr.bf16.mxu0 %v318_v47  ;;  %v328_v52 = vcombine.high %v318_v47, %v318_v47  ;;  %v1985_v8 = vld [vmem:[%s2558_s1 + $0x110] sm:$0xff]   ;;  %v1989_v12 = vld [vmem:[%s2558_s1 + $0x108] sm:$0xff]   ;;  %v1991_v13 = vld [vmem:[%s2558_s1 + $0x140] sm:$0xff]  }
  0x15   :  { %1770 = vmatpush3.bf16.msra.mxu1 %v1949_v19  ;;  %1749 = vmatprep.subr.bf16.mxu0 %v1950_v20  ;;  %v1986_v10 = vld [vmem:[%s2558_s1 + $0x190] sm:$0xff]   ;;  %v1990_v14 = vld [vmem:[%s2558_s1 + $0x188] sm:$0xff]   ;;  %v1992_v15 = vld [vmem:[%s2558_s1 + $0x1c0] sm:$0xff]  }
  0x16   :  { %1771 = vmatprep.subr.bf16.mxu1 %v1951_v21  ;;  %v329_v55 = vcombine.high %v325_v49, %v325_v49  ;;  %1235 = vmatprep.mubr.bf16.mxu1 %v328_v52  ;;  %v1993_v16 = vld [vmem:[%s2558_s1 + $0x100] sm:$0xff]   ;;  %v1995_v18 = vld [vmem:[%s2558_s1 + $0x278] sm:$0xff]   ;;  %v2002_v28 = vld [vmem:[%s2558_s1 + $0x2b0] sm:$0xff]  }
  0x17   :  { %v1994_v19 = vld [vmem:[%s2558_s1 + $0x180] sm:$0xff]   ;;  %v1996_v20 = vld [vmem:[%s2558_s1 + $0x2f8] sm:$0xff]   ;;  %v2015_v39 = vld [vmem:[%s2558_s1 + $0x250] sm:$0xff]  }
  0x18   :  { %1750 = vmatpush3.bf16.msra.mxu0 %v1952_v22  ;;  %v1997_v21 = vld [vmem:[%s2558_s1 + $0x238] sm:$0xff]   ;;  %v327_v22 = vcombine.high %v311_v17, %v311_v17  ;;  %v2008_v33 = vld [vmem:[%s2558_s1 + $0x2e0] sm:$0xff]   ;;  %v2016_v42 = vld [vmem:[%s2558_s1 + $0x2d0] sm:$0xff]  }
  0x19   :  { %1772 = vmatpush3.bf16.msra.mxu1 %v1953_v23  ;;  %1751 = vmatprep.subr.bf16.mxu0 %v1954_v24  ;;  %v1999_v23 = vld [vmem:[%s2558_s1 + $0x270] sm:$0xff]   ;;  %v1998_v24 = vld [vmem:[%s2558_s1 + $0x2b8] sm:$0xff]   ;;  %v2009_v34 = vld [vmem:[%s2558_s1 + $0x220] sm:$0xff]  }
  0x1a   :  { %1773 = vmatprep.subr.bf16.mxu1 %v1955_v25  ;;  %v2000_v25 = vld [vmem:[%s2558_s1 + $0x2f0] sm:$0xff]   ;;  %v2010_v36 = vld [vmem:[%s2558_s1 + $0x2a0] sm:$0xff]   ;;  %v2012_v37 = vld [vmem:[%s2558_s1 + $0x2d8] sm:$0xff]  }
  0x1b   :  { %v2014_v40 = vld [vmem:[%s2558_s1 + $0x298] sm:$0xff]   ;;  %v2017_v43 = vld [vmem:[%s2558_s1 + $0x210] sm:$0xff]   ;;  %v2019_v44 = vld [vmem:[%s2558_s1 + $0x248] sm:$0xff]  }
  0x1c   :  { %1752 = vmatpush3.bf16.msra.mxu0 %v1956_v26  ;;  %v2001_v26 = vld [vmem:[%s2558_s1 + $0x230] sm:$0xff]  }
  0x1d   :  { %1774 = vmatpush3.bf16.msra.mxu1 %v1957_v27  ;;  %1753 = vmatprep.subr.bf16.mxu0 %v1958_v29  ;;  %v2003_v27 = vld [vmem:[%s2558_s1 + $0x268] sm:$0xff]   ;;  %v2018_v46 = vld [vmem:[%s2558_s1 + $0x290] sm:$0xff]  }
  0x1e   :  { %1775 = vmatprep.subr.bf16.mxu1 %v1959_v30  ;;  %v2004_v29 = vld [vmem:[%s2558_s1 + $0x2e8] sm:$0xff]  }
  0x1f   :  { %v2005_v30 = vld [vmem:[%s2558_s1 + $0x228] sm:$0xff]  }
  0x20   :  { %1754 = vmatpush3.bf16.msra.mxu0 %v1960_v31  ;;  %v2007_v31 = vld [vmem:[%s2558_s1 + $0x260] sm:$0xff]  }
  0x21   :  { %1776 = vmatpush3.bf16.msra.mxu1 %v1961_v32  ;;  %1783 = vmatprep.subr.bf16.mxu0 %v1963_v35  ;;  %v2006_v32 = vld [vmem:[%s2558_s1 + $0x2a8] sm:$0xff]   ;;  %v2011_v35 = vld [vmem:[%s2558_s1 + $0x258] sm:$0xff]  }
  0x22   :  { %1805 = vmatprep.subr.bf16.mxu1 %v1964_v38  ;;  %v2013_v38 = vld [vmem:[%s2558_s1 + $0x218] sm:$0xff]  }
  0x23   :  { %1196 = vmatmul.mubr.bf16.vlgmr.msra.gmra.mxu0 %v304_v45  ;;  %v22_v45 = vld [vmem:[%s2557_s0 + $0x8] sm:$0xff] }
  0x24   :  { %1784 = vmatpush3.bf16.msra.mxu0 %v1965_v48  ;;  %1236 = vmatmul.mubr.bf16.vlgmr.msra.gmra.mxu1 %v326_v50  ;;  %v337_v47 = vrot.slane %v22_v45, %v2230_v41  ;;  %v330_v48 = vcombine.high %v22_v45, %v22_v45  ;;  %v2021_v50 = vld [vmem:[%s2558_s1 + $0x208] sm:$0xff]  }
  0x25   :  { %1785 = vmatprep.subr.bf16.mxu0 %v1967_v51  ;;  %1806 = vmatpush3.bf16.msra.mxu1 %v1966_v53  ;;  %v2023_v53 = vld [vmem:[%s2558_s1 + $0x240] sm:$0xff]  }
  0x26   :  { %1275 = vmatprep.mubr.bf16.mxu0 %v325_v49  ;;  %1807 = vmatprep.subr.bf16.mxu1 %v1968_v54  ;;  %v2020_v49 = vld [vmem:[%s2558_s1 + $0x2c8] sm:$0xff]   ;;  %v345_v51 = vcombine.high %v337_v47, %v337_v47  ;;  %v2419_v52 = vrot.slane %v330_v48, %v2230_v41 }
  0x27   :  { %1315 = vmatprep.mubr.bf16.mxu1 %v329_v55  ;;  %v2022_v54 = vld [vmem:[%s2558_s1 + $0x288] sm:$0xff]  }
  0x28   :  { %1786 = vmatpush3.bf16.msra.mxu0 %v1969_v56  ;;  %v367_v55 = vrot.slane %v345_v51, %v2230_v41  ;;  %v346_v56 = vcombine.high %v2419_v52, %v2419_v52 }
  0x29   :  { %1787 = vmatprep.subr.bf16.mxu0 %v1971_v57  ;;  %1808 = vmatpush3.bf16.msra.mxu1 %v1970_v58  ;;  %v2024_v57 = vld [vmem:[%s2558_s1 + $0x2c0] sm:$0xff]  }
  0x2a   :  { %1809 = vmatprep.subr.bf16.mxu1 %v1972_v59  ;;  %v2025_v58 = vld [vmem:[%s2558_s1 + $0x200] sm:$0xff]   ;;  %v377_v59 = vcombine.high %v367_v55, %v367_v55 }
  0x2c   :  { %1788 = vmatpush3.bf16.msra.mxu0 %v1973_v60  ;;  %v353_v60 = vrot.slane %v337_v47, %v2230_v41 }
  0x2d   :  { %1789 = vmatprep.subr.bf16.mxu0 %v1975_v61  ;;  %1810 = vmatpush3.bf16.msra.mxu1 %v1974_v62  ;;  %v2027_v61 = vld [vmem:[%s2558_s1 + $0x378] sm:$0xff]   ;;  %v2026_v62 = vld [vmem:[%s2558_s1 + $0x280] sm:$0xff]  }
  0x2e   :  { %1811 = vmatprep.subr.bf16.mxu1 %v1976_v63  ;;  %v374_v63 = vrot.slane %v346_v56, %v2230_v41 }
  0x30   :  { %1790 = vmatpush3.bf16.msra.mxu0 %v1977_v0  ;;  %v2028_v0 = vld [vmem:[%s2558_s1 + $0x3f8] sm:$0xff]  }
  0x31   :  { %1791 = vmatprep.subr.bf16.mxu0 %v1979_v1  ;;  %1812 = vmatpush3.bf16.msra.mxu1 %v1978_v2  ;;  %v2029_v1 = vld [vmem:[%s2558_s1 + $0x338] sm:$0xff]   ;;  %v375_v2 = vcombine.high %v353_v60, %v353_v60 }
  0x32   :  { %1813 = vmatprep.subr.bf16.mxu1 %v1980_v3  ;;  %v2031_v3 = vld [vmem:[%s2558_s1 + $0x370] sm:$0xff]  }
  0x34   :  { %1792 = vmatpush3.bf16.msra.mxu0 %v1981_v4  ;;  %v2030_v4 = vld [vmem:[%s2558_s1 + $0x3b8] sm:$0xff]  }
  0x35   :  { %1793 = vmatprep.subr.bf16.mxu0 %v1983_v5  ;;  %1814 = vmatpush3.bf16.msra.mxu1 %v1982_v6  ;;  %v378_v5 = vcombine.high %v374_v63, %v374_v63  ;;  %v2032_v6 = vld [vmem:[%s2558_s1 + $0x3f0] sm:$0xff]  }
  0x36   :  { %1815 = vmatprep.subr.bf16.mxu1 %v1984_v7  ;;  %v2033_v7 = vld [vmem:[%s2558_s1 + $0x330] sm:$0xff]  }
  0x38   :  { %1794 = vmatpush3.bf16.msra.mxu0 %v1985_v8  ;;  %v2035_v8 = vld [vmem:[%s2558_s1 + $0x368] sm:$0xff]  }
  0x39   :  { %1795 = vmatprep.subr.bf16.mxu0 %v1987_v9  ;;  %1816 = vmatpush3.bf16.msra.mxu1 %v1986_v10  ;;  %v2034_v9 = vld [vmem:[%s2558_s1 + $0x3b0] sm:$0xff]   ;;  %v2036_v10 = vld [vmem:[%s2558_s1 + $0x3e8] sm:$0xff]  }
  0x3a   :  { %1817 = vmatprep.subr.bf16.mxu1 %v1988_v11  ;;  %v2037_v11 = vld [vmem:[%s2558_s1 + $0x328] sm:$0xff]  }
  0x3c   :  { %1796 = vmatpush3.bf16.msra.mxu0 %v1989_v12  ;;  %v2039_v12 = vld [vmem:[%s2558_s1 + $0x360] sm:$0xff]  }
  0x3d   :  { %1797 = vmatprep.subr.bf16.mxu0 %v1991_v13  ;;  %1818 = vmatpush3.bf16.msra.mxu1 %v1990_v14  ;;  %v2038_v13 = vld [vmem:[%s2558_s1 + $0x3a8] sm:$0xff]   ;;  %v2040_v14 = vld [vmem:[%s2558_s1 + $0x3e0] sm:$0xff]  }
  0x3e   :  { %1819 = vmatprep.subr.bf16.mxu1 %v1992_v15  ;;  %v2041_v15 = vld [vmem:[%s2558_s1 + $0x320] sm:$0xff]  }
  0x40   :  { %1798 = vmatpush3.bf16.msra.mxu0 %v1993_v16  ;;  %v2043_v16 = vld [vmem:[%s2558_s1 + $0x358] sm:$0xff]  }
  0x41   :  { %1827 = vmatprep.subr.bf16.mxu0 %v1995_v18  ;;  %1820 = vmatpush3.bf16.msra.mxu1 %v1994_v19  ;;  %v2044_v18 = vld [vmem:[%s2558_s1 + $0x3d8] sm:$0xff]  }
  0x42   :  { %1849 = vmatprep.subr.bf16.mxu1 %v1996_v20  ;;  %v2045_v19 = vld [vmem:[%s2558_s1 + $0x318] sm:$0xff]   ;;  %v2047_v20 = vld [vmem:[%s2558_s1 + $0x350] sm:$0xff]  }
  0x43   :  { %1276 = vmatmul.mubr.bf16.vlgmr.msra.gmra.mxu0 %v311_v17  ;;  %v2042_v17 = vld [vmem:[%s2558_s1 + $0x3a0] sm:$0xff]  }
  0x44   :  { %1828 = vmatpush3.bf16.msra.mxu0 %v1997_v21  ;;  %1316 = vmatmul.mubr.bf16.vlgmr.msra.gmra.mxu1 %v327_v22  ;;  %v2046_v21 = vld [vmem:[%s2558_s1 + $0x398] sm:$0xff]   ;;  %v2048_v22 = vld [vmem:[%s2558_s1 + $0x3d0] sm:$0xff]  }
  0x45   :  { %1829 = vmatprep.subr.bf16.mxu0 %v1999_v23  ;;  %1850 = vmatpush3.bf16.msra.mxu1 %v1998_v24  ;;  %v2049_v23 = vld [vmem:[%s2558_s1 + $0x310] sm:$0xff]   ;;  %v2051_v24 = vld [vmem:[%s2558_s1 + $0x348] sm:$0xff]  }
  0x46   :  { %1851 = vmatprep.subr.bf16.mxu1 %v2000_v25  ;;  %1355 = vmatprep.mubr.bf16.mxu0 %v367_v55 }
  0x47   :  { %1395 = vmatprep.mubr.bf16.mxu1 %v377_v59 }
  0x48   :  { %1830 = vmatpush3.bf16.msra.mxu0 %v2001_v26 }
  0x49   :  { %1831 = vmatprep.subr.bf16.mxu0 %v2003_v27  ;;  %1852 = vmatpush3.bf16.msra.mxu1 %v2002_v28 }
  0x4a   :  { %1853 = vmatprep.subr.bf16.mxu1 %v2004_v29 }
  0x4c   :  { %1832 = vmatpush3.bf16.msra.mxu0 %v2005_v30 }
  0x4d   :  { %1833 = vmatprep.subr.bf16.mxu0 %v2007_v31  ;;  %1854 = vmatpush3.bf16.msra.mxu1 %v2006_v32 }
  0x4e   :  { %1855 = vmatprep.subr.bf16.mxu1 %v2008_v33 }
  0x50   :  { %1834 = vmatpush3.bf16.msra.mxu0 %v2009_v34 }
  0x51   :  { %1835 = vmatprep.subr.bf16.mxu0 %v2011_v35  ;;  %1856 = vmatpush3.bf16.msra.mxu1 %v2010_v36 }
  0x52   :  { %1857 = vmatprep.subr.bf16.mxu1 %v2012_v37 }
  0x54   :  { %1836 = vmatpush3.bf16.msra.mxu0 %v2013_v38 }
  0x55   :  { %1837 = vmatprep.subr.bf16.mxu0 %v2015_v39  ;;  %1858 = vmatpush3.bf16.msra.mxu1 %v2014_v40 }
  0x56   :  { %1859 = vmatprep.subr.bf16.mxu1 %v2016_v42 }
  0x58   :  { %1838 = vmatpush3.bf16.msra.mxu0 %v2017_v43 }
  0x59   :  { %1839 = vmatprep.subr.bf16.mxu0 %v2019_v44  ;;  %1860 = vmatpush3.bf16.msra.mxu1 %v2018_v46 }
  0x5a   :  { %1861 = vmatprep.subr.bf16.mxu1 %v2020_v49 }
  0x5c   :  { %1840 = vmatpush3.bf16.msra.mxu0 %v2021_v50 }
  0x5d   :  { %1841 = vmatprep.subr.bf16.mxu0 %v2023_v53  ;;  %1862 = vmatpush3.bf16.msra.mxu1 %v2022_v54 }
  0x5e   :  { %1863 = vmatprep.subr.bf16.mxu1 %v2024_v57 }
  0x60   :  { %1842 = vmatpush3.bf16.msra.mxu0 %v2025_v58 }
  0x61   :  { %1871 = vmatprep.subr.bf16.mxu0 %v2027_v61  ;;  %1864 = vmatpush3.bf16.msra.mxu1 %v2026_v62 }
  0x62   :  { %1893 = vmatprep.subr.bf16.mxu1 %v2028_v0 }
  0x63   :  { %1356 = vmatmul.mubr.bf16.vlgmr.msra.gmra.mxu0 %v353_v60 }
  0x64   :  { %1872 = vmatpush3.bf16.msra.mxu0 %v2029_v1  ;;  %1435 = vmatprep.mubr.bf16.mxu0 %v374_v63 }
  0x65   :  { %1396 = vmatmul.mubr.bf16.vlgmr.msra.gmra.mxu1 %v375_v2  ;;  %1873 = vmatprep.subr.bf16.mxu0 %v2031_v3 }
  0x66   :  { %1894 = vmatpush3.bf16.msra.mxu1 %v2030_v4  ;;  %1475 = vmatprep.mubr.bf16.mxu1 %v378_v5 }
  0x67   :  { %1895 = vmatprep.subr.bf16.mxu1 %v2032_v6 }
  0x68   :  { %1874 = vmatpush3.bf16.msra.mxu0 %v2033_v7 }
  0x69   :  { %1875 = vmatprep.subr.bf16.mxu0 %v2035_v8 }
  0x6a   :  { %1896 = vmatpush3.bf16.msra.mxu1 %v2034_v9 }
  0x6b   :  { %1897 = vmatprep.subr.bf16.mxu1 %v2036_v10 }
  0x6c   :  { %1876 = vmatpush3.bf16.msra.mxu0 %v2037_v11 }
  0x6d   :  { %1877 = vmatprep.subr.bf16.mxu0 %v2039_v12 }
  0x6e   :  { %1898 = vmatpush3.bf16.msra.mxu1 %v2038_v13 }
  0x6f   :  { %1899 = vmatprep.subr.bf16.mxu1 %v2040_v14 }
  0x70   :  { %1878 = vmatpush3.bf16.msra.mxu0 %v2041_v15 }
  0x71   :  { %1879 = vmatprep.subr.bf16.mxu0 %v2043_v16 }
  0x72   :  { %1900 = vmatpush3.bf16.msra.mxu1 %v2042_v17 }
  0x73   :  { %1901 = vmatprep.subr.bf16.mxu1 %v2044_v18 }
  0x74   :  { %1880 = vmatpush3.bf16.msra.mxu0 %v2045_v19 }
  0x75   :  { %1881 = vmatprep.subr.bf16.mxu0 %v2047_v20 }
  0x76   :  { %11 = vsyncpa [#allocation3], 0  ;;  %1902 = vmatpush3.bf16.msra.mxu1 %v2046_v21  ;;  %v2050_v25 = vld [vmem:[%s2558_s1 + $0x390] sm:$0xff]   ;;  %v2052_v26 = vld [vmem:[%s2558_s1 + $0x3c8] sm:$0xff]   ;;  %v360_v32 = vrot.slane %v2419_v52, %v2230_v41  ;;  %v2091_v36 = vmov 0.0   ;;  %vm2092_vm0 = vmmov 0  }
  0x77   :  { %1903 = vmatprep.subr.bf16.mxu1 %v2048_v22  ;;  %v2053_v27 = vld [vmem:[%s2558_s1 + $0x308] sm:$0xff]   ;;  %v2055_v28 = vld [vmem:[%s2558_s1 + $0x340] sm:$0xff]   ;;  %vm1492_vm1 = vcmask 130048   ;;  %vm1578_vm2 = vcmask 74752   ;;  %s2093_s0 = smov 118   ;;  %vm1576_vm3 = vcmask 1024  }
  0x78   :  { %1882 = vmatpush3.bf16.msra.mxu0 %v2049_v23  ;;  %v2054_v29 = vld [vmem:[%s2558_s1 + $0x388] sm:$0xff]   ;;  %v2056_v30 = vld [vmem:[%s2558_s1 + $0x3c0] sm:$0xff]   ;;  %v376_v34 = vcombine.high %v360_v32, %v360_v32  ;;  %s2094_s30 = smov [#allocation2]  }
  0x79   :  { %1883 = vmatprep.subr.bf16.mxu0 %v2051_v24  ;;  %v2057_v31 = vld [vmem:[%s2558_s1 + $0x300] sm:$0xff]   ;;  %v1484_v35 = vld [vmem:[%s2559_s2 + $0x8] sm:$0xff]  ;;  %s1599_s6 = sshll.u32 %s2094_s30, 4  ;;  %s1600_s6 = int_to_ptr.vmem [resolvable:$true] %s1599_s6 }
  0x7a   :  { %1904 = vmatpush3.bf16.msra.mxu1 %v2050_v25  ;;  %v2058_v33 = vld [vmem:[%s2558_s1 + $0x380] sm:$0xff]   ;;  %s2068_s7 = scalar_lea.vmem %s1600_s6, 32  ;;  %p2073_p1 = scmp.lt.s32.totalorder %s1600_s6, %s1600_s6 }
  0x7b   :  { %1905 = vmatprep.subr.bf16.mxu1 %v2052_v26  ;;  %v1483_v41 = vld [vmem:[%s2559_s2] sm:$0xff]  ;;  %p2069_p0 = scmp.ne.s32.totalorder %s1600_s6, %s2068_s7  ;;  %p2074_p2 = scmp.lt.s32.totalorder %s2068_s7, %s2068_s7 }
  0x7c   :  { %1884 = vmatpush3.bf16.msra.mxu0 %v2053_v27  ;;  %v1737_v21 = vld [vmem:[%s2560_s3] ss:$0 sm:$0xff] }
  0x7d   :  { %1885 = vmatprep.subr.bf16.mxu0 %v2055_v28  ;;  %p2075_p3 = por %p2074_p2, %p2073_p1 }
  0x7e   :  { %1906 = vmatpush3.bf16.msra.mxu1 %v2054_v29 }
  0x7f   :  { %1907 = vmatprep.subr.bf16.mxu1 %v2056_v30  ;;  %p2076_p4 = pnand %p2075_p3, %p2069_p0 }
  0x80   :  { %1886 = vmatpush3.bf16.msra.mxu0 %v2057_v31 }
  0x81   :  { %1918 = vmatprep.subr.mxu0 %v2091_v36 }
  0x82   :  { %1908 = vmatpush3.bf16.msra.mxu1 %v2058_v33 }
  0x83   :  { %1436 = vmatmul.mubr.bf16.vlgmr.msra.gmra.mxu0 %v360_v32 }
  0x84   :  { %1919 = vmatpush3.msra.mxu0 %v1484_v35  ;;  %1922 = vmatprep.mubr.msk.f32.mxu0 %vm2092_vm0, %v2091_v36 }
  0x85   :  { %1476 = vmatmul.mubr.bf16.vlgmr.msra.gmra.mxu1 %v376_v34  ;;  %1920 = vmatprep.subr.mxu0 %v2091_v36 }
  0x86   :  { %1921 = vmatpush3.msra.mxu0 %v1483_v41 }
  0xe3   :  { %v1755_v37 = vpop.f32.mrf.mxu0 }
  0xe4   :  { %v1777_v38 = vpop.f32.mrf.mxu1 }
  0xe5   :  { %v1756_v39 = vpop.f32.mrf.mxu0 }
  0xe6   :  { %v1757_v40 = vadd.f32 %v1756_v39, %v1755_v37  ;;  %v1778_v42 = vpop.f32.mrf.mxu1 }
  0xe7   :  { %v1758_v43 = vpop.f32.mrf.mxu0  ;;  %v1779_v44 = vadd.f32 %v1778_v42, %v1777_v38 }
  0xe8   :  { %v1780_v45 = vpop.f32.mrf.mxu1 }
  0xe9   :  { %v1759_v46 = vpop.f32.mrf.mxu0  ;;  %v1238_v47 = vadd.f32 %v1779_v44, %v1757_v40 }
  0xea   :  { %v1781_v48 = vpop.f32.mrf.mxu1 }
 0x103   :  { %v1799_v49 = vpop.f32.mrf.mxu0 }
 0x104   :  { %v1821_v50 = vpop.f32.mrf.mxu1 }
 0x105   :  { %v1800_v51 = vpop.f32.mrf.mxu0 }
 0x106   :  { %v1822_v52 = vpop.f32.mrf.mxu1  ;;  %v1801_v1 = vadd.f32 %v1800_v51, %v1799_v49 }
 0x107   :  { %v1802_v53 = vpop.f32.mrf.mxu0  ;;  %v1823_v3 = vadd.f32 %v1822_v52, %v1821_v50 }
 0x108   :  { %v1824_v54 = vpop.f32.mrf.mxu1  ;;  %v1278_v2 = vadd.f32 %v1801_v1, %v1238_v47 }
 0x109   :  { %v1803_v55 = vpop.f32.mrf.mxu0 }
 0x10a   :  { %v1825_v56 = vpop.f32.mrf.mxu1  ;;  %v1318_v5 = vadd.f32 %v1823_v3, %v1278_v2 }
 0x123   :  { %v1843_v57 = vpop.f32.mrf.mxu0 }
 0x125   :  { %v1865_v58 = vpop.f32.mrf.mxu1  ;;  %v1844_v59 = vpop.f32.mrf.mxu0 }
 0x126   :  { %v1845_v4 = vadd.f32 %v1844_v59, %v1843_v57 }
 0x127   :  { %v1866_v60 = vpop.f32.mrf.mxu1  ;;  %v1846_v61 = vpop.f32.mrf.mxu0 }
 0x128   :  { %v1358_v6 = vadd.f32 %v1845_v4, %v1318_v5  ;;  %v1867_v7 = vadd.f32 %v1866_v60, %v1865_v58 }
 0x129   :  { %v1868_v62 = vpop.f32.mrf.mxu1  ;;  %v1847_v63 = vpop.f32.mrf.mxu0 }
 0x12a   :  { %v1398_v11 = vadd.f32 %v1867_v7, %v1358_v6 }
 0x12b   :  { %v1869_v0 = vpop.f32.mrf.mxu1 }
 0x143   :  { %v1887_v8 = vpop.f32.mrf.mxu0 }
 0x145   :  { %v1909_v9 = vpop.f32.mrf.mxu1  ;;  %v1888_v10 = vpop.f32.mrf.mxu0 }
 0x146   :  { %v1889_v12 = vadd.f32 %v1888_v10, %v1887_v8 }
 0x147   :  { %v1910_v13 = vpop.f32.mrf.mxu1  ;;  %v1890_v14 = vpop.f32.mrf.mxu0 }
 0x148   :  { %v1438_v15 = vadd.f32 %v1889_v12, %v1398_v11  ;;  %v1911_v16 = vadd.f32 %v1910_v13, %v1909_v9 }
 0x149   :  { %v1912_v17 = vpop.f32.mrf.mxu1  ;;  %v1891_v18 = vpop.f32.mrf.mxu0 }
 0x14a   :  { %v1478_v19 = vadd.f32 %v1911_v16, %v1438_v15 }
 0x14b   :  { %v1913_v20 = vpop.f32.mrf.mxu1 }
 0x14c   :  { %1923 = vmatmul.mubr.msk.f32.vlgmr.msra.gmra.mxu0 %vm1492_vm1, %v1478_v19 }
 0x20c   :  { %v1562_v22 = vpop.f32.mrf.mxu0 }
 0x20d   :  { %v1563_v23 = vadd.f32 %v1737_v21, %v1562_v22 }
 0x20e   :  { %v1924_v24 = vpop.f32.mrf.mxu0 }
 0x20f   :  { %v1566_v25 = vsub.f32 0.0, %v1563_v23  ;;  %v1579_v26 = vsel %vm1578_vm2, %v1563_v23, -inf }
 0x210   :  { %1580 = vmax.xlane.f32.xlu0 %v1579_v26 }
 0x211   :  { %v1567_v27 = vmul.f32 1.442695, %v1566_v25 }
 0x213   :  { %2060 = vpow2.f32 %v1567_v27 }
 0x220   :  { %v2061_v28 = vpop.eup %2060 }
 0x221   :  { %v1569_v29 = vadd.f32 1.0, %v2061_v28 }
 0x223   :  { %2062 = vrcp.f32 %v1569_v29 }
 0x230   :  { %v2063_v30 = vpop.eup %2062 }
 0x231   :  { %1573 = vrot.lane.b32.xlu1 %v2063_v30, %s2093_s0 }
 0x299   :  { %v1581_v31 = vpop.xlane.xlu0 %1580 }
 0x29a   :  { %v1582_v32 = vsub.f32 %v1563_v23, %v1581_v31 }
 0x29c   :  { %v1583_v33 = vmul.f32 1.442695, %v1582_v32 }
 0x29e   :  { %2064 = vpow2.f32 %v1583_v33 }
 0x2a3   :  { %v1574_v34 = vpop.permute.xlu1 %1573 }
 0x2a4   :  { %1577 = vst.msk [vmem:[%s2561_s4] sm:$0x3] %vm1576_vm3, %v1574_v34 }
 0x2ab   :  { %v2065_v35 = vpop.eup %2064 }
 0x2ac   :  { %v1585_v36 = vsel %vm1578_vm2, %v2065_v35, 0.0 }
 0x2ad   :  { %1586 = vadd.xlane.f32.xlu0 %v1585_v36 }
 0x336   :  { %v1587_v41 = vpop.xlane.xlu0 %1586 }
 0x337   :  { %2066 = vrcp.f32 %v1587_v41 }
 0x344   :  { %v2067_v37 = vpop.eup %2066 }
 0x345   :  { %v1589_v38 = vmul.f32 %v2067_v37, %v2065_v35 }
 0x347   :  { %1590 = vst.msk [vmem:[#allocation2] sm:$0x3] %vm1578_vm2, %v1589_v38 }
 0x348   :  { %2079 = shalt.err (!%p2076_p4)
}
 0x349   :  { %1602 = dma.vmem_to_hbm [thread:$0]  %s1600_s6, 32, %s2562_s5, [#allocation3]  }
 0x34a   :  { %2088 = dma.done.wait [#allocation3], 32  }
 0x34b   :  { %2089 = vsyncadd [#allocation3], 4294967264 }
 0x34c   :  { %1608 = vsyncpa [#allocation3], 1 }

</bundles_post_ra>
